<compile_context>
chip_gen: v6e
topology: v6e:2x2x1
jax: 0.10.0
libtpu: 0.0.40
codegen_flags: <defaults>
</compile_context>

<pallas_src>
import functools

import jax
import jax.numpy as jnp
from jax import lax
from jax.experimental import pallas as pl
from jax.experimental.pallas import tpu as pltpu

MAX_LENGTH = 10
LANE = 128


def _fused_attn_decoder_kernel(
    # scalar prefetch
    tok_ref,                           # SMEM (num_steps,) int32 token ids
    # VMEM-resident inputs (full-array blocks, constant index map)
    emb_ref,                           # (V, H)   embedding table
    h0_ref,                            # (1, H)   initial hidden state
    enc_ref,                           # (L, H)   encoder outputs
    attn_we_ref, attn_wh_ref,          # (H, L), (H, L)   attn Linear, split halves
    attn_b_ref,                        # (1, L)
    comb_we_ref, comb_wa_ref,          # (H, H), (H, H)   attn_combine, split halves
    comb_b_ref,                        # (1, H)
    wih_ref, bih_ref,                  # (H, 3*GP), (1, 3*GP)  GRU W_ih^T, lane-padded per gate
    whh_ref, bhh_ref,                  # (H, 3*GP), (1, 3*GP)  GRU W_hh^T, lane-padded per gate
    out_w_ref,                         # (H, V)   out Linear weight (transposed)
    out_b_ref,                         # (1, V)
    # full-resident outputs
    logp_ref,                          # (num_steps, V)
    hid_ref,                           # (num_steps, H)
    attnw_ref,                         # (num_steps, L)
):
    num_steps = logp_ref.shape[0]
    H = h0_ref.shape[1]
    GP = wih_ref.shape[1] // 3         # lane-padded gate pitch (multiple of 128)

    dot = functools.partial(jnp.dot, preferred_element_type=jnp.float32)

    # Hoist all weights out of the step loop (single load each).
    enc = enc_ref[...]
    attn_we = attn_we_ref[...]
    attn_wh = attn_wh_ref[...]
    attn_b = attn_b_ref[...]
    comb_we = comb_we_ref[...]
    comb_wa = comb_wa_ref[...]
    comb_b = comb_b_ref[...]
    wih = wih_ref[...]
    bih = bih_ref[...]
    whh = whh_ref[...]
    bhh = bhh_ref[...]
    out_w = out_w_ref[...]
    out_b = out_b_ref[...]

    def step(s, h):
        # --- embedding row lookup (token ids clamped in the wrapper) --------
        tok = tok_ref[s]
        embedded = emb_ref[pl.ds(tok, 1), :]             # (1, H)
        # Dropout(p=0.1) is identity at inference time.
        # TODO(synk): training-mode dropout (pltpu.prng_*) not implemented.

        # --- attention weights: softmax(Linear(cat(embedded, hidden))) ------
        attn_logits = (dot(embedded, attn_we) + dot(h, attn_wh) + attn_b)  # (1, L)
        m = jnp.max(attn_logits, axis=1, keepdims=True)
        e = jnp.exp(attn_logits - m)
        attn_w = e / jnp.sum(e, axis=1, keepdims=True)   # exact divide
        attnw_ref[pl.ds(s, 1), :] = attn_w

        # --- apply attention over encoder outputs (the bmm) -----------------
        attn_applied = dot(attn_w, enc)                  # (1, H)

        # --- combine + relu (concat replaced by split matmuls) --------------
        x = dot(embedded, comb_we) + dot(attn_applied, comb_wa) + comb_b
        x = jnp.maximum(x, 0.0)                          # (1, H)

        # --- GRU cell, PyTorch gate order (r, z, n) --------------------------
        # Two fused matmuls on lane-padded weights; each gate sits at lane
        # offset g*GP, so gate extraction is a tile-aligned slice.
        gi = dot(x, wih) + bih                           # (1, 3*GP)
        gh = dot(h, whh) + bhh                           # (1, 3*GP)
        r = jax.nn.sigmoid(gi[:, 0:H] + gh[:, 0:H])
        z = jax.nn.sigmoid(gi[:, GP:GP + H] + gh[:, GP:GP + H])
        n = jnp.tanh(gi[:, 2 * GP:2 * GP + H] + r * gh[:, 2 * GP:2 * GP + H])
        h_new = (1.0 - z) * n + z * h                    # (1, H)
        hid_ref[pl.ds(s, 1), :] = h_new

        # --- output projection + log_softmax (off the recurrent path) -------
        logits = dot(h_new, out_w) + out_b               # (1, V)
        m2 = jnp.max(logits, axis=1, keepdims=True)
        shifted = logits - m2
        lse = jnp.log(jnp.sum(jnp.exp(shifted), axis=1, keepdims=True))
        logp_ref[pl.ds(s, 1), :] = shifted - lse

        return h_new

    # Fully unroll for small fixed step counts so the scheduler sees the
    # whole straight-line rollout; fall back to a rolled loop for long ones.
    lax.fori_loop(0, num_steps, step, h0_ref[...], unroll=bool(num_steps <= 32))


def attn_decoder_rollout(tokens, hidden, encoder_outputs, params,
                         *, hidden_size, output_size, max_length):
    """Runs the AttnDecoderRNN forward for every token in `tokens` (teacher
    forcing) inside ONE fused Pallas kernel invocation.

    tokens: (num_steps,) int; hidden: (1,1,H); encoder_outputs: (L,H).
    Returns (log_probs (S,V), hiddens (S,H), attn_weights (S,L)).
    """
    H, V, L = hidden_size, output_size, max_length
    GP = ((H + LANE - 1) // LANE) * LANE    # lane-padded gate pitch

    tokens = jnp.clip(jnp.reshape(tokens, (-1,)).astype(jnp.int32), 0, V - 1)
    num_steps = int(tokens.shape[0])
    h0 = jnp.reshape(hidden, (1, H)).astype(jnp.float32)
    enc = jnp.asarray(encoder_outputs, jnp.float32)

    f32 = lambda a: jnp.asarray(a, jnp.float32)
    attn_w, comb_w = f32(params["attn_w"]), f32(params["comb_w"])

    def pack_gate_cols(a):
        # (rows, 3H) -> (rows, 3*GP): gate g occupies lanes [g*GP, g*GP + H).
        rows = a.shape[0]
        out = jnp.zeros((rows, 3 * GP), jnp.float32)
        for g in range(3):
            out = out.at[:, g * GP:g * GP + H].set(a[:, g * H:(g + 1) * H])
        return out

    wih_p = pack_gate_cols(f32(params["wih"]))
    bih_p = pack_gate_cols(f32(params["bih"]))
    whh_p = pack_gate_cols(f32(params["whh"]))
    bhh_p = pack_gate_cols(f32(params["bhh"]))

    operands = [
        f32(params["emb"]), h0, enc,
        attn_w[:H], attn_w[H:], f32(params["attn_b"]),
        comb_w[:H], comb_w[H:], f32(params["comb_b"]),
        wih_p, bih_p, whh_p, bhh_p,
        f32(params["out_w"]), f32(params["out_b"]),
    ]

    # All operands are VMEM-resident for the whole fused decode: full-array
    # block, constant block index -> one HBM->VMEM DMA per array.
    # TODO(synk): at production vocab sizes keep emb in HBM (one-step-ahead
    # row DMA), tile out_w over V, and use pl.Buffered(1)/memory_space VMEM
    # specs to skip double-buffer allocation for the constant operands.
    in_specs = [pl.BlockSpec(op.shape, lambda i, tok: (0, 0)) for op in operands]

    out_shape = (
        jax.ShapeDtypeStruct((num_steps, V), jnp.float32),
        jax.ShapeDtypeStruct((num_steps, H), jnp.float32),
        jax.ShapeDtypeStruct((num_steps, L), jnp.float32),
    )
    out_specs = (
        pl.BlockSpec((num_steps, V), lambda i, tok: (0, 0)),
        pl.BlockSpec((num_steps, H), lambda i, tok: (0, 0)),
        pl.BlockSpec((num_steps, L), lambda i, tok: (0, 0)),
    )

    grid_spec = pltpu.PrefetchScalarGridSpec(
        num_scalar_prefetch=1,
        grid=(1,),
        in_specs=in_specs,
        out_specs=out_specs,
        scratch_shapes=[],
    )

    flops_per_step = 6 * H * L + 8 * H * H + 12 * H * GP + 2 * H * V
    weight_bytes = sum(int(op.size) for op in operands) * 4
    cost = pl.CostEstimate(
        flops=num_steps * flops_per_step,
        transcendentals=num_steps * (L + V + 3 * H + 2),
        bytes_accessed=weight_bytes + num_steps * (V + H + L + 1) * 4,
    )

    logp, hid, attn = pl.pallas_call(
        _fused_attn_decoder_kernel,
        out_shape=out_shape,
        grid_spec=grid_spec,
        compiler_params=pltpu.CompilerParams(
            dimension_semantics=("arbitrary",),
            vmem_limit_bytes=4 * 1024 * 1024,   # footprint << 1 MiB; v7x headroom
        ),
        cost_estimate=cost,
    )(tokens, *operands)

    return logp, hid, attn


def attn_decoder_forward(token, hidden, encoder_outputs, params,
                         *, hidden_size, output_size, max_length):
    """Single decoder step with PyTorch AttnDecoderRNN return shapes."""
    logp, hid, attn = attn_decoder_rollout(
        jnp.reshape(token, (1,)), hidden, encoder_outputs, params,
        hidden_size=hidden_size, output_size=output_size, max_length=max_length)
    return logp, hid.reshape(1, 1, hidden_size), attn


# ----------------------------- pure-JAX reference ---------------------------
def _reference_step(token, hidden, encoder_outputs, params, *, hidden_size):
    H = hidden_size
    embedded = params["emb"][token].reshape(1, H)
    h = hidden.reshape(1, H)
    cat1 = jnp.concatenate([embedded, h], axis=1)
    attn_w = jax.nn.softmax(cat1 @ params["attn_w"] + params["attn_b"], axis=1)
    attn_applied = attn_w @ encoder_outputs
    cat2 = jnp.concatenate([embedded, attn_applied], axis=1)
    x = jax.nn.relu(cat2 @ params["comb_w"] + params["comb_b"])
    gi = x @ params["wih"] + params["bih"]
    gh = h @ params["whh"] + params["bhh"]
    r = jax.nn.sigmoid(gi[:, :H] + gh[:, :H])
    z = jax.nn.sigmoid(gi[:, H:2 * H] + gh[:, H:2 * H])
    n = jnp.tanh(gi[:, 2 * H:] + r * gh[:, 2 * H:])
    h_new = (1.0 - z) * n + z * h
    logp = jax.nn.log_softmax(h_new @ params["out_w"] + params["out_b"], axis=1)
    return logp, h_new, attn_w


def _reference_rollout(tokens, hidden, encoder_outputs, params, *, hidden_size):
    h = hidden.reshape(1, hidden_size)
    logps, hs, aws = [], [], []
    for t in range(int(tokens.shape[0])):
        logp, h, aw = _reference_step(tokens[t], h, encoder_outputs, params,
                                      hidden_size=hidden_size)
        logps.append(logp[0]); hs.append(h[0]); aws.append(aw[0])
    return jnp.stack(logps), jnp.stack(hs), jnp.stack(aws)


def init_params(key, hidden_size, output_size, max_length):
    H, V, L = hidden_size, output_size, max_length
    ks = jax.random.split(key, 10)
    u = lambda k, shape, fan_in: jax.random.uniform(
        k, shape, jnp.float32, -1.0 / jnp.sqrt(fan_in), 1.0 / jnp.sqrt(fan_in))
    return {
        "emb":    jax.random.normal(ks[0], (V, H), jnp.float32),
        "attn_w": u(ks[1], (2 * H, L), 2 * H),
        "attn_b": u(ks[2], (1, L), 2 * H),
        "comb_w": u(ks[3], (2 * H, H), 2 * H),
        "comb_b": u(ks[4], (1, H), 2 * H),
        "wih":    u(ks[5], (H, 3 * H), H),
        "bih":    u(ks[6], (1, 3 * H), H),
        "whh":    u(ks[7], (H, 3 * H), H),
        "bhh":    u(ks[8], (1, 3 * H), H),
        "out_w":  u(ks[9], (H, V), H),
        "out_b":  jnp.zeros((1, V), jnp.float32),
    }


if __name__ == "__main__":
    H, V, L = 32, 20, MAX_LENGTH          # hidden_size, output_size, max_length
    NUM_STEPS = 6                         # fused teacher-forced decode steps

    key = jax.random.PRNGKey(0)
    kp, kh, ke, kt = jax.random.split(key, 4)
    params = init_params(kp, H, V, L)

    tokens = jax.random.randint(kt, (NUM_STEPS,), 0, V, dtype=jnp.int32)
    hidden0 = jax.random.normal(kh, (1, 1, H), jnp.float32)   # initHidden-like
    encoder_outputs = jax.random.normal(ke, (L, H), jnp.float32)

    # Fused multi-step decode in ONE Pallas kernel invocation.
    logp, hid, attn = attn_decoder_rollout(
        tokens, hidden0, encoder_outputs, params,
        hidden_size=H, output_size=V, max_length=L)
    jax.block_until_ready((logp, hid, attn))

    # Validate against the pure-JAX reference rollout.
    ref_logp, ref_hid, ref_attn = _reference_rollout(
        tokens, hidden0, encoder_outputs, params, hidden_size=H)
    assert jnp.allclose(logp, ref_logp, atol=2e-3, rtol=2e-3)
    assert jnp.allclose(hid, ref_hid, atol=2e-3, rtol=2e-3)
    assert jnp.allclose(attn, ref_attn, atol=2e-3, rtol=2e-3)

    # Single-step API matching the PyTorch forward shapes.
    logp1, hid1, attn1 = attn_decoder_forward(
        tokens[0], hidden0, encoder_outputs, params,
        hidden_size=H, output_size=V, max_length=L)
    jax.block_until_ready((logp1, hid1, attn1))
    assert logp1.shape == (1, V) and hid1.shape == (1, 1, H) and attn1.shape == (1, L)
    assert jnp.allclose(logp1[0], logp[0], atol=2e-3, rtol=2e-3)

    print("KERNEL_OK")
</pallas_src>

<mosaic_0001>
module attributes {stable_mosaic.version = 11 : i64} {
  func.func @_fused_attn_decoder_kernel(%arg0: i32, %arg1: memref<6xi32, #tpu.memory_space<smem>>, %arg2: memref<20x32xf32, #tpu.memory_space<vmem>>, %arg3: memref<1x32xf32, #tpu.memory_space<vmem>>, %arg4: memref<10x32xf32, #tpu.memory_space<vmem>>, %arg5: memref<32x10xf32, #tpu.memory_space<vmem>>, %arg6: memref<32x10xf32, #tpu.memory_space<vmem>>, %arg7: memref<1x10xf32, #tpu.memory_space<vmem>>, %arg8: memref<32x32xf32, #tpu.memory_space<vmem>>, %arg9: memref<32x32xf32, #tpu.memory_space<vmem>>, %arg10: memref<1x32xf32, #tpu.memory_space<vmem>>, %arg11: memref<32x384xf32, #tpu.memory_space<vmem>>, %arg12: memref<1x384xf32, #tpu.memory_space<vmem>>, %arg13: memref<32x384xf32, #tpu.memory_space<vmem>>, %arg14: memref<1x384xf32, #tpu.memory_space<vmem>>, %arg15: memref<32x20xf32, #tpu.memory_space<vmem>>, %arg16: memref<1x20xf32, #tpu.memory_space<vmem>>, %arg17: memref<6x20xf32, #tpu.memory_space<vmem>>, %arg18: memref<6x32xf32, #tpu.memory_space<vmem>>, %arg19: memref<6x10xf32, #tpu.memory_space<vmem>>) attributes {dimension_semantics = [#tpu.dimension_semantics<arbitrary>], iteration_bounds = array<i64: 1>, scalar_prefetch = 1 : i64, scratch_operands = 0 : i64, tpu.core_type = #tpu.core_type<tc>, window_params = [{pipeline_mode = #tpu.pipeline_mode<synchronous>, transform_indices = @transform_0, window_bounds = array<i64: 20, 32>}, {pipeline_mode = #tpu.pipeline_mode<synchronous>, transform_indices = @transform_1, window_bounds = array<i64: 1, 32>}, {pipeline_mode = #tpu.pipeline_mode<synchronous>, transform_indices = @transform_2, window_bounds = array<i64: 10, 32>}, {pipeline_mode = #tpu.pipeline_mode<synchronous>, transform_indices = @transform_3, window_bounds = array<i64: 32, 10>}, {pipeline_mode = #tpu.pipeline_mode<synchronous>, transform_indices = @transform_4, window_bounds = array<i64: 32, 10>}, {pipeline_mode = #tpu.pipeline_mode<synchronous>, transform_indices = @transform_5, window_bounds = array<i64: 1, 10>}, {pipeline_mode = #tpu.pipeline_mode<synchronous>, transform_indices = @transform_6, window_bounds = array<i64: 32, 32>}, {pipeline_mode = #tpu.pipeline_mode<synchronous>, transform_indices = @transform_7, window_bounds = array<i64: 32, 32>}, {pipeline_mode = #tpu.pipeline_mode<synchronous>, transform_indices = @transform_8, window_bounds = array<i64: 1, 32>}, {pipeline_mode = #tpu.pipeline_mode<synchronous>, transform_indices = @transform_9, window_bounds = array<i64: 32, 384>}, {pipeline_mode = #tpu.pipeline_mode<synchronous>, transform_indices = @transform_10, window_bounds = array<i64: 1, 384>}, {pipeline_mode = #tpu.pipeline_mode<synchronous>, transform_indices = @transform_11, window_bounds = array<i64: 32, 384>}, {pipeline_mode = #tpu.pipeline_mode<synchronous>, transform_indices = @transform_12, window_bounds = array<i64: 1, 384>}, {pipeline_mode = #tpu.pipeline_mode<synchronous>, transform_indices = @transform_13, window_bounds = array<i64: 32, 20>}, {pipeline_mode = #tpu.pipeline_mode<synchronous>, transform_indices = @transform_14, window_bounds = array<i64: 1, 20>}, {pipeline_mode = #tpu.pipeline_mode<synchronous>, transform_indices = @transform_15, window_bounds = array<i64: 6, 20>}, {pipeline_mode = #tpu.pipeline_mode<synchronous>, transform_indices = @transform_16, window_bounds = array<i64: 6, 32>}, {pipeline_mode = #tpu.pipeline_mode<synchronous>, transform_indices = @transform_17, window_bounds = array<i64: 6, 10>}]} {
    %c0 = arith.constant 0 : index
    %c0_0 = arith.constant 0 : index
    %0 = vector.load %arg4[%c0, %c0_0] : memref<10x32xf32, #tpu.memory_space<vmem>>, vector<10x32xf32>
    %c0_1 = arith.constant 0 : index
    %c0_2 = arith.constant 0 : index
    %1 = vector.load %arg5[%c0_1, %c0_2] : memref<32x10xf32, #tpu.memory_space<vmem>>, vector<32x10xf32>
    %c0_3 = arith.constant 0 : index
    %c0_4 = arith.constant 0 : index
    %2 = vector.load %arg6[%c0_3, %c0_4] : memref<32x10xf32, #tpu.memory_space<vmem>>, vector<32x10xf32>
    %c0_5 = arith.constant 0 : index
    %c0_6 = arith.constant 0 : index
    %3 = vector.load %arg7[%c0_5, %c0_6] : memref<1x10xf32, #tpu.memory_space<vmem>>, vector<1x10xf32>
    %c0_7 = arith.constant 0 : index
    %c0_8 = arith.constant 0 : index
    %4 = vector.load %arg8[%c0_7, %c0_8] : memref<32x32xf32, #tpu.memory_space<vmem>>, vector<32x32xf32>
    %c0_9 = arith.constant 0 : index
    %c0_10 = arith.constant 0 : index
    %5 = vector.load %arg9[%c0_9, %c0_10] : memref<32x32xf32, #tpu.memory_space<vmem>>, vector<32x32xf32>
    %c0_11 = arith.constant 0 : index
    %c0_12 = arith.constant 0 : index
    %6 = vector.load %arg10[%c0_11, %c0_12] : memref<1x32xf32, #tpu.memory_space<vmem>>, vector<1x32xf32>
    %c0_13 = arith.constant 0 : index
    %c0_14 = arith.constant 0 : index
    %7 = vector.load %arg11[%c0_13, %c0_14] : memref<32x384xf32, #tpu.memory_space<vmem>>, vector<32x384xf32>
    %c0_15 = arith.constant 0 : index
    %c0_16 = arith.constant 0 : index
    %8 = vector.load %arg12[%c0_15, %c0_16] : memref<1x384xf32, #tpu.memory_space<vmem>>, vector<1x384xf32>
    %c0_17 = arith.constant 0 : index
    %c0_18 = arith.constant 0 : index
    %9 = vector.load %arg13[%c0_17, %c0_18] : memref<32x384xf32, #tpu.memory_space<vmem>>, vector<32x384xf32>
    %c0_19 = arith.constant 0 : index
    %c0_20 = arith.constant 0 : index
    %10 = vector.load %arg14[%c0_19, %c0_20] : memref<1x384xf32, #tpu.memory_space<vmem>>, vector<1x384xf32>
    %c0_21 = arith.constant 0 : index
    %c0_22 = arith.constant 0 : index
    %11 = vector.load %arg15[%c0_21, %c0_22] : memref<32x20xf32, #tpu.memory_space<vmem>>, vector<32x20xf32>
    %c0_23 = arith.constant 0 : index
    %c0_24 = arith.constant 0 : index
    %12 = vector.load %arg16[%c0_23, %c0_24] : memref<1x20xf32, #tpu.memory_space<vmem>>, vector<1x20xf32>
    %c0_25 = arith.constant 0 : index
    %c0_26 = arith.constant 0 : index
    %13 = vector.load %arg3[%c0_25, %c0_26] : memref<1x32xf32, #tpu.memory_space<vmem>>, vector<1x32xf32>
    %c0_i32 = arith.constant 0 : i32
    %14 = arith.index_cast %c0_i32 : i32 to index
    %15 = memref.load %arg1[%14] : memref<6xi32, #tpu.memory_space<smem>>
    %16 = arith.index_cast %15 : i32 to index
    %c0_27 = arith.constant 0 : index
    %17 = vector.load %arg2[%16, %c0_27] : memref<20x32xf32, #tpu.memory_space<vmem>>, vector<1x32xf32>
    %cst = arith.constant dense<0.000000e+00> : vector<1x10xf32>
    %18 = tpu.matmul %17, %1, %cst {dimension_numbers = #tpu.dot_dimension_numbers<[1], [0], [0], [1], [0, 0, 1, 1], [], []>} : vector<1x32xf32>, vector<32x10xf32>, vector<1x10xf32> -> vector<1x10xf32>
    %cst_28 = arith.constant dense<0.000000e+00> : vector<1x10xf32>
    %19 = tpu.matmul %13, %2, %cst_28 {dimension_numbers = #tpu.dot_dimension_numbers<[1], [0], [0], [1], [0, 0, 1, 1], [], []>} : vector<1x32xf32>, vector<32x10xf32>, vector<1x10xf32> -> vector<1x10xf32>
    %20 = arith.addf %18, %19 : vector<1x10xf32>
    %21 = arith.addf %20, %3 : vector<1x10xf32>
    %cst_29 = arith.constant dense<0xFF800000> : vector<1xf32>
    %22 = vector.multi_reduction <maximumf>, %21, %cst_29 [1] : vector<1x10xf32> to vector<1xf32>
    %23 = vector.shape_cast %22 : vector<1xf32> to vector<1x1xf32>
    %24 = vector.broadcast %23 : vector<1x1xf32> to vector<1x10xf32>
    %25 = arith.subf %21, %24 : vector<1x10xf32>
    %26 = math.exp %25 : vector<1x10xf32>
    %cst_30 = arith.constant dense<0.000000e+00> : vector<1xf32>
    %27 = vector.multi_reduction <add>, %26, %cst_30 [1] : vector<1x10xf32> to vector<1xf32>
    %28 = vector.shape_cast %27 : vector<1xf32> to vector<1x1xf32>
    %29 = vector.broadcast %28 : vector<1x1xf32> to vector<1x10xf32>
    %30 = arith.divf %26, %29 : vector<1x10xf32>
    %31 = arith.index_cast %c0_i32 : i32 to index
    %c0_31 = arith.constant 0 : index
    %32 = vector.load %arg19[%31, %c0_31] : memref<6x10xf32, #tpu.memory_space<vmem>>, vector<1x10xf32>
    tpu.vector_store %arg19[%31, %c0_31], %30 {strides = array<i32>} : memref<6x10xf32, #tpu.memory_space<vmem>>, vector<1x10xf32>,
    %cst_32 = arith.constant dense<0.000000e+00> : vector<1x32xf32>
    %33 = tpu.matmul %30, %0, %cst_32 {dimension_numbers = #tpu.dot_dimension_numbers<[1], [0], [0], [1], [0, 0, 1, 1], [], []>} : vector<1x10xf32>, vector<10x32xf32>, vector<1x32xf32> -> vector<1x32xf32>
    %cst_33 = arith.constant dense<0.000000e+00> : vector<1x32xf32>
    %34 = tpu.matmul %17, %4, %cst_33 {dimension_numbers = #tpu.dot_dimension_numbers<[1], [0], [0], [1], [0, 0, 1, 1], [], []>} : vector<1x32xf32>, vector<32x32xf32>, vector<1x32xf32> -> vector<1x32xf32>
    %cst_34 = arith.constant dense<0.000000e+00> : vector<1x32xf32>
    %35 = tpu.matmul %33, %5, %cst_34 {dimension_numbers = #tpu.dot_dimension_numbers<[1], [0], [0], [1], [0, 0, 1, 1], [], []>} : vector<1x32xf32>, vector<32x32xf32>, vector<1x32xf32> -> vector<1x32xf32>
    %36 = arith.addf %34, %35 : vector<1x32xf32>
    %37 = arith.addf %36, %6 : vector<1x32xf32>
    %cst_35 = arith.constant 0.000000e+00 : f32
    %38 = vector.broadcast %cst_35 : f32 to vector<1x32xf32>
    %39 = arith.maximumf %37, %38 : vector<1x32xf32>
    %cst_36 = arith.constant dense<0.000000e+00> : vector<1x384xf32>
    %40 = tpu.matmul %39, %7, %cst_36 {dimension_numbers = #tpu.dot_dimension_numbers<[1], [0], [0], [1], [0, 0, 1, 1], [], []>} : vector<1x32xf32>, vector<32x384xf32>, vector<1x384xf32> -> vector<1x384xf32>
    %41 = arith.addf %40, %8 : vector<1x384xf32>
    %cst_37 = arith.constant dense<0.000000e+00> : vector<1x384xf32>
    %42 = tpu.matmul %13, %9, %cst_37 {dimension_numbers = #tpu.dot_dimension_numbers<[1], [0], [0], [1], [0, 0, 1, 1], [], []>} : vector<1x32xf32>, vector<32x384xf32>, vector<1x384xf32> -> vector<1x384xf32>
    %43 = arith.addf %42, %10 : vector<1x384xf32>
    %44 = vector.extract_strided_slice %41 {offsets = [0, 0], sizes = [1, 32], strides = [1, 1]} : vector<1x384xf32> to vector<1x32xf32>
    %45 = vector.extract_strided_slice %43 {offsets = [0, 0], sizes = [1, 32], strides = [1, 1]} : vector<1x384xf32> to vector<1x32xf32>
    %46 = arith.addf %44, %45 : vector<1x32xf32>
    %47 = arith.negf %46 : vector<1x32xf32>
    %48 = math.exp %47 : vector<1x32xf32>
    %cst_38 = arith.constant 1.000000e+00 : f32
    %49 = vector.broadcast %cst_38 : f32 to vector<1x32xf32>
    %50 = arith.addf %49, %48 : vector<1x32xf32>
    %51 = arith.divf %49, %50 : vector<1x32xf32>
    %52 = vector.extract_strided_slice %41 {offsets = [0, 128], sizes = [1, 32], strides = [1, 1]} : vector<1x384xf32> to vector<1x32xf32>
    %53 = vector.extract_strided_slice %43 {offsets = [0, 128], sizes = [1, 32], strides = [1, 1]} : vector<1x384xf32> to vector<1x32xf32>
    %54 = arith.addf %52, %53 : vector<1x32xf32>
    %55 = arith.negf %54 : vector<1x32xf32>
    %56 = math.exp %55 : vector<1x32xf32>
    %cst_39 = arith.constant 1.000000e+00 : f32
    %57 = vector.broadcast %cst_39 : f32 to vector<1x32xf32>
    %58 = arith.addf %57, %56 : vector<1x32xf32>
    %59 = arith.divf %57, %58 : vector<1x32xf32>
    %60 = vector.extract_strided_slice %41 {offsets = [0, 256], sizes = [1, 32], strides = [1, 1]} : vector<1x384xf32> to vector<1x32xf32>
    %61 = vector.extract_strided_slice %43 {offsets = [0, 256], sizes = [1, 32], strides = [1, 1]} : vector<1x384xf32> to vector<1x32xf32>
    %62 = arith.mulf %51, %61 : vector<1x32xf32>
    %63 = arith.addf %60, %62 : vector<1x32xf32>
    %64 = math.tanh %63 : vector<1x32xf32>
    %cst_40 = arith.constant 1.000000e+00 : f32
    %65 = vector.broadcast %cst_40 : f32 to vector<1x32xf32>
    %66 = arith.subf %65, %59 : vector<1x32xf32>
    %67 = arith.mulf %66, %64 : vector<1x32xf32>
    %68 = arith.mulf %59, %13 : vector<1x32xf32>
    %69 = arith.addf %67, %68 : vector<1x32xf32>
    %70 = arith.index_cast %c0_i32 : i32 to index
    %c0_41 = arith.constant 0 : index
    %71 = vector.load %arg18[%70, %c0_41] : memref<6x32xf32, #tpu.memory_space<vmem>>, vector<1x32xf32>
    tpu.vector_store %arg18[%70, %c0_41], %69 {strides = array<i32>} : memref<6x32xf32, #tpu.memory_space<vmem>>, vector<1x32xf32>,
    %cst_42 = arith.constant dense<0.000000e+00> : vector<1x20xf32>
    %72 = tpu.matmul %69, %11, %cst_42 {dimension_numbers = #tpu.dot_dimension_numbers<[1], [0], [0], [1], [0, 0, 1, 1], [], []>} : vector<1x32xf32>, vector<32x20xf32>, vector<1x20xf32> -> vector<1x20xf32>
    %73 = arith.addf %72, %12 : vector<1x20xf32>
    %cst_43 = arith.constant dense<0xFF800000> : vector<1xf32>
    %74 = vector.multi_reduction <maximumf>, %73, %cst_43 [1] : vector<1x20xf32> to vector<1xf32>
    %75 = vector.shape_cast %74 : vector<1xf32> to vector<1x1xf32>
    %76 = vector.broadcast %75 : vector<1x1xf32> to vector<1x20xf32>
    %77 = arith.subf %73, %76 : vector<1x20xf32>
    %78 = math.exp %77 : vector<1x20xf32>
    %cst_44 = arith.constant dense<0.000000e+00> : vector<1xf32>
    %79 = vector.multi_reduction <add>, %78, %cst_44 [1] : vector<1x20xf32> to vector<1xf32>
    %80 = vector.shape_cast %79 : vector<1xf32> to vector<1x1xf32>
    %81 = math.log %80 : vector<1x1xf32>
    %82 = vector.broadcast %81 : vector<1x1xf32> to vector<1x20xf32>
    %83 = arith.subf %77, %82 : vector<1x20xf32>
    %84 = arith.index_cast %c0_i32 : i32 to index
    %c0_45 = arith.constant 0 : index
    %85 = vector.load %arg17[%84, %c0_45] : memref<6x20xf32, #tpu.memory_space<vmem>>, vector<1x20xf32>
    tpu.vector_store %arg17[%84, %c0_45], %83 {strides = array<i32>} : memref<6x20xf32, #tpu.memory_space<vmem>>, vector<1x20xf32>,
    %c1_i32 = arith.constant 1 : i32
    %86 = arith.index_cast %c1_i32 : i32 to index
    %87 = memref.load %arg1[%86] : memref<6xi32, #tpu.memory_space<smem>>
    %88 = arith.index_cast %87 : i32 to index
    %c0_46 = arith.constant 0 : index
    %89 = vector.load %arg2[%88, %c0_46] : memref<20x32xf32, #tpu.memory_space<vmem>>, vector<1x32xf32>
    %cst_47 = arith.constant dense<0.000000e+00> : vector<1x10xf32>
    %90 = tpu.matmul %89, %1, %cst_47 {dimension_numbers = #tpu.dot_dimension_numbers<[1], [0], [0], [1], [0, 0, 1, 1], [], []>} : vector<1x32xf32>, vector<32x10xf32>, vector<1x10xf32> -> vector<1x10xf32>
    %cst_48 = arith.constant dense<0.000000e+00> : vector<1x10xf32>
    %91 = tpu.matmul %69, %2, %cst_48 {dimension_numbers = #tpu.dot_dimension_numbers<[1], [0], [0], [1], [0, 0, 1, 1], [], []>} : vector<1x32xf32>, vector<32x10xf32>, vector<1x10xf32> -> vector<1x10xf32>
    %92 = arith.addf %90, %91 : vector<1x10xf32>
    %93 = arith.addf %92, %3 : vector<1x10xf32>
    %cst_49 = arith.constant dense<0xFF800000> : vector<1xf32>
    %94 = vector.multi_reduction <maximumf>, %93, %cst_49 [1] : vector<1x10xf32> to vector<1xf32>
    %95 = vector.shape_cast %94 : vector<1xf32> to vector<1x1xf32>
    %96 = vector.broadcast %95 : vector<1x1xf32> to vector<1x10xf32>
    %97 = arith.subf %93, %96 : vector<1x10xf32>
    %98 = math.exp %97 : vector<1x10xf32>
    %cst_50 = arith.constant dense<0.000000e+00> : vector<1xf32>
    %99 = vector.multi_reduction <add>, %98, %cst_50 [1] : vector<1x10xf32> to vector<1xf32>
    %100 = vector.shape_cast %99 : vector<1xf32> to vector<1x1xf32>
    %101 = vector.broadcast %100 : vector<1x1xf32> to vector<1x10xf32>
    %102 = arith.divf %98, %101 : vector<1x10xf32>
    %103 = arith.index_cast %c1_i32 : i32 to index
    %c0_51 = arith.constant 0 : index
    %104 = vector.load %arg19[%103, %c0_51] : memref<6x10xf32, #tpu.memory_space<vmem>>, vector<1x10xf32>
    tpu.vector_store %arg19[%103, %c0_51], %102 {strides = array<i32>} : memref<6x10xf32, #tpu.memory_space<vmem>>, vector<1x10xf32>,
    %cst_52 = arith.constant dense<0.000000e+00> : vector<1x32xf32>
    %105 = tpu.matmul %102, %0, %cst_52 {dimension_numbers = #tpu.dot_dimension_numbers<[1], [0], [0], [1], [0, 0, 1, 1], [], []>} : vector<1x10xf32>, vector<10x32xf32>, vector<1x32xf32> -> vector<1x32xf32>
    %cst_53 = arith.constant dense<0.000000e+00> : vector<1x32xf32>
    %106 = tpu.matmul %89, %4, %cst_53 {dimension_numbers = #tpu.dot_dimension_numbers<[1], [0], [0], [1], [0, 0, 1, 1], [], []>} : vector<1x32xf32>, vector<32x32xf32>, vector<1x32xf32> -> vector<1x32xf32>
    %cst_54 = arith.constant dense<0.000000e+00> : vector<1x32xf32>
    %107 = tpu.matmul %105, %5, %cst_54 {dimension_numbers = #tpu.dot_dimension_numbers<[1], [0], [0], [1], [0, 0, 1, 1], [], []>} : vector<1x32xf32>, vector<32x32xf32>, vector<1x32xf32> -> vector<1x32xf32>
    %108 = arith.addf %106, %107 : vector<1x32xf32>
    %109 = arith.addf %108, %6 : vector<1x32xf32>
    %cst_55 = arith.constant 0.000000e+00 : f32
    %110 = vector.broadcast %cst_55 : f32 to vector<1x32xf32>
    %111 = arith.maximumf %109, %110 : vector<1x32xf32>
    %cst_56 = arith.constant dense<0.000000e+00> : vector<1x384xf32>
    %112 = tpu.matmul %111, %7, %cst_56 {dimension_numbers = #tpu.dot_dimension_numbers<[1], [0], [0], [1], [0, 0, 1, 1], [], []>} : vector<1x32xf32>, vector<32x384xf32>, vector<1x384xf32> -> vector<1x384xf32>
    %113 = arith.addf %112, %8 : vector<1x384xf32>
    %cst_57 = arith.constant dense<0.000000e+00> : vector<1x384xf32>
    %114 = tpu.matmul %69, %9, %cst_57 {dimension_numbers = #tpu.dot_dimension_numbers<[1], [0], [0], [1], [0, 0, 1, 1], [], []>} : vector<1x32xf32>, vector<32x384xf32>, vector<1x384xf32> -> vector<1x384xf32>
    %115 = arith.addf %114, %10 : vector<1x384xf32>
    %116 = vector.extract_strided_slice %113 {offsets = [0, 0], sizes = [1, 32], strides = [1, 1]} : vector<1x384xf32> to vector<1x32xf32>
    %117 = vector.extract_strided_slice %115 {offsets = [0, 0], sizes = [1, 32], strides = [1, 1]} : vector<1x384xf32> to vector<1x32xf32>
    %118 = arith.addf %116, %117 : vector<1x32xf32>
    %119 = arith.negf %118 : vector<1x32xf32>
    %120 = math.exp %119 : vector<1x32xf32>
    %cst_58 = arith.constant 1.000000e+00 : f32
    %121 = vector.broadcast %cst_58 : f32 to vector<1x32xf32>
    %122 = arith.addf %121, %120 : vector<1x32xf32>
    %123 = arith.divf %121, %122 : vector<1x32xf32>
    %124 = vector.extract_strided_slice %113 {offsets = [0, 128], sizes = [1, 32], strides = [1, 1]} : vector<1x384xf32> to vector<1x32xf32>
    %125 = vector.extract_strided_slice %115 {offsets = [0, 128], sizes = [1, 32], strides = [1, 1]} : vector<1x384xf32> to vector<1x32xf32>
    %126 = arith.addf %124, %125 : vector<1x32xf32>
    %127 = arith.negf %126 : vector<1x32xf32>
    %128 = math.exp %127 : vector<1x32xf32>
    %cst_59 = arith.constant 1.000000e+00 : f32
    %129 = vector.broadcast %cst_59 : f32 to vector<1x32xf32>
    %130 = arith.addf %129, %128 : vector<1x32xf32>
    %131 = arith.divf %129, %130 : vector<1x32xf32>
    %132 = vector.extract_strided_slice %113 {offsets = [0, 256], sizes = [1, 32], strides = [1, 1]} : vector<1x384xf32> to vector<1x32xf32>
    %133 = vector.extract_strided_slice %115 {offsets = [0, 256], sizes = [1, 32], strides = [1, 1]} : vector<1x384xf32> to vector<1x32xf32>
    %134 = arith.mulf %123, %133 : vector<1x32xf32>
    %135 = arith.addf %132, %134 : vector<1x32xf32>
    %136 = math.tanh %135 : vector<1x32xf32>
    %cst_60 = arith.constant 1.000000e+00 : f32
    %137 = vector.broadcast %cst_60 : f32 to vector<1x32xf32>
    %138 = arith.subf %137, %131 : vector<1x32xf32>
    %139 = arith.mulf %138, %136 : vector<1x32xf32>
    %140 = arith.mulf %131, %69 : vector<1x32xf32>
    %141 = arith.addf %139, %140 : vector<1x32xf32>
    %142 = arith.index_cast %c1_i32 : i32 to index
    %c0_61 = arith.constant 0 : index
    %143 = vector.load %arg18[%142, %c0_61] : memref<6x32xf32, #tpu.memory_space<vmem>>, vector<1x32xf32>
    tpu.vector_store %arg18[%142, %c0_61], %141 {strides = array<i32>} : memref<6x32xf32, #tpu.memory_space<vmem>>, vector<1x32xf32>,
    %cst_62 = arith.constant dense<0.000000e+00> : vector<1x20xf32>
    %144 = tpu.matmul %141, %11, %cst_62 {dimension_numbers = #tpu.dot_dimension_numbers<[1], [0], [0], [1], [0, 0, 1, 1], [], []>} : vector<1x32xf32>, vector<32x20xf32>, vector<1x20xf32> -> vector<1x20xf32>
    %145 = arith.addf %144, %12 : vector<1x20xf32>
    %cst_63 = arith.constant dense<0xFF800000> : vector<1xf32>
    %146 = vector.multi_reduction <maximumf>, %145, %cst_63 [1] : vector<1x20xf32> to vector<1xf32>
    %147 = vector.shape_cast %146 : vector<1xf32> to vector<1x1xf32>
    %148 = vector.broadcast %147 : vector<1x1xf32> to vector<1x20xf32>
    %149 = arith.subf %145, %148 : vector<1x20xf32>
    %150 = math.exp %149 : vector<1x20xf32>
    %cst_64 = arith.constant dense<0.000000e+00> : vector<1xf32>
    %151 = vector.multi_reduction <add>, %150, %cst_64 [1] : vector<1x20xf32> to vector<1xf32>
    %152 = vector.shape_cast %151 : vector<1xf32> to vector<1x1xf32>
    %153 = math.log %152 : vector<1x1xf32>
    %154 = vector.broadcast %153 : vector<1x1xf32> to vector<1x20xf32>
    %155 = arith.subf %149, %154 : vector<1x20xf32>
    %156 = arith.index_cast %c1_i32 : i32 to index
    %c0_65 = arith.constant 0 : index
    %157 = vector.load %arg17[%156, %c0_65] : memref<6x20xf32, #tpu.memory_space<vmem>>, vector<1x20xf32>
    tpu.vector_store %arg17[%156, %c0_65], %155 {strides = array<i32>} : memref<6x20xf32, #tpu.memory_space<vmem>>, vector<1x20xf32>,
    %c2_i32 = arith.constant 2 : i32
    %158 = arith.index_cast %c2_i32 : i32 to index
    %159 = memref.load %arg1[%158] : memref<6xi32, #tpu.memory_space<smem>>
    %160 = arith.index_cast %159 : i32 to index
    %c0_66 = arith.constant 0 : index
    %161 = vector.load %arg2[%160, %c0_66] : memref<20x32xf32, #tpu.memory_space<vmem>>, vector<1x32xf32>
    %cst_67 = arith.constant dense<0.000000e+00> : vector<1x10xf32>
    %162 = tpu.matmul %161, %1, %cst_67 {dimension_numbers = #tpu.dot_dimension_numbers<[1], [0], [0], [1], [0, 0, 1, 1], [], []>} : vector<1x32xf32>, vector<32x10xf32>, vector<1x10xf32> -> vector<1x10xf32>
    %cst_68 = arith.constant dense<0.000000e+00> : vector<1x10xf32>
    %163 = tpu.matmul %141, %2, %cst_68 {dimension_numbers = #tpu.dot_dimension_numbers<[1], [0], [0], [1], [0, 0, 1, 1], [], []>} : vector<1x32xf32>, vector<32x10xf32>, vector<1x10xf32> -> vector<1x10xf32>
    %164 = arith.addf %162, %163 : vector<1x10xf32>
    %165 = arith.addf %164, %3 : vector<1x10xf32>
    %cst_69 = arith.constant dense<0xFF800000> : vector<1xf32>
    %166 = vector.multi_reduction <maximumf>, %165, %cst_69 [1] : vector<1x10xf32> to vector<1xf32>
    %167 = vector.shape_cast %166 : vector<1xf32> to vector<1x1xf32>
    %168 = vector.broadcast %167 : vector<1x1xf32> to vector<1x10xf32>
    %169 = arith.subf %165, %168 : vector<1x10xf32>
    %170 = math.exp %169 : vector<1x10xf32>
    %cst_70 = arith.constant dense<0.000000e+00> : vector<1xf32>
    %171 = vector.multi_reduction <add>, %170, %cst_70 [1] : vector<1x10xf32> to vector<1xf32>
    %172 = vector.shape_cast %171 : vector<1xf32> to vector<1x1xf32>
    %173 = vector.broadcast %172 : vector<1x1xf32> to vector<1x10xf32>
    %174 = arith.divf %170, %173 : vector<1x10xf32>
    %175 = arith.index_cast %c2_i32 : i32 to index
    %c0_71 = arith.constant 0 : index
    %176 = vector.load %arg19[%175, %c0_71] : memref<6x10xf32, #tpu.memory_space<vmem>>, vector<1x10xf32>
    tpu.vector_store %arg19[%175, %c0_71], %174 {strides = array<i32>} : memref<6x10xf32, #tpu.memory_space<vmem>>, vector<1x10xf32>,
    %cst_72 = arith.constant dense<0.000000e+00> : vector<1x32xf32>
    %177 = tpu.matmul %174, %0, %cst_72 {dimension_numbers = #tpu.dot_dimension_numbers<[1], [0], [0], [1], [0, 0, 1, 1], [], []>} : vector<1x10xf32>, vector<10x32xf32>, vector<1x32xf32> -> vector<1x32xf32>
    %cst_73 = arith.constant dense<0.000000e+00> : vector<1x32xf32>
    %178 = tpu.matmul %161, %4, %cst_73 {dimension_numbers = #tpu.dot_dimension_numbers<[1], [0], [0], [1], [0, 0, 1, 1], [], []>} : vector<1x32xf32>, vector<32x32xf32>, vector<1x32xf32> -> vector<1x32xf32>
    %cst_74 = arith.constant dense<0.000000e+00> : vector<1x32xf32>
    %179 = tpu.matmul %177, %5, %cst_74 {dimension_numbers = #tpu.dot_dimension_numbers<[1], [0], [0], [1], [0, 0, 1, 1], [], []>} : vector<1x32xf32>, vector<32x32xf32>, vector<1x32xf32> -> vector<1x32xf32>
    %180 = arith.addf %178, %179 : vector<1x32xf32>
    %181 = arith.addf %180, %6 : vector<1x32xf32>
    %cst_75 = arith.constant 0.000000e+00 : f32
    %182 = vector.broadcast %cst_75 : f32 to vector<1x32xf32>
    %183 = arith.maximumf %181, %182 : vector<1x32xf32>
    %cst_76 = arith.constant dense<0.000000e+00> : vector<1x384xf32>
    %184 = tpu.matmul %183, %7, %cst_76 {dimension_numbers = #tpu.dot_dimension_numbers<[1], [0], [0], [1], [0, 0, 1, 1], [], []>} : vector<1x32xf32>, vector<32x384xf32>, vector<1x384xf32> -> vector<1x384xf32>
    %185 = arith.addf %184, %8 : vector<1x384xf32>
    %cst_77 = arith.constant dense<0.000000e+00> : vector<1x384xf32>
    %186 = tpu.matmul %141, %9, %cst_77 {dimension_numbers = #tpu.dot_dimension_numbers<[1], [0], [0], [1], [0, 0, 1, 1], [], []>} : vector<1x32xf32>, vector<32x384xf32>, vector<1x384xf32> -> vector<1x384xf32>
    %187 = arith.addf %186, %10 : vector<1x384xf32>
    %188 = vector.extract_strided_slice %185 {offsets = [0, 0], sizes = [1, 32], strides = [1, 1]} : vector<1x384xf32> to vector<1x32xf32>
    %189 = vector.extract_strided_slice %187 {offsets = [0, 0], sizes = [1, 32], strides = [1, 1]} : vector<1x384xf32> to vector<1x32xf32>
    %190 = arith.addf %188, %189 : vector<1x32xf32>
    %191 = arith.negf %190 : vector<1x32xf32>
    %192 = math.exp %191 : vector<1x32xf32>
    %cst_78 = arith.constant 1.000000e+00 : f32
    %193 = vector.broadcast %cst_78 : f32 to vector<1x32xf32>
    %194 = arith.addf %193, %192 : vector<1x32xf32>
    %195 = arith.divf %193, %194 : vector<1x32xf32>
    %196 = vector.extract_strided_slice %185 {offsets = [0, 128], sizes = [1, 32], strides = [1, 1]} : vector<1x384xf32> to vector<1x32xf32>
    %197 = vector.extract_strided_slice %187 {offsets = [0, 128], sizes = [1, 32], strides = [1, 1]} : vector<1x384xf32> to vector<1x32xf32>
    %198 = arith.addf %196, %197 : vector<1x32xf32>
    %199 = arith.negf %198 : vector<1x32xf32>
    %200 = math.exp %199 : vector<1x32xf32>
    %cst_79 = arith.constant 1.000000e+00 : f32
    %201 = vector.broadcast %cst_79 : f32 to vector<1x32xf32>
    %202 = arith.addf %201, %200 : vector<1x32xf32>
    %203 = arith.divf %201, %202 : vector<1x32xf32>
    %204 = vector.extract_strided_slice %185 {offsets = [0, 256], sizes = [1, 32], strides = [1, 1]} : vector<1x384xf32> to vector<1x32xf32>
    %205 = vector.extract_strided_slice %187 {offsets = [0, 256], sizes = [1, 32], strides = [1, 1]} : vector<1x384xf32> to vector<1x32xf32>
    %206 = arith.mulf %195, %205 : vector<1x32xf32>
    %207 = arith.addf %204, %206 : vector<1x32xf32>
    %208 = math.tanh %207 : vector<1x32xf32>
    %cst_80 = arith.constant 1.000000e+00 : f32
    %209 = vector.broadcast %cst_80 : f32 to vector<1x32xf32>
    %210 = arith.subf %209, %203 : vector<1x32xf32>
    %211 = arith.mulf %210, %208 : vector<1x32xf32>
    %212 = arith.mulf %203, %141 : vector<1x32xf32>
    %213 = arith.addf %211, %212 : vector<1x32xf32>
    %214 = arith.index_cast %c2_i32 : i32 to index
    %c0_81 = arith.constant 0 : index
    %215 = vector.load %arg18[%214, %c0_81] : memref<6x32xf32, #tpu.memory_space<vmem>>, vector<1x32xf32>
    tpu.vector_store %arg18[%214, %c0_81], %213 {strides = array<i32>} : memref<6x32xf32, #tpu.memory_space<vmem>>, vector<1x32xf32>,
    %cst_82 = arith.constant dense<0.000000e+00> : vector<1x20xf32>
    %216 = tpu.matmul %213, %11, %cst_82 {dimension_numbers = #tpu.dot_dimension_numbers<[1], [0], [0], [1], [0, 0, 1, 1], [], []>} : vector<1x32xf32>, vector<32x20xf32>, vector<1x20xf32> -> vector<1x20xf32>
    %217 = arith.addf %216, %12 : vector<1x20xf32>
    %cst_83 = arith.constant dense<0xFF800000> : vector<1xf32>
    %218 = vector.multi_reduction <maximumf>, %217, %cst_83 [1] : vector<1x20xf32> to vector<1xf32>
    %219 = vector.shape_cast %218 : vector<1xf32> to vector<1x1xf32>
    %220 = vector.broadcast %219 : vector<1x1xf32> to vector<1x20xf32>
    %221 = arith.subf %217, %220 : vector<1x20xf32>
    %222 = math.exp %221 : vector<1x20xf32>
    %cst_84 = arith.constant dense<0.000000e+00> : vector<1xf32>
    %223 = vector.multi_reduction <add>, %222, %cst_84 [1] : vector<1x20xf32> to vector<1xf32>
    %224 = vector.shape_cast %223 : vector<1xf32> to vector<1x1xf32>
    %225 = math.log %224 : vector<1x1xf32>
    %226 = vector.broadcast %225 : vector<1x1xf32> to vector<1x20xf32>
    %227 = arith.subf %221, %226 : vector<1x20xf32>
    %228 = arith.index_cast %c2_i32 : i32 to index
    %c0_85 = arith.constant 0 : index
    %229 = vector.load %arg17[%228, %c0_85] : memref<6x20xf32, #tpu.memory_space<vmem>>, vector<1x20xf32>
    tpu.vector_store %arg17[%228, %c0_85], %227 {strides = array<i32>} : memref<6x20xf32, #tpu.memory_space<vmem>>, vector<1x20xf32>,
    %c3_i32 = arith.constant 3 : i32
    %230 = arith.index_cast %c3_i32 : i32 to index
    %231 = memref.load %arg1[%230] : memref<6xi32, #tpu.memory_space<smem>>
    %232 = arith.index_cast %231 : i32 to index
    %c0_86 = arith.constant 0 : index
    %233 = vector.load %arg2[%232, %c0_86] : memref<20x32xf32, #tpu.memory_space<vmem>>, vector<1x32xf32>
    %cst_87 = arith.constant dense<0.000000e+00> : vector<1x10xf32>
    %234 = tpu.matmul %233, %1, %cst_87 {dimension_numbers = #tpu.dot_dimension_numbers<[1], [0], [0], [1], [0, 0, 1, 1], [], []>} : vector<1x32xf32>, vector<32x10xf32>, vector<1x10xf32> -> vector<1x10xf32>
    %cst_88 = arith.constant dense<0.000000e+00> : vector<1x10xf32>
    %235 = tpu.matmul %213, %2, %cst_88 {dimension_numbers = #tpu.dot_dimension_numbers<[1], [0], [0], [1], [0, 0, 1, 1], [], []>} : vector<1x32xf32>, vector<32x10xf32>, vector<1x10xf32> -> vector<1x10xf32>
    %236 = arith.addf %234, %235 : vector<1x10xf32>
    %237 = arith.addf %236, %3 : vector<1x10xf32>
    %cst_89 = arith.constant dense<0xFF800000> : vector<1xf32>
    %238 = vector.multi_reduction <maximumf>, %237, %cst_89 [1] : vector<1x10xf32> to vector<1xf32>
    %239 = vector.shape_cast %238 : vector<1xf32> to vector<1x1xf32>
    %240 = vector.broadcast %239 : vector<1x1xf32> to vector<1x10xf32>
    %241 = arith.subf %237, %240 : vector<1x10xf32>
    %242 = math.exp %241 : vector<1x10xf32>
    %cst_90 = arith.constant dense<0.000000e+00> : vector<1xf32>
    %243 = vector.multi_reduction <add>, %242, %cst_90 [1] : vector<1x10xf32> to vector<1xf32>
    %244 = vector.shape_cast %243 : vector<1xf32> to vector<1x1xf32>
    %245 = vector.broadcast %244 : vector<1x1xf32> to vector<1x10xf32>
    %246 = arith.divf %242, %245 : vector<1x10xf32>
    %247 = arith.index_cast %c3_i32 : i32 to index
    %c0_91 = arith.constant 0 : index
    %248 = vector.load %arg19[%247, %c0_91] : memref<6x10xf32, #tpu.memory_space<vmem>>, vector<1x10xf32>
    tpu.vector_store %arg19[%247, %c0_91], %246 {strides = array<i32>} : memref<6x10xf32, #tpu.memory_space<vmem>>, vector<1x10xf32>,
    %cst_92 = arith.constant dense<0.000000e+00> : vector<1x32xf32>
    %249 = tpu.matmul %246, %0, %cst_92 {dimension_numbers = #tpu.dot_dimension_numbers<[1], [0], [0], [1], [0, 0, 1, 1], [], []>} : vector<1x10xf32>, vector<10x32xf32>, vector<1x32xf32> -> vector<1x32xf32>
    %cst_93 = arith.constant dense<0.000000e+00> : vector<1x32xf32>
    %250 = tpu.matmul %233, %4, %cst_93 {dimension_numbers = #tpu.dot_dimension_numbers<[1], [0], [0], [1], [0, 0, 1, 1], [], []>} : vector<1x32xf32>, vector<32x32xf32>, vector<1x32xf32> -> vector<1x32xf32>
    %cst_94 = arith.constant dense<0.000000e+00> : vector<1x32xf32>
    %251 = tpu.matmul %249, %5, %cst_94 {dimension_numbers = #tpu.dot_dimension_numbers<[1], [0], [0], [1], [0, 0, 1, 1], [], []>} : vector<1x32xf32>, vector<32x32xf32>, vector<1x32xf32> -> vector<1x32xf32>
    %252 = arith.addf %250, %251 : vector<1x32xf32>
    %253 = arith.addf %252, %6 : vector<1x32xf32>
    %cst_95 = arith.constant 0.000000e+00 : f32
    %254 = vector.broadcast %cst_95 : f32 to vector<1x32xf32>
    %255 = arith.maximumf %253, %254 : vector<1x32xf32>
    %cst_96 = arith.constant dense<0.000000e+00> : vector<1x384xf32>
    %256 = tpu.matmul %255, %7, %cst_96 {dimension_numbers = #tpu.dot_dimension_numbers<[1], [0], [0], [1], [0, 0, 1, 1], [], []>} : vector<1x32xf32>, vector<32x384xf32>, vector<1x384xf32> -> vector<1x384xf32>
    %257 = arith.addf %256, %8 : vector<1x384xf32>
    %cst_97 = arith.constant dense<0.000000e+00> : vector<1x384xf32>
    %258 = tpu.matmul %213, %9, %cst_97 {dimension_numbers = #tpu.dot_dimension_numbers<[1], [0], [0], [1], [0, 0, 1, 1], [], []>} : vector<1x32xf32>, vector<32x384xf32>, vector<1x384xf32> -> vector<1x384xf32>
    %259 = arith.addf %258, %10 : vector<1x384xf32>
    %260 = vector.extract_strided_slice %257 {offsets = [0, 0], sizes = [1, 32], strides = [1, 1]} : vector<1x384xf32> to vector<1x32xf32>
    %261 = vector.extract_strided_slice %259 {offsets = [0, 0], sizes = [1, 32], strides = [1, 1]} : vector<1x384xf32> to vector<1x32xf32>
    %262 = arith.addf %260, %261 : vector<1x32xf32>
    %263 = arith.negf %262 : vector<1x32xf32>
    %264 = math.exp %263 : vector<1x32xf32>
    %cst_98 = arith.constant 1.000000e+00 : f32
    %265 = vector.broadcast %cst_98 : f32 to vector<1x32xf32>
    %266 = arith.addf %265, %264 : vector<1x32xf32>
    %267 = arith.divf %265, %266 : vector<1x32xf32>
    %268 = vector.extract_strided_slice %257 {offsets = [0, 128], sizes = [1, 32], strides = [1, 1]} : vector<1x384xf32> to vector<1x32xf32>
    %269 = vector.extract_strided_slice %259 {offsets = [0, 128], sizes = [1, 32], strides = [1, 1]} : vector<1x384xf32> to vector<1x32xf32>
    %270 = arith.addf %268, %269 : vector<1x32xf32>
    %271 = arith.negf %270 : vector<1x32xf32>
    %272 = math.exp %271 : vector<1x32xf32>
    %cst_99 = arith.constant 1.000000e+00 : f32
    %273 = vector.broadcast %cst_99 : f32 to vector<1x32xf32>
    %274 = arith.addf %273, %272 : vector<1x32xf32>
    %275 = arith.divf %273, %274 : vector<1x32xf32>
    %276 = vector.extract_strided_slice %257 {offsets = [0, 256], sizes = [1, 32], strides = [1, 1]} : vector<1x384xf32> to vector<1x32xf32>
    %277 = vector.extract_strided_slice %259 {offsets = [0, 256], sizes = [1, 32], strides = [1, 1]} : vector<1x384xf32> to vector<1x32xf32>
    %278 = arith.mulf %267, %277 : vector<1x32xf32>
    %279 = arith.addf %276, %278 : vector<1x32xf32>
    %280 = math.tanh %279 : vector<1x32xf32>
    %cst_100 = arith.constant 1.000000e+00 : f32
    %281 = vector.broadcast %cst_100 : f32 to vector<1x32xf32>
    %282 = arith.subf %281, %275 : vector<1x32xf32>
    %283 = arith.mulf %282, %280 : vector<1x32xf32>
    %284 = arith.mulf %275, %213 : vector<1x32xf32>
    %285 = arith.addf %283, %284 : vector<1x32xf32>
    %286 = arith.index_cast %c3_i32 : i32 to index
    %c0_101 = arith.constant 0 : index
    %287 = vector.load %arg18[%286, %c0_101] : memref<6x32xf32, #tpu.memory_space<vmem>>, vector<1x32xf32>
    tpu.vector_store %arg18[%286, %c0_101], %285 {strides = array<i32>} : memref<6x32xf32, #tpu.memory_space<vmem>>, vector<1x32xf32>,
    %cst_102 = arith.constant dense<0.000000e+00> : vector<1x20xf32>
    %288 = tpu.matmul %285, %11, %cst_102 {dimension_numbers = #tpu.dot_dimension_numbers<[1], [0], [0], [1], [0, 0, 1, 1], [], []>} : vector<1x32xf32>, vector<32x20xf32>, vector<1x20xf32> -> vector<1x20xf32>
    %289 = arith.addf %288, %12 : vector<1x20xf32>
    %cst_103 = arith.constant dense<0xFF800000> : vector<1xf32>
    %290 = vector.multi_reduction <maximumf>, %289, %cst_103 [1] : vector<1x20xf32> to vector<1xf32>
    %291 = vector.shape_cast %290 : vector<1xf32> to vector<1x1xf32>
    %292 = vector.broadcast %291 : vector<1x1xf32> to vector<1x20xf32>
    %293 = arith.subf %289, %292 : vector<1x20xf32>
    %294 = math.exp %293 : vector<1x20xf32>
    %cst_104 = arith.constant dense<0.000000e+00> : vector<1xf32>
    %295 = vector.multi_reduction <add>, %294, %cst_104 [1] : vector<1x20xf32> to vector<1xf32>
    %296 = vector.shape_cast %295 : vector<1xf32> to vector<1x1xf32>
    %297 = math.log %296 : vector<1x1xf32>
    %298 = vector.broadcast %297 : vector<1x1xf32> to vector<1x20xf32>
    %299 = arith.subf %293, %298 : vector<1x20xf32>
    %300 = arith.index_cast %c3_i32 : i32 to index
    %c0_105 = arith.constant 0 : index
    %301 = vector.load %arg17[%300, %c0_105] : memref<6x20xf32, #tpu.memory_space<vmem>>, vector<1x20xf32>
    tpu.vector_store %arg17[%300, %c0_105], %299 {strides = array<i32>} : memref<6x20xf32, #tpu.memory_space<vmem>>, vector<1x20xf32>,
    %c4_i32 = arith.constant 4 : i32
    %302 = arith.index_cast %c4_i32 : i32 to index
    %303 = memref.load %arg1[%302] : memref<6xi32, #tpu.memory_space<smem>>
    %304 = arith.index_cast %303 : i32 to index
    %c0_106 = arith.constant 0 : index
    %305 = vector.load %arg2[%304, %c0_106] : memref<20x32xf32, #tpu.memory_space<vmem>>, vector<1x32xf32>
    %cst_107 = arith.constant dense<0.000000e+00> : vector<1x10xf32>
    %306 = tpu.matmul %305, %1, %cst_107 {dimension_numbers = #tpu.dot_dimension_numbers<[1], [0], [0], [1], [0, 0, 1, 1], [], []>} : vector<1x32xf32>, vector<32x10xf32>, vector<1x10xf32> -> vector<1x10xf32>
    %cst_108 = arith.constant dense<0.000000e+00> : vector<1x10xf32>
    %307 = tpu.matmul %285, %2, %cst_108 {dimension_numbers = #tpu.dot_dimension_numbers<[1], [0], [0], [1], [0, 0, 1, 1], [], []>} : vector<1x32xf32>, vector<32x10xf32>, vector<1x10xf32> -> vector<1x10xf32>
    %308 = arith.addf %306, %307 : vector<1x10xf32>
    %309 = arith.addf %308, %3 : vector<1x10xf32>
    %cst_109 = arith.constant dense<0xFF800000> : vector<1xf32>
    %310 = vector.multi_reduction <maximumf>, %309, %cst_109 [1] : vector<1x10xf32> to vector<1xf32>
    %311 = vector.shape_cast %310 : vector<1xf32> to vector<1x1xf32>
    %312 = vector.broadcast %311 : vector<1x1xf32> to vector<1x10xf32>
    %313 = arith.subf %309, %312 : vector<1x10xf32>
    %314 = math.exp %313 : vector<1x10xf32>
    %cst_110 = arith.constant dense<0.000000e+00> : vector<1xf32>
    %315 = vector.multi_reduction <add>, %314, %cst_110 [1] : vector<1x10xf32> to vector<1xf32>
    %316 = vector.shape_cast %315 : vector<1xf32> to vector<1x1xf32>
    %317 = vector.broadcast %316 : vector<1x1xf32> to vector<1x10xf32>
    %318 = arith.divf %314, %317 : vector<1x10xf32>
    %319 = arith.index_cast %c4_i32 : i32 to index
    %c0_111 = arith.constant 0 : index
    %320 = vector.load %arg19[%319, %c0_111] : memref<6x10xf32, #tpu.memory_space<vmem>>, vector<1x10xf32>
    tpu.vector_store %arg19[%319, %c0_111], %318 {strides = array<i32>} : memref<6x10xf32, #tpu.memory_space<vmem>>, vector<1x10xf32>,
    %cst_112 = arith.constant dense<0.000000e+00> : vector<1x32xf32>
    %321 = tpu.matmul %318, %0, %cst_112 {dimension_numbers = #tpu.dot_dimension_numbers<[1], [0], [0], [1], [0, 0, 1, 1], [], []>} : vector<1x10xf32>, vector<10x32xf32>, vector<1x32xf32> -> vector<1x32xf32>
    %cst_113 = arith.constant dense<0.000000e+00> : vector<1x32xf32>
    %322 = tpu.matmul %305, %4, %cst_113 {dimension_numbers = #tpu.dot_dimension_numbers<[1], [0], [0], [1], [0, 0, 1, 1], [], []>} : vector<1x32xf32>, vector<32x32xf32>, vector<1x32xf32> -> vector<1x32xf32>
    %cst_114 = arith.constant dense<0.000000e+00> : vector<1x32xf32>
    %323 = tpu.matmul %321, %5, %cst_114 {dimension_numbers = #tpu.dot_dimension_numbers<[1], [0], [0], [1], [0, 0, 1, 1], [], []>} : vector<1x32xf32>, vector<32x32xf32>, vector<1x32xf32> -> vector<1x32xf32>
    %324 = arith.addf %322, %323 : vector<1x32xf32>
    %325 = arith.addf %324, %6 : vector<1x32xf32>
    %cst_115 = arith.constant 0.000000e+00 : f32
    %326 = vector.broadcast %cst_115 : f32 to vector<1x32xf32>
    %327 = arith.maximumf %325, %326 : vector<1x32xf32>
    %cst_116 = arith.constant dense<0.000000e+00> : vector<1x384xf32>
    %328 = tpu.matmul %327, %7, %cst_116 {dimension_numbers = #tpu.dot_dimension_numbers<[1], [0], [0], [1], [0, 0, 1, 1], [], []>} : vector<1x32xf32>, vector<32x384xf32>, vector<1x384xf32> -> vector<1x384xf32>
    %329 = arith.addf %328, %8 : vector<1x384xf32>
    %cst_117 = arith.constant dense<0.000000e+00> : vector<1x384xf32>
    %330 = tpu.matmul %285, %9, %cst_117 {dimension_numbers = #tpu.dot_dimension_numbers<[1], [0], [0], [1], [0, 0, 1, 1], [], []>} : vector<1x32xf32>, vector<32x384xf32>, vector<1x384xf32> -> vector<1x384xf32>
    %331 = arith.addf %330, %10 : vector<1x384xf32>
    %332 = vector.extract_strided_slice %329 {offsets = [0, 0], sizes = [1, 32], strides = [1, 1]} : vector<1x384xf32> to vector<1x32xf32>
    %333 = vector.extract_strided_slice %331 {offsets = [0, 0], sizes = [1, 32], strides = [1, 1]} : vector<1x384xf32> to vector<1x32xf32>
    %334 = arith.addf %332, %333 : vector<1x32xf32>
    %335 = arith.negf %334 : vector<1x32xf32>
    %336 = math.exp %335 : vector<1x32xf32>
    %cst_118 = arith.constant 1.000000e+00 : f32
    %337 = vector.broadcast %cst_118 : f32 to vector<1x32xf32>
    %338 = arith.addf %337, %336 : vector<1x32xf32>
    %339 = arith.divf %337, %338 : vector<1x32xf32>
    %340 = vector.extract_strided_slice %329 {offsets = [0, 128], sizes = [1, 32], strides = [1, 1]} : vector<1x384xf32> to vector<1x32xf32>
    %341 = vector.extract_strided_slice %331 {offsets = [0, 128], sizes = [1, 32], strides = [1, 1]} : vector<1x384xf32> to vector<1x32xf32>
    %342 = arith.addf %340, %341 : vector<1x32xf32>
    %343 = arith.negf %342 : vector<1x32xf32>
    %344 = math.exp %343 : vector<1x32xf32>
    %cst_119 = arith.constant 1.000000e+00 : f32
    %345 = vector.broadcast %cst_119 : f32 to vector<1x32xf32>
    %346 = arith.addf %345, %344 : vector<1x32xf32>
    %347 = arith.divf %345, %346 : vector<1x32xf32>
    %348 = vector.extract_strided_slice %329 {offsets = [0, 256], sizes = [1, 32], strides = [1, 1]} : vector<1x384xf32> to vector<1x32xf32>
    %349 = vector.extract_strided_slice %331 {offsets = [0, 256], sizes = [1, 32], strides = [1, 1]} : vector<1x384xf32> to vector<1x32xf32>
    %350 = arith.mulf %339, %349 : vector<1x32xf32>
    %351 = arith.addf %348, %350 : vector<1x32xf32>
    %352 = math.tanh %351 : vector<1x32xf32>
    %cst_120 = arith.constant 1.000000e+00 : f32
    %353 = vector.broadcast %cst_120 : f32 to vector<1x32xf32>
    %354 = arith.subf %353, %347 : vector<1x32xf32>
    %355 = arith.mulf %354, %352 : vector<1x32xf32>
    %356 = arith.mulf %347, %285 : vector<1x32xf32>
    %357 = arith.addf %355, %356 : vector<1x32xf32>
    %358 = arith.index_cast %c4_i32 : i32 to index
    %c0_121 = arith.constant 0 : index
    %359 = vector.load %arg18[%358, %c0_121] : memref<6x32xf32, #tpu.memory_space<vmem>>, vector<1x32xf32>
    tpu.vector_store %arg18[%358, %c0_121], %357 {strides = array<i32>} : memref<6x32xf32, #tpu.memory_space<vmem>>, vector<1x32xf32>,
    %cst_122 = arith.constant dense<0.000000e+00> : vector<1x20xf32>
    %360 = tpu.matmul %357, %11, %cst_122 {dimension_numbers = #tpu.dot_dimension_numbers<[1], [0], [0], [1], [0, 0, 1, 1], [], []>} : vector<1x32xf32>, vector<32x20xf32>, vector<1x20xf32> -> vector<1x20xf32>
    %361 = arith.addf %360, %12 : vector<1x20xf32>
    %cst_123 = arith.constant dense<0xFF800000> : vector<1xf32>
    %362 = vector.multi_reduction <maximumf>, %361, %cst_123 [1] : vector<1x20xf32> to vector<1xf32>
    %363 = vector.shape_cast %362 : vector<1xf32> to vector<1x1xf32>
    %364 = vector.broadcast %363 : vector<1x1xf32> to vector<1x20xf32>
    %365 = arith.subf %361, %364 : vector<1x20xf32>
    %366 = math.exp %365 : vector<1x20xf32>
    %cst_124 = arith.constant dense<0.000000e+00> : vector<1xf32>
    %367 = vector.multi_reduction <add>, %366, %cst_124 [1] : vector<1x20xf32> to vector<1xf32>
    %368 = vector.shape_cast %367 : vector<1xf32> to vector<1x1xf32>
    %369 = math.log %368 : vector<1x1xf32>
    %370 = vector.broadcast %369 : vector<1x1xf32> to vector<1x20xf32>
    %371 = arith.subf %365, %370 : vector<1x20xf32>
    %372 = arith.index_cast %c4_i32 : i32 to index
    %c0_125 = arith.constant 0 : index
    %373 = vector.load %arg17[%372, %c0_125] : memref<6x20xf32, #tpu.memory_space<vmem>>, vector<1x20xf32>
    tpu.vector_store %arg17[%372, %c0_125], %371 {strides = array<i32>} : memref<6x20xf32, #tpu.memory_space<vmem>>, vector<1x20xf32>,
    %c5_i32 = arith.constant 5 : i32
    %374 = arith.index_cast %c5_i32 : i32 to index
    %375 = memref.load %arg1[%374] : memref<6xi32, #tpu.memory_space<smem>>
    %376 = arith.index_cast %375 : i32 to index
    %c0_126 = arith.constant 0 : index
    %377 = vector.load %arg2[%376, %c0_126] : memref<20x32xf32, #tpu.memory_space<vmem>>, vector<1x32xf32>
    %cst_127 = arith.constant dense<0.000000e+00> : vector<1x10xf32>
    %378 = tpu.matmul %377, %1, %cst_127 {dimension_numbers = #tpu.dot_dimension_numbers<[1], [0], [0], [1], [0, 0, 1, 1], [], []>} : vector<1x32xf32>, vector<32x10xf32>, vector<1x10xf32> -> vector<1x10xf32>
    %cst_128 = arith.constant dense<0.000000e+00> : vector<1x10xf32>
    %379 = tpu.matmul %357, %2, %cst_128 {dimension_numbers = #tpu.dot_dimension_numbers<[1], [0], [0], [1], [0, 0, 1, 1], [], []>} : vector<1x32xf32>, vector<32x10xf32>, vector<1x10xf32> -> vector<1x10xf32>
    %380 = arith.addf %378, %379 : vector<1x10xf32>
    %381 = arith.addf %380, %3 : vector<1x10xf32>
    %cst_129 = arith.constant dense<0xFF800000> : vector<1xf32>
    %382 = vector.multi_reduction <maximumf>, %381, %cst_129 [1] : vector<1x10xf32> to vector<1xf32>
    %383 = vector.shape_cast %382 : vector<1xf32> to vector<1x1xf32>
    %384 = vector.broadcast %383 : vector<1x1xf32> to vector<1x10xf32>
    %385 = arith.subf %381, %384 : vector<1x10xf32>
    %386 = math.exp %385 : vector<1x10xf32>
    %cst_130 = arith.constant dense<0.000000e+00> : vector<1xf32>
    %387 = vector.multi_reduction <add>, %386, %cst_130 [1] : vector<1x10xf32> to vector<1xf32>
    %388 = vector.shape_cast %387 : vector<1xf32> to vector<1x1xf32>
    %389 = vector.broadcast %388 : vector<1x1xf32> to vector<1x10xf32>
    %390 = arith.divf %386, %389 : vector<1x10xf32>
    %391 = arith.index_cast %c5_i32 : i32 to index
    %c0_131 = arith.constant 0 : index
    %392 = vector.load %arg19[%391, %c0_131] : memref<6x10xf32, #tpu.memory_space<vmem>>, vector<1x10xf32>
    tpu.vector_store %arg19[%391, %c0_131], %390 {strides = array<i32>} : memref<6x10xf32, #tpu.memory_space<vmem>>, vector<1x10xf32>,
    %cst_132 = arith.constant dense<0.000000e+00> : vector<1x32xf32>
    %393 = tpu.matmul %390, %0, %cst_132 {dimension_numbers = #tpu.dot_dimension_numbers<[1], [0], [0], [1], [0, 0, 1, 1], [], []>} : vector<1x10xf32>, vector<10x32xf32>, vector<1x32xf32> -> vector<1x32xf32>
    %cst_133 = arith.constant dense<0.000000e+00> : vector<1x32xf32>
    %394 = tpu.matmul %377, %4, %cst_133 {dimension_numbers = #tpu.dot_dimension_numbers<[1], [0], [0], [1], [0, 0, 1, 1], [], []>} : vector<1x32xf32>, vector<32x32xf32>, vector<1x32xf32> -> vector<1x32xf32>
    %cst_134 = arith.constant dense<0.000000e+00> : vector<1x32xf32>
    %395 = tpu.matmul %393, %5, %cst_134 {dimension_numbers = #tpu.dot_dimension_numbers<[1], [0], [0], [1], [0, 0, 1, 1], [], []>} : vector<1x32xf32>, vector<32x32xf32>, vector<1x32xf32> -> vector<1x32xf32>
    %396 = arith.addf %394, %395 : vector<1x32xf32>
    %397 = arith.addf %396, %6 : vector<1x32xf32>
    %cst_135 = arith.constant 0.000000e+00 : f32
    %398 = vector.broadcast %cst_135 : f32 to vector<1x32xf32>
    %399 = arith.maximumf %397, %398 : vector<1x32xf32>
    %cst_136 = arith.constant dense<0.000000e+00> : vector<1x384xf32>
    %400 = tpu.matmul %399, %7, %cst_136 {dimension_numbers = #tpu.dot_dimension_numbers<[1], [0], [0], [1], [0, 0, 1, 1], [], []>} : vector<1x32xf32>, vector<32x384xf32>, vector<1x384xf32> -> vector<1x384xf32>
    %401 = arith.addf %400, %8 : vector<1x384xf32>
    %cst_137 = arith.constant dense<0.000000e+00> : vector<1x384xf32>
    %402 = tpu.matmul %357, %9, %cst_137 {dimension_numbers = #tpu.dot_dimension_numbers<[1], [0], [0], [1], [0, 0, 1, 1], [], []>} : vector<1x32xf32>, vector<32x384xf32>, vector<1x384xf32> -> vector<1x384xf32>
    %403 = arith.addf %402, %10 : vector<1x384xf32>
    %404 = vector.extract_strided_slice %401 {offsets = [0, 0], sizes = [1, 32], strides = [1, 1]} : vector<1x384xf32> to vector<1x32xf32>
    %405 = vector.extract_strided_slice %403 {offsets = [0, 0], sizes = [1, 32], strides = [1, 1]} : vector<1x384xf32> to vector<1x32xf32>
    %406 = arith.addf %404, %405 : vector<1x32xf32>
    %407 = arith.negf %406 : vector<1x32xf32>
    %408 = math.exp %407 : vector<1x32xf32>
    %cst_138 = arith.constant 1.000000e+00 : f32
    %409 = vector.broadcast %cst_138 : f32 to vector<1x32xf32>
    %410 = arith.addf %409, %408 : vector<1x32xf32>
    %411 = arith.divf %409, %410 : vector<1x32xf32>
    %412 = vector.extract_strided_slice %401 {offsets = [0, 128], sizes = [1, 32], strides = [1, 1]} : vector<1x384xf32> to vector<1x32xf32>
    %413 = vector.extract_strided_slice %403 {offsets = [0, 128], sizes = [1, 32], strides = [1, 1]} : vector<1x384xf32> to vector<1x32xf32>
    %414 = arith.addf %412, %413 : vector<1x32xf32>
    %415 = arith.negf %414 : vector<1x32xf32>
    %416 = math.exp %415 : vector<1x32xf32>
    %cst_139 = arith.constant 1.000000e+00 : f32
    %417 = vector.broadcast %cst_139 : f32 to vector<1x32xf32>
    %418 = arith.addf %417, %416 : vector<1x32xf32>
    %419 = arith.divf %417, %418 : vector<1x32xf32>
    %420 = vector.extract_strided_slice %401 {offsets = [0, 256], sizes = [1, 32], strides = [1, 1]} : vector<1x384xf32> to vector<1x32xf32>
    %421 = vector.extract_strided_slice %403 {offsets = [0, 256], sizes = [1, 32], strides = [1, 1]} : vector<1x384xf32> to vector<1x32xf32>
    %422 = arith.mulf %411, %421 : vector<1x32xf32>
    %423 = arith.addf %420, %422 : vector<1x32xf32>
    %424 = math.tanh %423 : vector<1x32xf32>
    %cst_140 = arith.constant 1.000000e+00 : f32
    %425 = vector.broadcast %cst_140 : f32 to vector<1x32xf32>
    %426 = arith.subf %425, %419 : vector<1x32xf32>
    %427 = arith.mulf %426, %424 : vector<1x32xf32>
    %428 = arith.mulf %419, %357 : vector<1x32xf32>
    %429 = arith.addf %427, %428 : vector<1x32xf32>
    %430 = arith.index_cast %c5_i32 : i32 to index
    %c0_141 = arith.constant 0 : index
    %431 = vector.load %arg18[%430, %c0_141] : memref<6x32xf32, #tpu.memory_space<vmem>>, vector<1x32xf32>
    tpu.vector_store %arg18[%430, %c0_141], %429 {strides = array<i32>} : memref<6x32xf32, #tpu.memory_space<vmem>>, vector<1x32xf32>,
    %cst_142 = arith.constant dense<0.000000e+00> : vector<1x20xf32>
    %432 = tpu.matmul %429, %11, %cst_142 {dimension_numbers = #tpu.dot_dimension_numbers<[1], [0], [0], [1], [0, 0, 1, 1], [], []>} : vector<1x32xf32>, vector<32x20xf32>, vector<1x20xf32> -> vector<1x20xf32>
    %433 = arith.addf %432, %12 : vector<1x20xf32>
    %cst_143 = arith.constant dense<0xFF800000> : vector<1xf32>
    %434 = vector.multi_reduction <maximumf>, %433, %cst_143 [1] : vector<1x20xf32> to vector<1xf32>
    %435 = vector.shape_cast %434 : vector<1xf32> to vector<1x1xf32>
    %436 = vector.broadcast %435 : vector<1x1xf32> to vector<1x20xf32>
    %437 = arith.subf %433, %436 : vector<1x20xf32>
    %438 = math.exp %437 : vector<1x20xf32>
    %cst_144 = arith.constant dense<0.000000e+00> : vector<1xf32>
    %439 = vector.multi_reduction <add>, %438, %cst_144 [1] : vector<1x20xf32> to vector<1xf32>
    %440 = vector.shape_cast %439 : vector<1xf32> to vector<1x1xf32>
    %441 = math.log %440 : vector<1x1xf32>
    %442 = vector.broadcast %441 : vector<1x1xf32> to vector<1x20xf32>
    %443 = arith.subf %437, %442 : vector<1x20xf32>
    %444 = arith.index_cast %c5_i32 : i32 to index
    %c0_145 = arith.constant 0 : index
    %445 = vector.load %arg17[%444, %c0_145] : memref<6x20xf32, #tpu.memory_space<vmem>>, vector<1x20xf32>
    tpu.vector_store %arg17[%444, %c0_145], %443 {strides = array<i32>} : memref<6x20xf32, #tpu.memory_space<vmem>>, vector<1x20xf32>,
    %c6_i32 = arith.constant 6 : i32
    return
  }
  func.func @transform_0(%arg0: i32, %arg1: memref<6xi32, #tpu.memory_space<smem>>) -> (i32, i32) {
    %c0_i32 = arith.constant 0 : i32
    %c0_i32_0 = arith.constant 0 : i32
    %c0_i32_1 = arith.constant 0 : i32
    return %c0_i32, %c0_i32_0 : i32, i32
  }
  func.func @transform_1(%arg0: i32, %arg1: memref<6xi32, #tpu.memory_space<smem>>) -> (i32, i32) {
    %c0_i32 = arith.constant 0 : i32
    %c0_i32_0 = arith.constant 0 : i32
    %c0_i32_1 = arith.constant 0 : i32
    return %c0_i32, %c0_i32_0 : i32, i32
  }
  func.func @transform_2(%arg0: i32, %arg1: memref<6xi32, #tpu.memory_space<smem>>) -> (i32, i32) {
    %c0_i32 = arith.constant 0 : i32
    %c0_i32_0 = arith.constant 0 : i32
    %c0_i32_1 = arith.constant 0 : i32
    return %c0_i32, %c0_i32_0 : i32, i32
  }
  func.func @transform_3(%arg0: i32, %arg1: memref<6xi32, #tpu.memory_space<smem>>) -> (i32, i32) {
    %c0_i32 = arith.constant 0 : i32
    %c0_i32_0 = arith.constant 0 : i32
    %c0_i32_1 = arith.constant 0 : i32
    return %c0_i32, %c0_i32_0 : i32, i32
  }
  func.func @transform_4(%arg0: i32, %arg1: memref<6xi32, #tpu.memory_space<smem>>) -> (i32, i32) {
    %c0_i32 = arith.constant 0 : i32
    %c0_i32_0 = arith.constant 0 : i32
    %c0_i32_1 = arith.constant 0 : i32
    return %c0_i32, %c0_i32_0 : i32, i32
  }
  func.func @transform_5(%arg0: i32, %arg1: memref<6xi32, #tpu.memory_space<smem>>) -> (i32, i32) {
    %c0_i32 = arith.constant 0 : i32
    %c0_i32_0 = arith.constant 0 : i32
    %c0_i32_1 = arith.constant 0 : i32
    return %c0_i32, %c0_i32_0 : i32, i32
  }
  func.func @transform_6(%arg0: i32, %arg1: memref<6xi32, #tpu.memory_space<smem>>) -> (i32, i32) {
    %c0_i32 = arith.constant 0 : i32
    %c0_i32_0 = arith.constant 0 : i32
    %c0_i32_1 = arith.constant 0 : i32
    return %c0_i32, %c0_i32_0 : i32, i32
  }
  func.func @transform_7(%arg0: i32, %arg1: memref<6xi32, #tpu.memory_space<smem>>) -> (i32, i32) {
    %c0_i32 = arith.constant 0 : i32
    %c0_i32_0 = arith.constant 0 : i32
    %c0_i32_1 = arith.constant 0 : i32
    return %c0_i32, %c0_i32_0 : i32, i32
  }
  func.func @transform_8(%arg0: i32, %arg1: memref<6xi32, #tpu.memory_space<smem>>) -> (i32, i32) {
    %c0_i32 = arith.constant 0 : i32
    %c0_i32_0 = arith.constant 0 : i32
    %c0_i32_1 = arith.constant 0 : i32
    return %c0_i32, %c0_i32_0 : i32, i32
  }
  func.func @transform_9(%arg0: i32, %arg1: memref<6xi32, #tpu.memory_space<smem>>) -> (i32, i32) {
    %c0_i32 = arith.constant 0 : i32
    %c0_i32_0 = arith.constant 0 : i32
    %c0_i32_1 = arith.constant 0 : i32
    return %c0_i32, %c0_i32_0 : i32, i32
  }
  func.func @transform_10(%arg0: i32, %arg1: memref<6xi32, #tpu.memory_space<smem>>) -> (i32, i32) {
    %c0_i32 = arith.constant 0 : i32
    %c0_i32_0 = arith.constant 0 : i32
    %c0_i32_1 = arith.constant 0 : i32
    return %c0_i32, %c0_i32_0 : i32, i32
  }
  func.func @transform_11(%arg0: i32, %arg1: memref<6xi32, #tpu.memory_space<smem>>) -> (i32, i32) {
    %c0_i32 = arith.constant 0 : i32
    %c0_i32_0 = arith.constant 0 : i32
    %c0_i32_1 = arith.constant 0 : i32
    return %c0_i32, %c0_i32_0 : i32, i32
  }
  func.func @transform_12(%arg0: i32, %arg1: memref<6xi32, #tpu.memory_space<smem>>) -> (i32, i32) {
    %c0_i32 = arith.constant 0 : i32
    %c0_i32_0 = arith.constant 0 : i32
    %c0_i32_1 = arith.constant 0 : i32
    return %c0_i32, %c0_i32_0 : i32, i32
  }
  func.func @transform_13(%arg0: i32, %arg1: memref<6xi32, #tpu.memory_space<smem>>) -> (i32, i32) {
    %c0_i32 = arith.constant 0 : i32
    %c0_i32_0 = arith.constant 0 : i32
    %c0_i32_1 = arith.constant 0 : i32
    return %c0_i32, %c0_i32_0 : i32, i32
  }
  func.func @transform_14(%arg0: i32, %arg1: memref<6xi32, #tpu.memory_space<smem>>) -> (i32, i32) {
    %c0_i32 = arith.constant 0 : i32
    %c0_i32_0 = arith.constant 0 : i32
    %c0_i32_1 = arith.constant 0 : i32
    return %c0_i32, %c0_i32_0 : i32, i32
  }
  func.func @transform_15(%arg0: i32, %arg1: memref<6xi32, #tpu.memory_space<smem>>) -> (i32, i32) {
    %c0_i32 = arith.constant 0 : i32
    %c0_i32_0 = arith.constant 0 : i32
    %c0_i32_1 = arith.constant 0 : i32
    return %c0_i32, %c0_i32_0 : i32, i32
  }
  func.func @transform_16(%arg0: i32, %arg1: memref<6xi32, #tpu.memory_space<smem>>) -> (i32, i32) {
    %c0_i32 = arith.constant 0 : i32
    %c0_i32_0 = arith.constant 0 : i32
    %c0_i32_1 = arith.constant 0 : i32
    return %c0_i32, %c0_i32_0 : i32, i32
  }
  func.func @transform_17(%arg0: i32, %arg1: memref<6xi32, #tpu.memory_space<smem>>) -> (i32, i32) {
    %c0_i32 = arith.constant 0 : i32
    %c0_i32_0 = arith.constant 0 : i32
    %c0_i32_1 = arith.constant 0 : i32
    return %c0_i32, %c0_i32_0 : i32, i32
  }
}

</mosaic_0001>

<bundles_post_ra>
// kernel: tpu_custom_call.1
= control target key start
LH: loop header
LB: loop body
LE: loop exit
PB: predicated region body
PF: predicated region fallthrough
CT: control target
= control target key end

     0   :  { %s7337_s0 = inlined_call_operand.vmem [shape: s32[6], index: 0, kind: input, shape index: {}]   ;;  %s7338_s1 = inlined_call_operand.hbm [shape: f32[20,32], index: 1, kind: input, shape index: {}]   ;;  %s7339_s2 = inlined_call_operand.vmem [shape: f32[1,32], index: 2, kind: input, shape index: {}]   ;;  %s7340_s3 = inlined_call_operand.hbm [shape: f32[10,32], index: 3, kind: input, shape index: {}]   ;;  %s7341_s4 = inlined_call_operand.vmem [shape: f32[32,10], index: 4, kind: input, shape index: {}]   ;;  %s7342_s5 = inlined_call_operand.vmem [shape: f32[32,10], index: 5, kind: input, shape index: {}]   ;;  %s7343_s6 = inlined_call_operand.vmem [shape: f32[1,10], index: 6, kind: input, shape index: {}]   ;;  %s7344_s7 = inlined_call_operand.vmem [shape: f32[32,32], index: 7, kind: input, shape index: {}]   ;;  %s7345_s8 = inlined_call_operand.vmem [shape: f32[32,32], index: 8, kind: input, shape index: {}]   ;;  %s7346_s9 = inlined_call_operand.vmem [shape: f32[1,32], index: 9, kind: input, shape index: {}]   ;;  %s7347_s10 = inlined_call_operand.vmem [shape: f32[32,384], index: 10, kind: input, shape index: {}]   ;;  %s7348_s11 = inlined_call_operand.vmem [shape: f32[1,384], index: 11, kind: input, shape index: {}]   ;;  %s7349_s12 = inlined_call_operand.hbm [shape: f32[32,384], index: 12, kind: input, shape index: {}]   ;;  %s7350_s13 = inlined_call_operand.vmem [shape: f32[1,384], index: 13, kind: input, shape index: {}]   ;;  %s7351_s14 = inlined_call_operand.vmem [shape: f32[32,20], index: 14, kind: input, shape index: {}]   ;;  %s7352_s15 = inlined_call_operand.vmem [shape: f32[1,20], index: 15, kind: input, shape index: {}]   ;;  %s7353_s16 = inlined_call_operand.hbm [shape: f32[6,20], index: 16, kind: output, shape index: {0}]   ;;  %s7354_s17 = inlined_call_operand.hbm [shape: f32[6,32], index: 17, kind: output, shape index: {1}]   ;;  %s7355_s18 = inlined_call_operand.hbm [shape: f32[6,10], index: 18, kind: output, shape index: {2}]  }
   0x1   :  { %7390 = sst [smem:[#allocation33_spill]] %s7337_s0 }
   0x2   :  { %7391 = sst [smem:[#allocation34_spill]] %s7338_s1 }
   0x3   :  { %7392 = sst [smem:[#allocation35_spill]] %s7339_s2 }
   0x4   :  { %7393 = sst [smem:[#allocation36_spill]] %s7348_s11 }
   0x5   :  { %s7394_s29 = sld [smem:[#allocation33_spill]] }
   0xb   :  { %s24_s11 = sshll.u32 %s7394_s29, 4  ;;  %s25_s11 = int_to_ptr.vmem [resolvable:$true] %s24_s11 }
   0xc   :  { %s5852_s30 = scalar_lea.vmem %s25_s11, 16  ;;  %p5857_p1 = scmp.lt.s32.totalorder %s25_s11, %s25_s11 }
   0xd   :  { %p5853_p0 = scmp.ne.s32.totalorder %s25_s11, %s5852_s30  ;;  %p5858_p2 = scmp.lt.s32.totalorder %s5852_s30, %s5852_s30 }
   0xf   :  { %p5859_p3 = por %p5858_p2, %p5857_p1 }
  0x11   :  { %p5860_p4 = pnand %p5859_p3, %p5853_p0 }
  0x13   :  { %5863 = shalt.err (!%p5860_p4)  }
  0x14   :  { %s5994_s0 = smov [#allocation3]  }
  0x15   :  { %27 = dma.vmem_to_smem %s25_s11, 16, %s5994_s0, [#allocation2] }
  0x16   :  { %5984 = dma.done.wait [#allocation2], 16 }
  0x17   :  { %5985 = vsyncadd [#allocation2], 4294967280 }
  0x18   :  { %29 = sfence }
  0x19   :  { %30 = vsyncpa [#allocation5], 0 }
  0x1a   :  { %31 = vsyncpa [#allocation8], 0 }
  0x1b   :  { %32 = vsyncpa [#allocation6], 0 }
  0x1c   :  { %33 = vsyncpa [#allocation12], 0  ;;  %s5995_s19 = smov [#allocation7]   ;;  %s5996_s20 = smov [#allocation4]  }
  0x1d   :  { %s53_s1 = sshll.u32 %s5995_s19, 4  ;;  %s39_s21 = sshll.u32 %s5996_s20, 4  ;;  %s54_s1 = int_to_ptr.vmem [resolvable:$true] %s53_s1  ;;  %s40_s21 = int_to_ptr.vmem [resolvable:$true] %s39_s21 }
  0x1e   :  { %s5872_s22 = scalar_lea.vmem %s54_s1, 256  ;;  %p5877_p6 = scmp.lt.s32.totalorder %s54_s1, %s54_s1 }
  0x1f   :  { %p5873_p5 = scmp.ne.s32.totalorder %s54_s1, %s5872_s22  ;;  %p5878_p7 = scmp.lt.s32.totalorder %s5872_s22, %s5872_s22 }
  0x21   :  { %p5879_p8 = por %p5878_p7, %p5877_p6 }
  0x23   :  { %p5880_p9 = pnand %p5879_p8, %p5873_p5 }
  0x25   :  { %5883 = shalt.err (!%p5880_p9)
}
  0x26   :  { %s5997_s11 = smov 128   ;;  %s5998_s2 = smov 8  }
  0x27   :  { %59 = dma.hbm_to_vmem [thread:$0]  %s7340_s3, 256, %s54_s1, [#allocation8], %s5997_s11, %s5997_s11, %s5998_s2  }
  0x28   :  { %s5892_s25 = scalar_lea.vmem %s40_s21, 384  ;;  %p5897_p11 = scmp.lt.s32.totalorder %s40_s21, %s40_s21 }
  0x29   :  { %p5893_p10 = scmp.ne.s32.totalorder %s40_s21, %s5892_s25  ;;  %p5898_p12 = scmp.lt.s32.totalorder %s5892_s25, %s5892_s25 }
  0x2b   :  { %p5899_p13 = por %p5898_p12, %p5897_p11 }
  0x2d   :  { %p5900_p0 = pnand %p5899_p13, %p5893_p10 }
  0x2f   :  { %5903 = shalt.err (!%p5900_p0)
}
  0x30   :  { %s7395_s28 = sld [smem:[#allocation34_spill]]  ;;  %s5999_s29 = smov [#allocation9]  }
  0x31   :  { %s81_s30 = sshll.u32 %s5999_s29, 4  ;;  %s82_s30 = int_to_ptr.vmem [resolvable:$true] %s81_s30 }
  0x32   :  { %s5912_s0 = scalar_lea.vmem %s82_s30, 1536  ;;  %p5917_p2 = scmp.lt.s32.totalorder %s82_s30, %s82_s30 }
  0x33   :  { %p5913_p1 = scmp.ne.s32.totalorder %s82_s30, %s5912_s0  ;;  %p5918_p3 = scmp.lt.s32.totalorder %s5912_s0, %s5912_s0 }
  0x35   :  { %p5919_p4 = por %p5918_p3, %p5917_p2 }
  0x36   :  { %45 = dma.hbm_to_vmem [thread:$0]  %s7395_s28, 384, %s40_s21, [#allocation5], %s5997_s11, %s5997_s11, %s5998_s2  }
  0x37   :  { %p5920_p5 = pnand %p5919_p4, %p5913_p1 }
  0x39   :  { %5923 = shalt.err (!%p5920_p5)
}
  0x3a   :  { %s6000_s3 = smov 384   ;;  %s6001_s19 = smov 24  }
  0x3b   :  { %87 = dma.hbm_to_vmem [thread:$0]  %s7349_s12, 1536, %s82_s30, [#allocation8], %s6000_s3, %s6000_s3, %s6001_s19  }
  0x3c   :  { %5986 = dma.done.wait [#allocation5], 384  }
  0x3d   :  { %5987 = vsyncadd [#allocation5], 4294966912 }
  0x3e   :  { %5988 = dma.done.wait [#allocation8], 1792  }
  0x3f   :  { %5989 = vsyncadd [#allocation8], 4294965504  ;;  %v7356_v0 = vmov 0.0   ;;  %s155_s21 = sld [smem:[#allocation3]]  ;;  %vm6003_vm0 = vmmov 0   ;;  %v6123_v1 = vld [vmem:[%s7342_s5 + $0x18] sm:$0xff] }
  0x40   :  { %5179 = vmatprep.subr.mxu0 %v7356_v0  ;;  %5190 = vmatprep.subr.mxu1 %v7356_v0  ;;  %7396 = vst [vmem:[#allocation19_spill] sm:$0xff] %v6123_v1  ;;  %v6128_v2 = vld [vmem:[%s7341_s4 + $0x18] sm:$0xff]  ;;  %v6133_v3 = vld [vmem:[%s7342_s5 + $0x10] sm:$0xff]  ;;  %v6147_v5 = vld [vmem:[%s7342_s5 + $0x8] sm:$0xff]  ;;  %s7400_s11 = sld [smem:[#allocation35_spill]]  ;;  %vm158_vm1 = vcmask 261120  }
  0x41   :  { %5187 = vmatprep.mubr.msk.f32.mxu0 %vm6003_vm0, %v7356_v0  ;;  %5198 = vmatprep.mubr.msk.f32.mxu1 %vm6003_vm0, %v7356_v0  ;;  %7397 = vst [vmem:[#allocation20_spill] sm:$0xff] %v6133_v3  ;;  %v6140_v4 = vld [vmem:[%s7341_s4 + $0x10] sm:$0xff]  ;;  %7398 = vst [vmem:[#allocation21_spill] sm:$0xff] %v6147_v5  ;;  %v6152_v6 = vld [vmem:[%s7341_s4 + $0x8] sm:$0xff]  ;;  %vm306_vm2 = vcmask 73728   ;;  %vm323_vm3 = vcmask 1041408  }
  0x42   :  { %5180 = vmatpush3.msra.mxu0 %v6123_v1  ;;  %5191 = vmatpush3.msra.mxu1 %v6128_v2  ;;  %v6161_v7 = vld [vmem:[%s7342_s5] sm:$0xff]  ;;  %v6198_v25 = vld [vmem:[#allocation7] sm:$0xff]  ;;  %v6214_v27 = vld [vmem:[%s7344_s7 + $0x10] sm:$0xff]  ;;  %vm319_vm4 = vcmask 80896   ;;  %vm880_vm5 = vcmask 253952   ;;  %s4895_s25 = sld [smem:[#allocation3 + $0x2]] }
  0x43   :  { %5181 = vmatprep.subr.mxu0 %v7356_v0  ;;  %5192 = vmatprep.subr.mxu1 %v7356_v0  ;;  %7399 = vst [vmem:[#allocation22_spill] sm:$0xff] %v6161_v7  ;;  %v6166_v8 = vld [vmem:[%s7341_s4] sm:$0xff]  ;;  %v6208_v26 = vld [vmem:[%s7344_s7 + $0x18] sm:$0xff]  ;;  %v6221_v28 = vld [vmem:[%s7344_s7 + $0x8] sm:$0xff]  ;;  %vm955_vm6 = vcmask 155648  }
  0x44   :  { %5182 = vmatpush3.msra.mxu0 %v6133_v3  ;;  %5193 = vmatpush3.msra.mxu1 %v6140_v4  ;;  %v6191_v13 = vld [vmem:[%s7343_s6] sm:$0x1]  ;;  %v6239_v33 = vld [vmem:[%s7345_s8 + $0x18] sm:$0xff]  ;;  %v6246_v34 = vld [vmem:[%s7345_s8 + $0x10] sm:$0xff] }
  0x45   :  { %5183 = vmatprep.subr.mxu0 %v7356_v0  ;;  %5194 = vmatprep.subr.mxu1 %v7356_v0  ;;  %s156_s12 = scalar_lea.vmem [#allocation4], %s155_s21  ;;  %v6196_v24 = vld [vmem:[#allocation7 + $0x8] sm:$0x3]  ;;  %v6255_v35 = vld [vmem:[%s7345_s8 + $0x8] sm:$0xff]  ;;  %v6270_v37 = vld [vmem:[%s7347_s10 + $0x50] sm:$0xff]  ;;  %s7408_s21 = sld [smem:[#allocation36_spill]] }
  0x46   :  { %5184 = vmatpush3.msra.mxu0 %v6147_v5  ;;  %5195 = vmatpush3.msra.mxu1 %v6152_v6  ;;  %v6173_v9 = vld [vmem:[%s7400_s11] sm:$0x1]  ;;  %v6276_v40 = vld [vmem:[%s7347_s10 + $0x48] sm:$0xff]  ;;  %v6284_v43 = vld [vmem:[%s7347_s10 + $0x38] sm:$0xff] }
  0x47   :  { %v157_v10 = vld [vmem:[%s156_s12] sm:$0x1]  ;;  %5185 = vmatprep.subr.mxu0 %v7356_v0  ;;  %5196 = vmatprep.subr.mxu1 %v7356_v0  ;;  %v6289_v44 = vld [vmem:[%s7347_s10 + $0x58] sm:$0xff]  ;;  %v6296_v45 = vld [vmem:[%s7347_s10 + $0x30] sm:$0xff] }
  0x48   :  { %5186 = vmatpush3.msra.mxu0 %v6161_v7  ;;  %5197 = vmatpush3.msra.mxu1 %v6166_v8  ;;  %v6228_v29 = vld [vmem:[%s7344_s7] sm:$0xff]  ;;  %v6315_v48 = vld [vmem:[%s7347_s10 + $0x18] sm:$0xff]  ;;  %v6322_v49 = vld [vmem:[%s7347_s10 + $0x8] sm:$0xff]  ;;  %s1740_s26 = scalar_lea.vmem [#allocation4], %s4895_s25 }
  0x49   :  { %5188 = vmatmul.mubr.msk.f32.vlgmr.msra.gmra.mxu0 %vm158_vm1, %v6173_v9  ;;  %5199 = vmatmul.mubr.msk.f32.vlgmr.msra.gmra.mxu1 %vm158_vm1, %v157_v10  ;;  %v6264_v36 = vld [vmem:[%s7345_s8] sm:$0xff]  ;;  %v6327_v50 = vld [vmem:[%s7347_s10 + $0x28] sm:$0xff]  ;;  %v6341_v52 = vld [vmem:[%s7347_s10 + $0x10] sm:$0xff] }
  0x4a   :  { %5201 = vmatprep.subr.mxu1 %v7356_v0  ;;  %5205 = vmatprep.mubr.msk.f32.mxu1 %vm6003_vm0, %v7356_v0  ;;  %v6303_v46 = vld [vmem:[%s7347_s10 + $0x20] sm:$0xff]  ;;  %v6343_v53 = vld [vmem:[#allocation9 + $0x50] sm:$0xff]  ;;  %v6354_v60 = vld [vmem:[#allocation9 + $0x48] sm:$0xff] }
  0x4b   :  { %5219 = vmatprep.subr.mxu0 %v7356_v0  ;;  %5227 = vmatprep.mubr.msk.f32.mxu0 %vm6003_vm0, %v7356_v0  ;;  %v6308_v47 = vld [vmem:[%s7347_s10 + $0x40] sm:$0xff]  ;;  %v6362_v63 = vld [vmem:[#allocation9 + $0x30] sm:$0xff] }
  0x4c   :  { %5202 = vmatpush3.msk.msra.mxu1 %vm323_vm3, %v6196_v24  ;;  %5220 = vmatpush3.msra.mxu0 %v6208_v26  ;;  %v6334_v51 = vld [vmem:[%s7347_s10] sm:$0xff] }
  0x4d   :  { %5203 = vmatprep.subr.mxu1 %v7356_v0  ;;  %5221 = vmatprep.subr.mxu0 %v7356_v0  ;;  %v6351_v54 = vld [vmem:[%s7346_s9] sm:$0x1] }
  0x4e   :  { %5204 = vmatpush3.msra.mxu1 %v6198_v25  ;;  %5222 = vmatpush3.msra.mxu0 %v6214_v27  ;;  %v6356_v61 = vld [vmem:[#allocation9 + $0x38] sm:$0xff] }
  0x4f   :  { %5208 = vmatprep.subr.mxu1 %v7356_v0  ;;  %5223 = vmatprep.subr.mxu0 %v7356_v0  ;;  %v6358_v62 = vld [vmem:[#allocation9 + $0x58] sm:$0xff] }
  0x50   :  { %5224 = vmatpush3.msra.mxu0 %v6221_v28 }
  0x51   :  { %5225 = vmatprep.subr.mxu0 %v7356_v0 }
  0x52   :  { %5226 = vmatpush3.msra.mxu0 %v6228_v29 }
  0x53   :  { %5228 = vmatmul.mubr.msk.f32.vlgmr.msra.gmra.mxu0 %vm158_vm1, %v157_v10  ;;  %5230 = vmatprep.subr.mxu0 %v7356_v0  ;;  %v6365_v10 = vld [vmem:[#allocation9 + $0x20] sm:$0xff] }
  0x54   :  { %5238 = vmatprep.mubr.msk.f32.mxu0 %vm6003_vm0, %v7356_v0  ;;  %5231 = vmatpush3.msra.mxu0 %v6289_v44 }
  0x55   :  { %5232 = vmatprep.subr.mxu0 %v7356_v0 }
  0x56   :  { %5233 = vmatpush3.msra.mxu0 %v6308_v47 }
  0x57   :  { %5234 = vmatprep.subr.mxu0 %v7356_v0 }
  0x58   :  { %5235 = vmatpush3.msra.mxu0 %v6327_v50 }
  0x59   :  { %5236 = vmatprep.subr.mxu0 %v7356_v0 }
  0x5a   :  { %5237 = vmatpush3.msra.mxu0 %v6341_v52 }
  0x5b   :  { %5241 = vmatprep.subr.mxu0 %v7356_v0 }
 0x109   :  { %v228_v11 = vpop.f32.mrf.mxu0  ;;  %v301_v12 = vpop.f32.mrf.mxu1 }
 0x10a   :  { %v302_v14 = vadd.f32 %v301_v12, %v228_v11  ;;  %v6368_v11 = vld [vmem:[#allocation9 + $0x40] sm:$0xff]  ;;  %v6371_v12 = vld [vmem:[#allocation9 + $0x18] sm:$0xff] }
 0x10b   :  { %v5189_v15 = vpop.f32.mrf.mxu0  ;;  %v5200_v16 = vpop.f32.mrf.mxu1 }
 0x10c   :  { %v305_v17 = vadd.f32 %v302_v14, %v6191_v13  ;;  %v6375_v14 = vld [vmem:[#allocation9 + $0x8] sm:$0xff]  ;;  %v6381_v16 = vld [vmem:[#allocation9] sm:$0xff] }
 0x10d   :  { %7401 = vst [vmem:[#allocation23_spill] sm:$0xff] %v6375_v14  ;;  %v6378_v15 = vld [vmem:[#allocation9 + $0x28] sm:$0xff]  ;;  %7402 = vst [vmem:[#allocation24_spill] sm:$0xff] %v6381_v16 }
 0x10e   :  { %v307_v18 = vsel %vm306_vm2, %v305_v17, -inf }
 0x10f   :  { %308 = vmax.xlane.f32.xlu0 %v307_v18  ;;  %v6416_v18 = vld [vmem:[%s7351_s14 + $0x18] sm:$0xff] }
 0x110   :  { %7404 = vst [vmem:[#allocation26_spill] sm:$0xff] %v6416_v18 }
 0x113   :  { %v536_v38 = vpop.f32.mrf.mxu0 }
 0x115   :  { %v5229_v39 = vpop.f32.mrf.mxu0 }
 0x198   :  { %v309_v19 = vpop.xlane.xlu0 %308 }
 0x199   :  { %v310_v20 = vsub.f32 %v305_v17, %v309_v19  ;;  %v6386_v17 = vld [vmem:[#allocation9 + $0x10] sm:$0xff]  ;;  %v6423_v19 = vld [vmem:[%s7351_s14 + $0x10] sm:$0xff] }
 0x19a   :  { %7403 = vst [vmem:[#allocation25_spill] sm:$0xff] %v6386_v17  ;;  %7405 = vst [vmem:[#allocation27_spill] sm:$0xff] %v6423_v19 }
 0x19b   :  { %v311_v21 = vmul.f32 1.442695, %v310_v20  ;;  %v6430_v20 = vld [vmem:[%s7351_s14 + $0x8] sm:$0xff] }
 0x19c   :  { %7406 = vst [vmem:[#allocation28_spill] sm:$0xff] %v6430_v20 }
 0x19d   :  { %5696 = vpow2.f32 %v311_v21  ;;  %v6436_v21 = vld [vmem:[%s7351_s14] sm:$0xff] }
 0x19e   :  { %7407 = vst [vmem:[#allocation29_spill] sm:$0xff] %v6436_v21 }
 0x1aa   :  { %v5697_v22 = vpop.eup %5696 }
 0x1ab   :  { %v313_v23 = vsel %vm306_vm2, %v5697_v22, 0.0 }
 0x1ac   :  { %314 = vadd.xlane.f32.xlu0 %v313_v23 }
 0x235   :  { %v315_v30 = vpop.xlane.xlu0 %314 }
 0x236   :  { %5698 = vrcp.f32 %v315_v30 }
 0x243   :  { %v5699_v31 = vpop.eup %5698 }
 0x244   :  { %v317_v32 = vmul.f32 %v5699_v31, %v5697_v22  ;;  %v543_v22 = vlaneseq }
 0x246   :  { %318 = vst.msk [vmem:[#allocation13] sm:$0x1] %vm306_vm2, %v317_v32  ;;  %5206 = vmatmul.mubr.msk.f32.vlgmr.msra.gmra.mxu1 %vm319_vm4, %v317_v32  ;;  %v544_v23 = vshrl.u32 %v543_v22, 7  ;;  %v135_v32 = vld [vmem:[%s7408_s21] sm:$0x7] }
 0x247   :  { %5209 = vmatpush3.msra.mxu1 %v6239_v33  ;;  %5216 = vmatprep.mubr.msk.f32.mxu1 %vm6003_vm0, %v7356_v0 }
 0x248   :  { %5210 = vmatprep.subr.mxu1 %v7356_v0  ;;  %v545_v31 = vsub.s32 0, %v544_v23 }
 0x249   :  { %5211 = vmatpush3.msra.mxu1 %v6246_v34 }
 0x24a   :  { %5212 = vmatprep.subr.mxu1 %v7356_v0 }
 0x24b   :  { %5213 = vmatpush3.msra.mxu1 %v6255_v35 }
 0x24c   :  { %5214 = vmatprep.subr.mxu1 %v7356_v0 }
 0x24d   :  { %5215 = vmatpush3.msra.mxu1 %v6264_v36 }
 0x24e   :  { %585 = vmatprep.subr.mxu1 %v6270_v37 }
 0x306   :  { %v393_v41 = vpop.f32.mrf.mxu1 }
 0x307   :  { %5217 = vmatmul.mubr.msk.f32.vlgmr.msra.gmra.mxu1 %vm158_vm1, %v393_v41  ;;  %v148_v41 = vld [vmem:[%s7350_s13] sm:$0x7]  ;;  %s4881_s13 = sld [smem:[#allocation3 + $0x1]] }
 0x308   :  { %v5207_v42 = vpop.f32.mrf.mxu1  ;;  %586 = vmatpush1.msra.mxu1 %v6276_v40  ;;  %625 = vmatprep.mubr.f32.mxu1 %v7356_v0 }
 0x309   :  { %587 = vmatprep.subr.mxu1 %v6284_v43  ;;  %v6447_v42 = vrot.slane %v135_v32, %v545_v31 }
 0x30a   :  { %588 = vmatpush1.msra.mxu1 %v6296_v45 }
 0x30b   :  { %589 = vmatprep.subr.mxu1 %v6303_v46  ;;  %7409 = vst [vmem:[#allocation30_spill] sm:$0xff] %v6447_v42 }
 0x30c   :  { %590 = vmatpush1.msra.mxu1 %v6315_v48 }
 0x30d   :  { %591 = vmatprep.subr.mxu1 %v6322_v49  ;;  %s970_s24 = scalar_lea.vmem [#allocation4], %s4881_s13 }
 0x30e   :  { %592 = vmatpush1.msra.mxu1 %v6334_v51 }
 0x30f   :  { %742 = vmatprep.subr.mxu1 %v6343_v53 }
 0x3c7   :  { %v466_v55 = vpop.f32.mrf.mxu1 }
 0x3c8   :  { %v537_v56 = vadd.f32 %v536_v38, %v466_v55  ;;  %v6449_v55 = vrot.slane %v148_v41, %v545_v31 }
 0x3c9   :  { %v5218_v57 = vpop.f32.mrf.mxu1 }
 0x3ca   :  { %v540_v58 = vadd.f32 %v537_v56, %v6351_v54  ;;  %7410 = vst [vmem:[#allocation31_spill] sm:$0xff] %v6449_v55  ;;  %v549_v57 = vsub.s32 1, %v544_v23 }
 0x3cc   :  { %v541_v59 = vmax.f32 %v540_v58, 0.0 }
 0x3ce   :  { %4874 = vmatmul.mubr.msk.f32.vlgmr.msra.gmra.mxu1 %vm158_vm1, %v541_v59  ;;  %5239 = vmatmul.mubr.msk.f32.vlgmr.msra.gmra.mxu0 %vm158_vm1, %v541_v59 }
 0x3cf   :  { %743 = vmatpush1.msra.mxu1 %v6354_v60  ;;  %782 = vmatprep.mubr.f32.mxu1 %v7356_v0 }
 0x3d0   :  { %744 = vmatprep.subr.mxu1 %v6356_v61  ;;  %5242 = vmatpush3.msra.mxu0 %v6358_v62 }
 0x3d1   :  { %745 = vmatpush1.msra.mxu1 %v6362_v63  ;;  %5243 = vmatprep.subr.mxu0 %v7356_v0 }
 0x3d2   :  { %746 = vmatprep.subr.mxu1 %v6365_v10  ;;  %5244 = vmatpush3.msra.mxu0 %v6368_v11 }
 0x3d3   :  { %747 = vmatpush1.msra.mxu1 %v6371_v12  ;;  %5245 = vmatprep.subr.mxu0 %v7356_v0 }
 0x3d4   :  { %748 = vmatprep.subr.mxu1 %v6375_v14  ;;  %5246 = vmatpush3.msra.mxu0 %v6378_v15 }
 0x3d5   :  { %749 = vmatpush1.msra.mxu1 %v6381_v16  ;;  %5247 = vmatprep.subr.mxu0 %v7356_v0 }
 0x3d6   :  { %4876 = vmatmul.mubr.msk.f32.vlgmr.msra.gmra.mxu1 %vm158_vm1, %v6173_v9  ;;  %5248 = vmatpush3.msra.mxu0 %v6386_v17 }
 0x3d7   :  { %5249 = vmatprep.mubr.msk.f32.mxu0 %vm6003_vm0, %v7356_v0  ;;  %5252 = vmatprep.subr.mxu1 %v7356_v0 }
 0x3d8   :  { %5250 = vmatmul.mubr.msk.f32.vlgmr.msra.gmra.mxu0 %vm158_vm1, %v6173_v9  ;;  %5263 = vmatprep.subr.mxu0 %v7356_v0 }
 0x3d9   :  { %5264 = vmatpush3.msra.mxu0 %v6123_v1  ;;  %5260 = vmatprep.mubr.msk.f32.mxu1 %vm6003_vm0, %v7356_v0 }
 0x3da   :  { %5265 = vmatprep.subr.mxu0 %v7356_v0  ;;  %5271 = vmatprep.mubr.msk.f32.mxu0 %vm6003_vm0, %v7356_v0 }
 0x3db   :  { %5266 = vmatpush3.msra.mxu0 %v6133_v3  ;;  %5253 = vmatpush3.msra.mxu1 %v6416_v18 }
 0x3dc   :  { %5267 = vmatprep.subr.mxu0 %v7356_v0  ;;  %5254 = vmatprep.subr.mxu1 %v7356_v0 }
 0x3dd   :  { %5268 = vmatpush3.msra.mxu0 %v6147_v5  ;;  %5255 = vmatpush3.msra.mxu1 %v6423_v19 }
 0x3de   :  { %5269 = vmatprep.subr.mxu0 %v7356_v0  ;;  %5256 = vmatprep.subr.mxu1 %v7356_v0 }
 0x3df   :  { %5270 = vmatpush3.msra.mxu0 %v6161_v7  ;;  %5257 = vmatpush3.msra.mxu1 %v6430_v20 }
 0x3e0   :  { %5285 = vmatprep.subr.mxu0 %v7356_v0  ;;  %5258 = vmatprep.subr.mxu1 %v7356_v0 }
 0x3e1   :  { %5259 = vmatpush3.msra.mxu1 %v6436_v21 }
 0x3e2   :  { %5274 = vmatprep.subr.mxu1 %v7356_v0  ;;  %v6453_v0 = vrot.slane %v148_v41, %v549_v57 }
 0x48e   :  { %v698_v30 = vpop.f32.mrf.mxu0  ;;  %v627_v38 = vpop.f32.mrf.mxu1 }
 0x48f   :  { %v628_v59 = vadd.f32 %v627_v38, %v6447_v42 }
 0x490   :  { %v5240_v39 = vpop.f32.mrf.mxu0  ;;  %v629_v56 = vpop.f32.mrf.mxu1 }
 0x491   :  { %v6455_v39 = vrot.slane %v135_v32, %v549_v57 }
 0x493   :  { %v630_v31 = vadd.f32 %v629_v56, %v6455_v39 }
 0x496   :  { %v784_v58 = vpop.f32.mrf.mxu1 }
 0x497   :  { %v785_v22 = vadd.f32 %v784_v58, %v6449_v55  ;;  %v553_v58 = vsub.s32 2, %v544_v23 }
 0x498   :  { %v786_v7 = vpop.f32.mrf.mxu1  ;;  %v855_v21 = vpop.f32.mrf.mxu0 }
 0x499   :  { %v859_v5 = vadd.f32 %v785_v22, %v628_v59  ;;  %v787_v19 = vadd.f32 %v786_v7, %v6453_v0  ;;  %v6459_v55 = vrot.slane %v148_v41, %v553_v58  ;;  %v6461_v57 = vrot.slane %v135_v32, %v553_v58 }
 0x49a   :  { %v5251_v20 = vpop.f32.mrf.mxu0 }
 0x49b   :  { %v4878_v3 = vmul.f32 -1.442695, %v859_v5  ;;  %v866_v1 = vadd.f32 %v787_v19, %v630_v31  ;;  %v856_v5 = vadd.f32 %v855_v21, %v6459_v55  ;;  %v699_v7 = vadd.f32 %v698_v30, %v6461_v57 }
 0x49d   :  { %5700 = vpow2.f32 %v4878_v3  ;;  %v4879_v18 = vmul.f32 -1.442695, %v866_v1 }
 0x49f   :  { %5702 = vpow2.f32 %v4879_v18 }
 0x4aa   :  { %v5701_v38 = vpop.eup %5700 }
 0x4ab   :  { %v863_v42 = vadd.f32 1.0, %v5701_v38 }
 0x4ac   :  { %v5703_v17 = vpop.eup %5702 }
 0x4ad   :  { %5704 = vrcp.f32 %v863_v42  ;;  %v870_v59 = vadd.f32 1.0, %v5703_v17  ;;  %v7411_v17 = vmov 0.0  }
 0x4af   :  { %5706 = vrcp.f32 %v870_v59 }
 0x4ba   :  { %v5705_v20 = vpop.eup %5704 }
 0x4bb   :  { %v873_v3 = vmul.f32 %v5705_v20, %v856_v5 }
 0x4bc   :  { %v5707_v1 = vpop.eup %5706 }
 0x4bd   :  { %v874_v19 = vadd.f32 %v873_v3, %v699_v7  ;;  %v876_v18 = vsub.f32 1.0, %v5707_v1  ;;  %v878_v41 = vmul.f32 %v5707_v1, %v6173_v9  ;;  %v971_v9 = vld [vmem:[%s970_s24] sm:$0x1] }
 0x4bf   :  { %5708 = vtanh.f32 %v874_v19 }
 0x4cc   :  { %v5709_v42 = vpop.eup %5708 }
 0x4cd   :  { %v877_v23 = vmul.f32 %v5709_v42, %v876_v18 }
 0x4cf   :  { %v6466_v32 = vadd.f32 %v878_v41, %v877_v23 }
 0x4d1   :  { %5261 = vmatmul.mubr.msk.f32.vlgmr.msra.gmra.mxu1 %vm158_vm1, %v6466_v32  ;;  %5272 = vmatmul.mubr.msk.f32.vlgmr.msra.gmra.mxu0 %vm158_vm1, %v6466_v32  ;;  %881 = vst.msk [vmem:[#allocation11] sm:$0x1] %vm880_vm5, %v6466_v32 }
 0x4d2   :  { %5275 = vmatpush3.msra.mxu1 %v6128_v2  ;;  %5282 = vmatprep.mubr.msk.f32.mxu1 %vm6003_vm0, %v7411_v17 }
 0x4d3   :  { %5276 = vmatprep.subr.mxu1 %v7411_v17  ;;  %5286 = vmatpush3.msk.msra.mxu0 %vm323_vm3, %v6196_v24 }
 0x4d4   :  { %5277 = vmatpush3.msra.mxu1 %v6140_v4  ;;  %5287 = vmatprep.subr.mxu0 %v7411_v17 }
 0x4d5   :  { %5278 = vmatprep.subr.mxu1 %v7411_v17  ;;  %5288 = vmatpush3.msra.mxu0 %v6198_v25 }
 0x4d6   :  { %5279 = vmatpush3.msra.mxu1 %v6152_v6  ;;  %5289 = vmatprep.mubr.msk.f32.mxu0 %vm6003_vm0, %v7411_v17 }
 0x4d7   :  { %5280 = vmatprep.subr.mxu1 %v7411_v17  ;;  %5292 = vmatprep.subr.mxu0 %v7411_v17 }
 0x4d8   :  { %5281 = vmatpush3.msra.mxu1 %v6166_v8 }
 0x4d9   :  { %5283 = vmatmul.mubr.msk.f32.vlgmr.msra.gmra.mxu1 %vm158_vm1, %v971_v9  ;;  %5303 = vmatprep.subr.mxu1 %v7411_v17 }
 0x4da   :  { %5304 = vmatpush3.msra.mxu1 %v6208_v26  ;;  %5311 = vmatprep.mubr.msk.f32.mxu1 %vm6003_vm0, %v7411_v17 }
 0x4db   :  { %5305 = vmatprep.subr.mxu1 %v7411_v17 }
 0x4dc   :  { %5306 = vmatpush3.msra.mxu1 %v6214_v27 }
 0x4dd   :  { %5307 = vmatprep.subr.mxu1 %v7411_v17 }
 0x4de   :  { %5308 = vmatpush3.msra.mxu1 %v6221_v28 }
 0x4df   :  { %5309 = vmatprep.subr.mxu1 %v7411_v17 }
 0x4e0   :  { %5310 = vmatpush3.msra.mxu1 %v6228_v29 }
 0x4e1   :  { %5312 = vmatmul.mubr.msk.f32.vlgmr.msra.gmra.mxu1 %vm158_vm1, %v971_v9  ;;  %5314 = vmatprep.subr.mxu1 %v7411_v17 }
 0x4e2   :  { %5315 = vmatpush3.msra.mxu1 %v6289_v44  ;;  %5322 = vmatprep.mubr.msk.f32.mxu1 %vm6003_vm0, %v7411_v17 }
 0x4e3   :  { %5316 = vmatprep.subr.mxu1 %v7411_v17 }
 0x4e4   :  { %5317 = vmatpush3.msra.mxu1 %v6308_v47 }
 0x4e5   :  { %5318 = vmatprep.subr.mxu1 %v7411_v17 }
 0x4e6   :  { %5319 = vmatpush3.msra.mxu1 %v6327_v50 }
 0x4e7   :  { %5320 = vmatprep.subr.mxu1 %v7411_v17 }
 0x4e8   :  { %5321 = vmatpush3.msra.mxu1 %v6341_v52 }
 0x4e9   :  { %5325 = vmatprep.subr.mxu1 %v7411_v17 }
 0x591   :  { %v6513_v21 = vpop.f32.mrf.mxu1  ;;  %v1038_v30 = vpop.f32.mrf.mxu0 }
 0x592   :  { %7412 = vst [vmem:[#allocation32_spill] sm:$0xff] %v6513_v21 }
 0x593   :  { %v5262_v56 = vpop.f32.mrf.mxu1  ;;  %v5273_v22 = vpop.f32.mrf.mxu0 }
 0x599   :  { %v1111_v31 = vpop.f32.mrf.mxu1 }
 0x59a   :  { %v1112_v38 = vadd.f32 %v1111_v31, %v1038_v30 }
 0x59b   :  { %v5284_v58 = vpop.f32.mrf.mxu1 }
 0x59c   :  { %v1115_v59 = vadd.f32 %v1112_v38, %v6191_v13 }
 0x59e   :  { %v1116_v5 = vsel %vm306_vm2, %v1115_v59, -inf }
 0x59f   :  { %1117 = vmax.xlane.f32.xlu1 %v1116_v5  ;;  %v7413_v5 = vld [vmem:[#allocation25_spill] sm:$0xff] }
 0x5a1   :  { %v1340_v41 = vpop.f32.mrf.mxu1 }
 0x5a3   :  { %v5313_v9 = vpop.f32.mrf.mxu1 }
 0x628   :  { %v1118_v20 = vpop.xlane.xlu1 %1117 }
 0x629   :  { %v1119_v7 = vsub.f32 %v1115_v59, %v1118_v20  ;;  %v7414_v20 = vld [vmem:[#allocation26_spill] sm:$0xff] }
 0x62b   :  { %v1120_v3 = vmul.f32 1.442695, %v1119_v7  ;;  %v7415_v7 = vld [vmem:[#allocation19_spill] sm:$0xff] }
 0x62d   :  { %5710 = vpow2.f32 %v1120_v3  ;;  %v7416_v3 = vld [vmem:[#allocation27_spill] sm:$0xff] }
 0x63a   :  { %v5711_v19 = vpop.eup %5710 }
 0x63b   :  { %v1122_v1 = vsel %vm306_vm2, %v5711_v19, 0.0 }
 0x63c   :  { %1123 = vadd.xlane.f32.xlu1 %v1122_v1  ;;  %v7418_v1 = vld [vmem:[#allocation28_spill] sm:$0xff] }
 0x6c5   :  { %v1124_v18 = vpop.xlane.xlu1 %1123 }
 0x6c6   :  { %5712 = vrcp.f32 %v1124_v18  ;;  %v7419_v18 = vld [vmem:[#allocation21_spill] sm:$0xff] }
 0x6d3   :  { %v5713_v42 = vpop.eup %5712 }
 0x6d4   :  { %v1126_v23 = vmul.f32 %v5713_v42, %v5711_v19  ;;  %v7417_v19 = vld [vmem:[#allocation20_spill] sm:$0xff]  ;;  %v7420_v42 = vld [vmem:[#allocation29_spill] sm:$0xff] }
 0x6d6   :  { %1127 = vst.msk [vmem:[#allocation13 + $0x1] sm:$0x1] %vm306_vm2, %v1126_v23  ;;  %5290 = vmatmul.mubr.msk.f32.vlgmr.msra.gmra.mxu0 %vm319_vm4, %v1126_v23  ;;  %v7421_v23 = vld [vmem:[#allocation22_spill] sm:$0xff] }
 0x6d7   :  { %5293 = vmatpush3.msra.mxu0 %v6239_v33  ;;  %5300 = vmatprep.mubr.msk.f32.mxu0 %vm6003_vm0, %v7411_v17 }
 0x6d8   :  { %5294 = vmatprep.subr.mxu0 %v7411_v17 }
 0x6d9   :  { %5295 = vmatpush3.msra.mxu0 %v6246_v34 }
 0x6da   :  { %5296 = vmatprep.subr.mxu0 %v7411_v17 }
 0x6db   :  { %5297 = vmatpush3.msra.mxu0 %v6255_v35 }
 0x6dc   :  { %5298 = vmatprep.subr.mxu0 %v7411_v17 }
 0x6dd   :  { %5299 = vmatpush3.msra.mxu0 %v6264_v36 }
 0x6de   :  { %1373 = vmatprep.subr.mxu0 %v6270_v37 }
 0x796   :  { %v1197_v30 = vpop.f32.mrf.mxu0 }
 0x797   :  { %5301 = vmatmul.mubr.msk.f32.vlgmr.msra.gmra.mxu0 %vm158_vm1, %v1197_v30 }
 0x798   :  { %v5291_v56 = vpop.f32.mrf.mxu0  ;;  %1374 = vmatpush1.msra.mxu0 %v6276_v40  ;;  %1413 = vmatprep.mubr.f32.mxu0 %v7411_v17 }
 0x799   :  { %1375 = vmatprep.subr.mxu0 %v6284_v43 }
 0x79a   :  { %1376 = vmatpush1.msra.mxu0 %v6296_v45 }
 0x79b   :  { %1377 = vmatprep.subr.mxu0 %v6303_v46 }
 0x79c   :  { %1378 = vmatpush1.msra.mxu0 %v6315_v48 }
 0x79d   :  { %1379 = vmatprep.subr.mxu0 %v6322_v49 }
 0x79e   :  { %1380 = vmatpush1.msra.mxu0 %v6334_v51 }
 0x79f   :  { %1514 = vmatprep.subr.mxu0 %v6343_v53 }
 0x857   :  { %v1270_v22 = vpop.f32.mrf.mxu0 }
 0x858   :  { %v1341_v31 = vadd.f32 %v1340_v41, %v1270_v22 }
 0x859   :  { %v5302_v38 = vpop.f32.mrf.mxu0 }
 0x85a   :  { %v1344_v58 = vadd.f32 %v1341_v31, %v6351_v54  ;;  %v7422_v38 = vld [vmem:[#allocation30_spill] sm:$0xff] }
 0x85c   :  { %v1345_v59 = vmax.f32 %v1344_v58, 0.0 }
 0x85e   :  { %4888 = vmatmul.mubr.msk.f32.vlgmr.msra.gmra.mxu0 %vm158_vm1, %v1345_v59  ;;  %5323 = vmatmul.mubr.msk.f32.vlgmr.msra.gmra.mxu1 %vm158_vm1, %v1345_v59  ;;  %v7423_v59 = vld [vmem:[#allocation31_spill] sm:$0xff] }
 0x85f   :  { %1515 = vmatpush1.msra.mxu0 %v6354_v60  ;;  %5326 = vmatpush3.msra.mxu1 %v6358_v62 }
 0x860   :  { %1516 = vmatprep.subr.mxu0 %v6356_v61  ;;  %5327 = vmatprep.subr.mxu1 %v7411_v17 }
 0x861   :  { %1517 = vmatpush1.msra.mxu0 %v6362_v63  ;;  %5328 = vmatpush3.msra.mxu1 %v6368_v11 }
 0x862   :  { %1518 = vmatprep.subr.mxu0 %v6365_v10  ;;  %5329 = vmatprep.subr.mxu1 %v7411_v17 }
 0x863   :  { %1519 = vmatpush1.msra.mxu0 %v6371_v12  ;;  %5330 = vmatpush3.msra.mxu1 %v6378_v15 }
 0x864   :  { %1520 = vmatprep.subr.mxu0 %v6375_v14  ;;  %5331 = vmatprep.subr.mxu1 %v7411_v17 }
 0x865   :  { %1521 = vmatpush1.msra.mxu0 %v6381_v16  ;;  %1554 = vmatprep.mubr.f32.mxu0 %v7411_v17 }
 0x866   :  { %5332 = vmatpush3.msra.mxu1 %v7413_v5  ;;  %5333 = vmatprep.mubr.msk.f32.mxu1 %vm6003_vm0, %v7411_v17 }
 0x867   :  { %4890 = vmatmul.mubr.msk.f32.vlgmr.msra.gmra.mxu0 %vm158_vm1, %v6466_v32  ;;  %5334 = vmatmul.mubr.msk.f32.vlgmr.msra.gmra.mxu1 %vm158_vm1, %v6466_v32 }
 0x868   :  { %5336 = vmatprep.subr.mxu0 %v7411_v17  ;;  %5347 = vmatprep.subr.mxu1 %v7411_v17 }
 0x869   :  { %5337 = vmatpush3.msra.mxu0 %v7414_v20  ;;  %5348 = vmatpush3.msra.mxu1 %v7415_v7 }
 0x86a   :  { %5338 = vmatprep.subr.mxu0 %v7411_v17  ;;  %5349 = vmatprep.subr.mxu1 %v7411_v17 }
 0x86b   :  { %5339 = vmatpush3.msra.mxu0 %v7416_v3  ;;  %5350 = vmatpush3.msra.mxu1 %v7417_v19 }
 0x86c   :  { %5340 = vmatprep.subr.mxu0 %v7411_v17  ;;  %5351 = vmatprep.subr.mxu1 %v7411_v17 }
 0x86d   :  { %5341 = vmatpush3.msra.mxu0 %v7418_v1  ;;  %5352 = vmatpush3.msra.mxu1 %v7419_v18 }
 0x86e   :  { %5342 = vmatprep.subr.mxu0 %v7411_v17  ;;  %5353 = vmatprep.subr.mxu1 %v7411_v17 }
 0x86f   :  { %5343 = vmatpush3.msra.mxu0 %v7420_v42  ;;  %5344 = vmatprep.mubr.msk.f32.mxu0 %vm6003_vm0, %v7411_v17 }
 0x870   :  { %5354 = vmatpush3.msra.mxu1 %v7421_v23  ;;  %5355 = vmatprep.mubr.msk.f32.mxu1 %vm6003_vm0, %v7411_v17 }
 0x871   :  { %5358 = vmatprep.subr.mxu0 %v7411_v17  ;;  %5369 = vmatprep.subr.mxu1 %v7411_v17 }
 0x91e   :  { %v1486_v41 = vpop.f32.mrf.mxu1  ;;  %v1415_v30 = vpop.f32.mrf.mxu0 }
 0x91f   :  { %v1416_v58 = vadd.f32 %v1415_v30, %v7422_v38 }
 0x920   :  { %v5324_v9 = vpop.f32.mrf.mxu1  ;;  %v1417_v56 = vpop.f32.mrf.mxu0 }
 0x921   :  { %v1418_v1 = vadd.f32 %v1417_v56, %v6455_v39 }
 0x927   :  { %v1556_v22 = vpop.f32.mrf.mxu0  ;;  %v1627_v31 = vpop.f32.mrf.mxu1 }
 0x928   :  { %v1557_v7 = vadd.f32 %v1556_v22, %v7423_v59  ;;  %v1628_v30 = vadd.f32 %v1627_v31, %v6459_v55 }
 0x929   :  { %v1558_v19 = vpop.f32.mrf.mxu0  ;;  %v5335_v18 = vpop.f32.mrf.mxu1 }
 0x92a   :  { %v1631_v23 = vadd.f32 %v1557_v7, %v1416_v58  ;;  %v1559_v42 = vadd.f32 %v1558_v19, %v6453_v0  ;;  %v1487_v18 = vadd.f32 %v1486_v41, %v6461_v57 }
 0x92c   :  { %v4892_v21 = vmul.f32 -1.442695, %v1631_v23  ;;  %v1638_v3 = vadd.f32 %v1559_v42, %v1418_v1 }
 0x92e   :  { %5714 = vpow2.f32 %v4892_v21  ;;  %v4893_v20 = vmul.f32 -1.442695, %v1638_v3 }
 0x930   :  { %5716 = vpow2.f32 %v4893_v20 }
 0x93b   :  { %v5715_v9 = vpop.eup %5714 }
 0x93c   :  { %v1635_v5 = vadd.f32 1.0, %v5715_v9 }
 0x93d   :  { %v5717_v16 = vpop.eup %5716 }
 0x93e   :  { %5718 = vrcp.f32 %v1635_v5  ;;  %v1642_v14 = vadd.f32 1.0, %v5717_v16 }
 0x940   :  { %5720 = vrcp.f32 %v1642_v14 }
 0x94b   :  { %v5719_v22 = vpop.eup %5718 }
 0x94c   :  { %v1645_v58 = vmul.f32 %v5719_v22, %v1628_v30 }
 0x94d   :  { %v5721_v19 = vpop.eup %5720 }
 0x94e   :  { %v1646_v7 = vadd.f32 %v1645_v58, %v1487_v18  ;;  %v1648_v56 = vsub.f32 1.0, %v5721_v19  ;;  %v1650_v20 = vmul.f32 %v5721_v19, %v6466_v32 }
 0x950   :  { %5722 = vtanh.f32 %v1646_v7 }
 0x95d   :  { %v5723_v21 = vpop.eup %5722 }
 0x95e   :  { %v1649_v3 = vmul.f32 %v5723_v21, %v1648_v56 }
 0x960   :  { %v6593_v1 = vadd.f32 %v1650_v20, %v1649_v3 }
 0x962   :  { %5345 = vmatmul.mubr.msk.f32.vlgmr.msra.gmra.mxu0 %vm158_vm1, %v6593_v1  ;;  %5356 = vmatmul.mubr.msk.f32.vlgmr.msra.gmra.mxu1 %vm158_vm1, %v6593_v1  ;;  %1652 = vst.msk [vmem:[#allocation11 + $0x1] sm:$0x1] %vm880_vm5, %v6593_v1 }
 0x963   :  { %5359 = vmatpush3.msra.mxu0 %v6128_v2  ;;  %5366 = vmatprep.mubr.msk.f32.mxu0 %vm6003_vm0, %v7411_v17  ;;  %v1741_v2 = vld [vmem:[%s1740_s26] sm:$0x1] }
 0x964   :  { %5360 = vmatprep.subr.mxu0 %v7411_v17  ;;  %5370 = vmatpush3.msk.msra.mxu1 %vm323_vm3, %v6196_v24 }
 0x965   :  { %5361 = vmatpush3.msra.mxu0 %v6140_v4  ;;  %5371 = vmatprep.subr.mxu1 %v7411_v17 }
 0x966   :  { %5362 = vmatprep.subr.mxu0 %v7411_v17  ;;  %5372 = vmatpush3.msra.mxu1 %v6198_v25 }
 0x967   :  { %5363 = vmatpush3.msra.mxu0 %v6152_v6  ;;  %5373 = vmatprep.mubr.msk.f32.mxu1 %vm6003_vm0, %v7411_v17 }
 0x968   :  { %5364 = vmatprep.subr.mxu0 %v7411_v17  ;;  %5376 = vmatprep.subr.mxu1 %v7411_v17 }
 0x969   :  { %5365 = vmatpush3.msra.mxu0 %v6166_v8 }
 0x96a   :  { %5367 = vmatmul.mubr.msk.f32.vlgmr.msra.gmra.mxu0 %vm158_vm1, %v1741_v2  ;;  %5387 = vmatprep.subr.mxu0 %v7411_v17 }
 0x96b   :  { %5388 = vmatpush3.msra.mxu0 %v6208_v26  ;;  %5395 = vmatprep.mubr.msk.f32.mxu0 %vm6003_vm0, %v7411_v17 }
 0x96c   :  { %5389 = vmatprep.subr.mxu0 %v7411_v17 }
 0x96d   :  { %5390 = vmatpush3.msra.mxu0 %v6214_v27 }
 0x96e   :  { %5391 = vmatprep.subr.mxu0 %v7411_v17 }
 0x96f   :  { %5392 = vmatpush3.msra.mxu0 %v6221_v28 }
 0x970   :  { %5393 = vmatprep.subr.mxu0 %v7411_v17 }
 0x971   :  { %5394 = vmatpush3.msra.mxu0 %v6228_v29 }
 0x972   :  { %5396 = vmatmul.mubr.msk.f32.vlgmr.msra.gmra.mxu0 %vm158_vm1, %v1741_v2  ;;  %5398 = vmatprep.subr.mxu0 %v7411_v17 }
 0x973   :  { %5399 = vmatpush3.msra.mxu0 %v6289_v44  ;;  %5406 = vmatprep.mubr.msk.f32.mxu0 %vm6003_vm0, %v7411_v17 }
 0x974   :  { %5400 = vmatprep.subr.mxu0 %v7411_v17 }
 0x975   :  { %5401 = vmatpush3.msra.mxu0 %v6308_v47 }
 0x976   :  { %5402 = vmatprep.subr.mxu0 %v7411_v17 }
 0x977   :  { %5403 = vmatpush3.msra.mxu0 %v6327_v50 }
 0x978   :  { %5404 = vmatprep.subr.mxu0 %v7411_v17 }
 0x979   :  { %5405 = vmatpush3.msra.mxu0 %v6341_v52 }
 0x97a   :  { %5409 = vmatprep.subr.mxu0 %v7411_v17 }
 0xa22   :  { %v6640_v4 = vpop.f32.mrf.mxu0  ;;  %v1808_v6 = vpop.f32.mrf.mxu1 }
 0xa23   :  { %7424 = vst [vmem:[#allocation19_spill] sm:$0xff] %v6640_v4 }
 0xa24   :  { %v5346_v8 = vpop.f32.mrf.mxu0  ;;  %v5357_v24 = vpop.f32.mrf.mxu1 }
 0xa2a   :  { %v1881_v25 = vpop.f32.mrf.mxu0 }
 0xa2b   :  { %v1882_v26 = vadd.f32 %v1881_v25, %v1808_v6 }
 0xa2c   :  { %v5368_v27 = vpop.f32.mrf.mxu0 }
 0xa2d   :  { %v1885_v28 = vadd.f32 %v1882_v26, %v6191_v13 }
 0xa2f   :  { %v1886_v29 = vsel %vm306_vm2, %v1885_v28, -inf }
 0xa30   :  { %1887 = vmax.xlane.f32.xlu0 %v1886_v29 }
 0xa32   :  { %v2110_v13 = vpop.f32.mrf.mxu0 }
 0xa34   :  { %v5397_v9 = vpop.f32.mrf.mxu0 }
 0xa35   :  { %v6764_v9 = vld [vmem:[%s7341_s4 + $0x10] sm:$0xff] }
 0xab9   :  { %v1888_v14 = vpop.xlane.xlu0 %1887 }
 0xaba   :  { %v1889_v16 = vsub.f32 %v1885_v28, %v1888_v14 }
 0xabc   :  { %v1890_v32 = vmul.f32 1.442695, %v1889_v16 }
 0xabe   :  { %5724 = vpow2.f32 %v1890_v32 }
 0xacb   :  { %v5725_v5 = vpop.eup %5724 }
 0xacc   :  { %v1892_v42 = vsel %vm306_vm2, %v5725_v5, 0.0 }
 0xacd   :  { %1893 = vadd.xlane.f32.xlu1 %v1892_v42 }
 0xb56   :  { %v1894_v41 = vpop.xlane.xlu1 %1893 }
 0xb57   :  { %5726 = vrcp.f32 %v1894_v41 }
 0xb64   :  { %v5727_v31 = vpop.eup %5726 }
 0xb65   :  { %v1896_v23 = vmul.f32 %v5727_v31, %v5725_v5 }
 0xb67   :  { %1897 = vst.msk [vmem:[#allocation13 + $0x2] sm:$0x1] %vm306_vm2, %v1896_v23  ;;  %5374 = vmatmul.mubr.msk.f32.vlgmr.msra.gmra.mxu1 %vm319_vm4, %v1896_v23 }
 0xb68   :  { %5377 = vmatpush3.msra.mxu1 %v6239_v33  ;;  %5384 = vmatprep.mubr.msk.f32.mxu1 %vm6003_vm0, %v7411_v17 }
 0xb69   :  { %5378 = vmatprep.subr.mxu1 %v7411_v17 }
 0xb6a   :  { %5379 = vmatpush3.msra.mxu1 %v6246_v34 }
 0xb6b   :  { %5380 = vmatprep.subr.mxu1 %v7411_v17 }
 0xb6c   :  { %5381 = vmatpush3.msra.mxu1 %v6255_v35 }
 0xb6d   :  { %5382 = vmatprep.subr.mxu1 %v7411_v17 }
 0xb6e   :  { %5383 = vmatpush3.msra.mxu1 %v6264_v36 }
 0xb6f   :  { %2143 = vmatprep.subr.mxu1 %v6270_v37 }
 0xc27   :  { %v1967_v33 = vpop.f32.mrf.mxu1 }
 0xc28   :  { %5385 = vmatmul.mubr.msk.f32.vlgmr.msra.gmra.mxu1 %vm158_vm1, %v1967_v33  ;;  %v6769_v33 = vld [vmem:[#allocation7] sm:$0xff] }
 0xc29   :  { %v5375_v30 = vpop.f32.mrf.mxu1  ;;  %2144 = vmatpush1.msra.mxu1 %v6276_v40  ;;  %2183 = vmatprep.mubr.f32.mxu1 %v7411_v17 }
 0xc2a   :  { %2145 = vmatprep.subr.mxu1 %v6284_v43  ;;  %v7425_v43 = vld [vmem:[#allocation23_spill] sm:$0xff]  ;;  %v6775_v30 = vld [vmem:[%s7341_s4 + $0x8] sm:$0xff] }
 0xc2b   :  { %2146 = vmatpush1.msra.mxu1 %v6296_v45  ;;  %v7426_v45 = vld [vmem:[#allocation24_spill] sm:$0xff] }
 0xc2c   :  { %2147 = vmatprep.subr.mxu1 %v6303_v46  ;;  %v7427_v46 = vld [vmem:[#allocation25_spill] sm:$0xff] }
 0xc2d   :  { %2148 = vmatpush1.msra.mxu1 %v6315_v48  ;;  %v7428_v48 = vld [vmem:[#allocation26_spill] sm:$0xff] }
 0xc2e   :  { %2149 = vmatprep.subr.mxu1 %v6322_v49  ;;  %v6697_v49 = vld [vmem:[%s7342_s5 + $0x18] sm:$0xff] }
 0xc2f   :  { %2150 = vmatpush1.msra.mxu1 %v6334_v51  ;;  %v7429_v51 = vld [vmem:[#allocation27_spill] sm:$0xff] }
 0xc30   :  { %2284 = vmatprep.subr.mxu1 %v6343_v53  ;;  %v6706_v53 = vld [vmem:[%s7342_s5 + $0x10] sm:$0xff] }
 0xc31   :  { %7430 = vst [vmem:[#allocation20_spill] sm:$0xff] %v6706_v53 }
 0xce8   :  { %v2040_v34 = vpop.f32.mrf.mxu1 }
 0xce9   :  { %v2111_v35 = vadd.f32 %v2110_v13, %v2040_v34  ;;  %v6751_v13 = vld [vmem:[%s7341_s4 + $0x18] sm:$0xff] }
 0xcea   :  { %v5386_v36 = vpop.f32.mrf.mxu1 }
 0xceb   :  { %v2114_v37 = vadd.f32 %v2111_v35, %v6351_v54  ;;  %v7431_v54 = vld [vmem:[#allocation28_spill] sm:$0xff]  ;;  %v6785_v35 = vld [vmem:[%s7341_s4] sm:$0xff]  ;;  %v6793_v36 = vld [vmem:[%s7344_s7 + $0x18] sm:$0xff] }
 0xced   :  { %v2115_v40 = vmax.f32 %v2114_v37, 0.0  ;;  %v6802_v37 = vld [vmem:[%s7344_s7 + $0x10] sm:$0xff] }
 0xcef   :  { %4902 = vmatmul.mubr.msk.f32.vlgmr.msra.gmra.mxu1 %vm158_vm1, %v2115_v40  ;;  %5407 = vmatmul.mubr.msk.f32.vlgmr.msra.gmra.mxu0 %vm158_vm1, %v2115_v40  ;;  %v6809_v40 = vld [vmem:[%s7344_s7 + $0x8] sm:$0xff] }
 0xcf0   :  { %2285 = vmatpush1.msra.mxu1 %v6354_v60  ;;  %5410 = vmatpush3.msra.mxu0 %v6358_v62  ;;  %v6715_v60 = vld [vmem:[%s7342_s5 + $0x8] sm:$0xff]  ;;  %v6726_v62 = vld [vmem:[%s7342_s5] sm:$0xff]  ;;  %s4909_s5 = sld [smem:[#allocation3 + $0x3]] }
 0xcf1   :  { %2286 = vmatprep.subr.mxu1 %v6356_v61  ;;  %5411 = vmatprep.subr.mxu0 %v7411_v17  ;;  %7432 = vst [vmem:[#allocation21_spill] sm:$0xff] %v6715_v60  ;;  %v7433_v61 = vld [vmem:[#allocation29_spill] sm:$0xff]  ;;  %7434 = vst [vmem:[#allocation22_spill] sm:$0xff] %v6726_v62 }
 0xcf2   :  { %2287 = vmatpush1.msra.mxu1 %v6362_v63  ;;  %5412 = vmatpush3.msra.mxu0 %v6368_v11 }
 0xcf3   :  { %2288 = vmatprep.subr.mxu1 %v6365_v10  ;;  %5413 = vmatprep.subr.mxu0 %v7411_v17 }
 0xcf4   :  { %2289 = vmatpush1.msra.mxu1 %v6371_v12  ;;  %5414 = vmatpush3.msra.mxu0 %v6378_v15 }
 0xcf5   :  { %2290 = vmatprep.subr.mxu1 %v7425_v43  ;;  %5415 = vmatprep.subr.mxu0 %v7411_v17  ;;  %v6816_v43 = vld [vmem:[%s7344_s7] sm:$0xff] }
 0xcf6   :  { %2291 = vmatpush1.msra.mxu1 %v7426_v45  ;;  %2324 = vmatprep.mubr.f32.mxu1 %v7411_v17  ;;  %s2510_s23 = scalar_lea.vmem [#allocation4], %s4909_s5  ;;  %s4923_s5 = sld [smem:[#allocation3 + $0x4]] }
 0xcf7   :  { %5416 = vmatpush3.msra.mxu0 %v7427_v46  ;;  %5417 = vmatprep.mubr.msk.f32.mxu0 %vm6003_vm0, %v7411_v17  ;;  %v2511_v34 = vld [vmem:[%s2510_s23] sm:$0x1] }
 0xcf8   :  { %4904 = vmatmul.mubr.msk.f32.vlgmr.msra.gmra.mxu1 %vm158_vm1, %v6593_v1  ;;  %5418 = vmatmul.mubr.msk.f32.vlgmr.msra.gmra.mxu0 %vm158_vm1, %v6593_v1 }
 0xcf9   :  { %5420 = vmatprep.subr.mxu1 %v7411_v17  ;;  %5431 = vmatprep.subr.mxu0 %v7411_v17 }
 0xcfa   :  { %5421 = vmatpush3.msra.mxu1 %v7428_v48  ;;  %5432 = vmatpush3.msra.mxu0 %v6697_v49 }
 0xcfb   :  { %5422 = vmatprep.subr.mxu1 %v7411_v17  ;;  %5433 = vmatprep.subr.mxu0 %v7411_v17 }
 0xcfc   :  { %5423 = vmatpush3.msra.mxu1 %v7429_v51  ;;  %5434 = vmatpush3.msra.mxu0 %v6706_v53  ;;  %s3280_s20 = scalar_lea.vmem [#allocation4], %s4923_s5 }
 0xcfd   :  { %5424 = vmatprep.subr.mxu1 %v7411_v17  ;;  %5435 = vmatprep.subr.mxu0 %v7411_v17 }
 0xcfe   :  { %5425 = vmatpush3.msra.mxu1 %v7431_v54  ;;  %5436 = vmatpush3.msra.mxu0 %v6715_v60 }
 0xcff   :  { %5426 = vmatprep.subr.mxu1 %v7411_v17  ;;  %5437 = vmatprep.subr.mxu0 %v7411_v17 }
 0xd00   :  { %5427 = vmatpush3.msra.mxu1 %v7433_v61  ;;  %5428 = vmatprep.mubr.msk.f32.mxu1 %vm6003_vm0, %v7411_v17 }
 0xd01   :  { %5438 = vmatpush3.msra.mxu0 %v6726_v62  ;;  %5439 = vmatprep.mubr.msk.f32.mxu0 %vm6003_vm0, %v7411_v17 }
 0xd02   :  { %5442 = vmatprep.subr.mxu1 %v7411_v17  ;;  %5453 = vmatprep.subr.mxu0 %v7411_v17 }
 0xdaf   :  { %v2256_v63 = vpop.f32.mrf.mxu0  ;;  %v2185_v11 = vpop.f32.mrf.mxu1 }
 0xdb0   :  { %v2186_v18 = vadd.f32 %v2185_v11, %v7422_v38  ;;  %v2257_v29 = vadd.f32 %v2256_v63, %v6461_v57 }
 0xdb1   :  { %v5408_v10 = vpop.f32.mrf.mxu0  ;;  %v2187_v12 = vpop.f32.mrf.mxu1 }
 0xdb2   :  { %v2188_v20 = vadd.f32 %v2187_v12, %v6455_v39 }
 0xdb8   :  { %v2326_v15 = vpop.f32.mrf.mxu1  ;;  %v2397_v22 = vpop.f32.mrf.mxu0 }
 0xdb9   :  { %v2327_v58 = vadd.f32 %v2326_v15, %v7423_v59  ;;  %v2398_v27 = vadd.f32 %v2397_v22, %v6459_v55 }
 0xdba   :  { %v2328_v7 = vpop.f32.mrf.mxu1  ;;  %v5419_v19 = vpop.f32.mrf.mxu0 }
 0xdbb   :  { %v2401_v56 = vadd.f32 %v2327_v58, %v2186_v18  ;;  %v2329_v3 = vadd.f32 %v2328_v7, %v6453_v0 }
 0xdbd   :  { %v4906_v21 = vmul.f32 -1.442695, %v2401_v56  ;;  %v2408_v2 = vadd.f32 %v2329_v3, %v2188_v20  ;;  %v6855_v3 = vld [vmem:[%s7345_s8 + $0x10] sm:$0xff]  ;;  %v6862_v20 = vld [vmem:[%s7345_s8 + $0x8] sm:$0xff] }
 0xdbf   :  { %5728 = vpow2.f32 %v4906_v21  ;;  %v4907_v6 = vmul.f32 -1.442695, %v2408_v2  ;;  %v6846_v21 = vld [vmem:[%s7345_s8 + $0x18] sm:$0xff]  ;;  %v6869_v2 = vld [vmem:[%s7345_s8] sm:$0xff] }
 0xdc1   :  { %5730 = vpow2.f32 %v4907_v6  ;;  %v6875_v6 = vld [vmem:[%s7347_s10 + $0x50] sm:$0xff] }
 0xdcc   :  { %v5729_v8 = vpop.eup %5728 }
 0xdcd   :  { %v2405_v24 = vadd.f32 1.0, %v5729_v8 }
 0xdce   :  { %v5731_v25 = vpop.eup %5730 }
 0xdcf   :  { %5732 = vrcp.f32 %v2405_v24  ;;  %v2412_v26 = vadd.f32 1.0, %v5731_v25 }
 0xdd1   :  { %5734 = vrcp.f32 %v2412_v26 }
 0xddc   :  { %v5733_v28 = vpop.eup %5732 }
 0xddd   :  { %v2415_v14 = vmul.f32 %v5733_v28, %v2398_v27  ;;  %v6882_v27 = vld [vmem:[%s7347_s10 + $0x48] sm:$0xff]  ;;  %v6889_v28 = vld [vmem:[%s7347_s10 + $0x38] sm:$0xff] }
 0xdde   :  { %v5735_v32 = vpop.eup %5734 }
 0xddf   :  { %v2416_v16 = vadd.f32 %v2415_v14, %v2257_v29  ;;  %v2418_v5 = vsub.f32 1.0, %v5735_v32  ;;  %v2420_v31 = vmul.f32 %v5735_v32, %v6593_v1  ;;  %v6757_v1 = vld [vmem:[#allocation7 + $0x8] sm:$0x3]  ;;  %v6895_v29 = vld [vmem:[%s7347_s10 + $0x30] sm:$0xff]  ;;  %v6913_v32 = vld [vmem:[%s7347_s10 + $0x8] sm:$0xff] }
 0xde0   :  { %v6901_v14 = vld [vmem:[%s7347_s10 + $0x20] sm:$0xff] }
 0xde1   :  { %5736 = vtanh.f32 %v2416_v16  ;;  %v6907_v16 = vld [vmem:[%s7347_s10 + $0x18] sm:$0xff] }
 0xdee   :  { %v5737_v42 = vpop.eup %5736 }
 0xdef   :  { %v2419_v41 = vmul.f32 %v5737_v42, %v2418_v5  ;;  %v6919_v5 = vld [vmem:[%s7347_s10] sm:$0xff]  ;;  %v6922_v42 = vld [vmem:[#allocation9 + $0x50] sm:$0xff] }
 0xdf1   :  { %v6740_v23 = vadd.f32 %v2420_v31, %v2419_v41 }
 0xdf3   :  { %5429 = vmatmul.mubr.msk.f32.vlgmr.msra.gmra.mxu1 %vm158_vm1, %v6740_v23  ;;  %5440 = vmatmul.mubr.msk.f32.vlgmr.msra.gmra.mxu0 %vm158_vm1, %v6740_v23  ;;  %2422 = vst.msk [vmem:[#allocation11 + $0x2] sm:$0x1] %vm880_vm5, %v6740_v23 }
 0xdf4   :  { %5443 = vmatpush3.msra.mxu1 %v6751_v13  ;;  %5450 = vmatprep.mubr.msk.f32.mxu1 %vm6003_vm0, %v7411_v17 }
 0xdf5   :  { %5444 = vmatprep.subr.mxu1 %v7411_v17  ;;  %5454 = vmatpush3.msk.msra.mxu0 %vm323_vm3, %v6757_v1 }
 0xdf6   :  { %5445 = vmatpush3.msra.mxu1 %v6764_v9  ;;  %5455 = vmatprep.subr.mxu0 %v7411_v17 }
 0xdf7   :  { %5446 = vmatprep.subr.mxu1 %v7411_v17  ;;  %5456 = vmatpush3.msra.mxu0 %v6769_v33 }
 0xdf8   :  { %5447 = vmatpush3.msra.mxu1 %v6775_v30  ;;  %5457 = vmatprep.mubr.msk.f32.mxu0 %vm6003_vm0, %v7411_v17 }
 0xdf9   :  { %5448 = vmatprep.subr.mxu1 %v7411_v17  ;;  %5460 = vmatprep.subr.mxu0 %v7411_v17 }
 0xdfa   :  { %5449 = vmatpush3.msra.mxu1 %v6785_v35 }
 0xdfb   :  { %5451 = vmatmul.mubr.msk.f32.vlgmr.msra.gmra.mxu1 %vm158_vm1, %v2511_v34  ;;  %5471 = vmatprep.subr.mxu1 %v7411_v17 }
 0xdfc   :  { %5472 = vmatpush3.msra.mxu1 %v6793_v36  ;;  %5479 = vmatprep.mubr.msk.f32.mxu1 %vm6003_vm0, %v7411_v17 }
 0xdfd   :  { %5473 = vmatprep.subr.mxu1 %v7411_v17 }
 0xdfe   :  { %5474 = vmatpush3.msra.mxu1 %v6802_v37 }
 0xdff   :  { %5475 = vmatprep.subr.mxu1 %v7411_v17 }
 0xe00   :  { %5476 = vmatpush3.msra.mxu1 %v6809_v40 }
 0xe01   :  { %5477 = vmatprep.subr.mxu1 %v7411_v17 }
 0xe02   :  { %5478 = vmatpush3.msra.mxu1 %v6816_v43 }
 0xe03   :  { %5480 = vmatmul.mubr.msk.f32.vlgmr.msra.gmra.mxu1 %vm158_vm1, %v2511_v34  ;;  %5482 = vmatprep.subr.mxu1 %v7411_v17 }
 0xe04   :  { %5483 = vmatpush3.msra.mxu1 %v6289_v44  ;;  %5490 = vmatprep.mubr.msk.f32.mxu1 %vm6003_vm0, %v7411_v17 }
 0xe05   :  { %5484 = vmatprep.subr.mxu1 %v7411_v17 }
 0xe06   :  { %5485 = vmatpush3.msra.mxu1 %v6308_v47  ;;  %v6836_v47 = vld [vmem:[%s7343_s6] sm:$0x1] }
 0xe07   :  { %5486 = vmatprep.subr.mxu1 %v7411_v17 }
 0xe08   :  { %5487 = vmatpush3.msra.mxu1 %v6327_v50 }
 0xe09   :  { %5488 = vmatprep.subr.mxu1 %v7411_v17 }
 0xe0a   :  { %5489 = vmatpush3.msra.mxu1 %v6341_v52 }
 0xe0b   :  { %5493 = vmatprep.subr.mxu1 %v7411_v17 }
 0xeb3   :  { %v6831_v45 = vpop.f32.mrf.mxu1  ;;  %v2578_v44 = vpop.f32.mrf.mxu0 }
 0xeb4   :  { %7435 = vst [vmem:[#allocation30_spill] sm:$0xff] %v6831_v45 }
 0xeb5   :  { %v5430_v46 = vpop.f32.mrf.mxu1  ;;  %v5441_v61 = vpop.f32.mrf.mxu0 }
 0xebb   :  { %v2651_v63 = vpop.f32.mrf.mxu1 }
 0xebc   :  { %v2652_v10 = vadd.f32 %v2651_v63, %v2578_v44  ;;  %v6928_v44 = vld [vmem:[%s7346_s9] sm:$0x1]  ;;  %v6933_v63 = vld [vmem:[#allocation9 + $0x48] sm:$0xff] }
 0xebd   :  { %v5452_v11 = vpop.f32.mrf.mxu1 }
 0xebe   :  { %v2655_v50 = vadd.f32 %v6836_v47, %v2652_v10  ;;  %v6936_v10 = vld [vmem:[#allocation9 + $0x58] sm:$0xff] }
 0xebf   :  { %v6939_v11 = vld [vmem:[#allocation9 + $0x38] sm:$0xff] }
 0xec0   :  { %v2656_v12 = vsel %vm306_vm2, %v2655_v50, -inf }
 0xec1   :  { %2657 = vmax.xlane.f32.xlu0 %v2656_v12  ;;  %v6946_v12 = vld [vmem:[#allocation9 + $0x40] sm:$0xff] }
 0xec3   :  { %v2880_v8 = vpop.f32.mrf.mxu1 }
 0xec5   :  { %v5481_v24 = vpop.f32.mrf.mxu1 }
 0xf4a   :  { %v2658_v52 = vpop.xlane.xlu0 %2657 }
 0xf4b   :  { %v2659_v15 = vsub.f32 %v2655_v50, %v2658_v52  ;;  %v6943_v50 = vld [vmem:[#allocation9 + $0x30] sm:$0xff]  ;;  %v6949_v52 = vld [vmem:[#allocation9 + $0x20] sm:$0xff] }
 0xf4d   :  { %v2660_v22 = vmul.f32 1.442695, %v2659_v15  ;;  %v6953_v15 = vld [vmem:[#allocation9 + $0x18] sm:$0xff] }
 0xf4f   :  { %5738 = vpow2.f32 %v2660_v22  ;;  %v6956_v22 = vld [vmem:[#allocation9 + $0x28] sm:$0xff] }
 0xf50   :  { %7436 = vst [vmem:[#allocation31_spill] sm:$0xff] %v6956_v22 }
 0xf5c   :  { %v5739_v18 = vpop.eup %5738 }
 0xf5d   :  { %v2662_v58 = vsel %vm306_vm2, %v5739_v18, 0.0 }
 0xf5e   :  { %2663 = vadd.xlane.f32.xlu1 %v2662_v58  ;;  %v6963_v58 = vld [vmem:[#allocation9] sm:$0xff] }
 0xf5f   :  { %7438 = vst [vmem:[#allocation24_spill] sm:$0xff] %v6963_v58 }
 0xfe7   :  { %v2664_v7 = vpop.xlane.xlu1 %2663 }
 0xfe8   :  { %5740 = vrcp.f32 %v2664_v7  ;;  %v6967_v7 = vld [vmem:[#allocation9 + $0x10] sm:$0xff] }
 0xfe9   :  { %7439 = vst [vmem:[#allocation25_spill] sm:$0xff] %v6967_v7 }
 0xff5   :  { %v5741_v19 = vpop.eup %5740 }
 0xff6   :  { %v2666_v56 = vmul.f32 %v5741_v19, %v5739_v18  ;;  %v6959_v18 = vld [vmem:[#allocation9 + $0x8] sm:$0xff] }
 0xff7   :  { %7437 = vst [vmem:[#allocation23_spill] sm:$0xff] %v6959_v18 }
 0xff8   :  { %2667 = vst.msk [vmem:[#allocation13 + $0x3] sm:$0x1] %vm306_vm2, %v2666_v56  ;;  %5458 = vmatmul.mubr.msk.f32.vlgmr.msra.gmra.mxu0 %vm319_vm4, %v2666_v56 }
 0xff9   :  { %5461 = vmatpush3.msra.mxu0 %v6846_v21  ;;  %5468 = vmatprep.mubr.msk.f32.mxu0 %vm6003_vm0, %v7411_v17 }
 0xffa   :  { %5462 = vmatprep.subr.mxu0 %v7411_v17 }
 0xffb   :  { %5463 = vmatpush3.msra.mxu0 %v6855_v3 }
 0xffc   :  { %5464 = vmatprep.subr.mxu0 %v7411_v17 }
 0xffd   :  { %5465 = vmatpush3.msra.mxu0 %v6862_v20 }
 0xffe   :  { %5466 = vmatprep.subr.mxu0 %v7411_v17 }
 0xfff   :  { %5467 = vmatpush3.msra.mxu0 %v6869_v2 }
0x1000   :  { %2913 = vmatprep.subr.mxu0 %v6875_v6 }
0x10b8   :  { %v2737_v25 = vpop.f32.mrf.mxu0 }
0x10b9   :  { %5469 = vmatmul.mubr.msk.f32.vlgmr.msra.gmra.mxu0 %vm158_vm1, %v2737_v25 }
0x10ba   :  { %v5459_v26 = vpop.f32.mrf.mxu0  ;;  %2914 = vmatpush1.msra.mxu0 %v6882_v27  ;;  %2953 = vmatprep.mubr.f32.mxu0 %v7411_v17 }
0x10bb   :  { %2915 = vmatprep.subr.mxu0 %v6889_v28 }
0x10bc   :  { %2916 = vmatpush1.msra.mxu0 %v6895_v29 }
0x10bd   :  { %2917 = vmatprep.subr.mxu0 %v6901_v14 }
0x10be   :  { %2918 = vmatpush1.msra.mxu0 %v6907_v16 }
0x10bf   :  { %2919 = vmatprep.subr.mxu0 %v6913_v32 }
0x10c0   :  { %2920 = vmatpush1.msra.mxu0 %v6919_v5 }
0x10c1   :  { %3054 = vmatprep.subr.mxu0 %v6922_v42 }
0x1179   :  { %v2810_v41 = vpop.f32.mrf.mxu0 }
0x117a   :  { %v2881_v31 = vadd.f32 %v2880_v8, %v2810_v41 }
0x117b   :  { %v5470_v34 = vpop.f32.mrf.mxu0 }
0x117c   :  { %v2884_v46 = vadd.f32 %v6928_v44, %v2881_v31 }
0x117e   :  { %v2885_v61 = vmax.f32 %v2884_v46, 0.0 }
0x1180   :  { %4916 = vmatmul.mubr.msk.f32.vlgmr.msra.gmra.mxu0 %vm158_vm1, %v2885_v61  ;;  %5491 = vmatmul.mubr.msk.f32.vlgmr.msra.gmra.mxu1 %vm158_vm1, %v2885_v61 }
0x1181   :  { %3055 = vmatpush1.msra.mxu0 %v6933_v63  ;;  %5494 = vmatpush3.msra.mxu1 %v6936_v10 }
0x1182   :  { %3056 = vmatprep.subr.mxu0 %v6939_v11  ;;  %5495 = vmatprep.subr.mxu1 %v7411_v17 }
0x1183   :  { %3057 = vmatpush1.msra.mxu0 %v6943_v50  ;;  %5496 = vmatpush3.msra.mxu1 %v6946_v12 }
0x1184   :  { %3058 = vmatprep.subr.mxu0 %v6949_v52  ;;  %5497 = vmatprep.subr.mxu1 %v7411_v17 }
0x1185   :  { %3059 = vmatpush1.msra.mxu0 %v6953_v15  ;;  %5498 = vmatpush3.msra.mxu1 %v6956_v22 }
0x1186   :  { %3060 = vmatprep.subr.mxu0 %v6959_v18  ;;  %5499 = vmatprep.subr.mxu1 %v7411_v17 }
0x1187   :  { %3061 = vmatpush1.msra.mxu0 %v6963_v58  ;;  %3094 = vmatprep.mubr.f32.mxu0 %v7411_v17 }
0x1188   :  { %5500 = vmatpush3.msra.mxu1 %v6967_v7  ;;  %5501 = vmatprep.mubr.msk.f32.mxu1 %vm6003_vm0, %v7411_v17 }
0x1189   :  { %4918 = vmatmul.mubr.msk.f32.vlgmr.msra.gmra.mxu0 %vm158_vm1, %v6740_v23  ;;  %5502 = vmatmul.mubr.msk.f32.vlgmr.msra.gmra.mxu1 %vm158_vm1, %v6740_v23 }
0x118a   :  { %5504 = vmatprep.subr.mxu0 %v7411_v17  ;;  %5515 = vmatprep.subr.mxu1 %v7411_v17 }
0x118b   :  { %5505 = vmatpush3.msra.mxu0 %v7428_v48  ;;  %5516 = vmatpush3.msra.mxu1 %v6697_v49  ;;  %v6993_v48 = vld [vmem:[%s7351_s14] sm:$0xff] }
0x118c   :  { %5506 = vmatprep.subr.mxu0 %v7411_v17  ;;  %5517 = vmatprep.subr.mxu1 %v7411_v17  ;;  %7440 = vst [vmem:[#allocation26_spill] sm:$0xff] %v6993_v48 }
0x118d   :  { %5507 = vmatpush3.msra.mxu0 %v7429_v51  ;;  %5518 = vmatpush3.msra.mxu1 %v6706_v53 }
0x118e   :  { %5508 = vmatprep.subr.mxu0 %v7411_v17  ;;  %5519 = vmatprep.subr.mxu1 %v7411_v17 }
0x118f   :  { %5509 = vmatpush3.msra.mxu0 %v7431_v54  ;;  %5520 = vmatpush3.msra.mxu1 %v6715_v60 }
0x1190   :  { %5510 = vmatprep.subr.mxu0 %v7411_v17  ;;  %5521 = vmatprep.subr.mxu1 %v7411_v17 }
0x1191   :  { %5511 = vmatpush3.msra.mxu0 %v6993_v48  ;;  %5512 = vmatprep.mubr.msk.f32.mxu0 %vm6003_vm0, %v7411_v17 }
0x1192   :  { %5522 = vmatpush3.msra.mxu1 %v6726_v62  ;;  %5523 = vmatprep.mubr.msk.f32.mxu1 %vm6003_vm0, %v7411_v17 }
0x1193   :  { %5526 = vmatprep.subr.mxu0 %v7411_v17  ;;  %5537 = vmatprep.subr.mxu1 %v7411_v17 }
0x1240   :  { %v3026_v51 = vpop.f32.mrf.mxu1  ;;  %v2955_v19 = vpop.f32.mrf.mxu0 }
0x1241   :  { %v2956_v25 = vadd.f32 %v2955_v19, %v7422_v38 }
0x1242   :  { %v5492_v54 = vpop.f32.mrf.mxu1  ;;  %v2957_v56 = vpop.f32.mrf.mxu0 }
0x1243   :  { %v2958_v4 = vadd.f32 %v2957_v56, %v6455_v39 }
0x1249   :  { %v3096_v8 = vpop.f32.mrf.mxu0  ;;  %v3167_v24 = vpop.f32.mrf.mxu1 }
0x124a   :  { %v3097_v26 = vadd.f32 %v3096_v8, %v7423_v59  ;;  %v3168_v19 = vadd.f32 %v3167_v24, %v6459_v55 }
0x124b   :  { %v3098_v41 = vpop.f32.mrf.mxu0  ;;  %v5503_v31 = vpop.f32.mrf.mxu1 }
0x124c   :  { %v3171_v34 = vadd.f32 %v3097_v26, %v2956_v25  ;;  %v3099_v61 = vadd.f32 %v3098_v41, %v6453_v0  ;;  %v3027_v31 = vadd.f32 %v3026_v51, %v6461_v57  ;;  %v7073_v51 = vld [vmem:[%s7347_s10 + $0x10] sm:$0xff] }
0x124e   :  { %v4920_v46 = vmul.f32 -1.442695, %v3171_v34  ;;  %v3178_v45 = vadd.f32 %v3099_v61, %v2958_v4 }
0x1250   :  { %5742 = vpow2.f32 %v4920_v46  ;;  %v4921_v62 = vmul.f32 -1.442695, %v3178_v45 }
0x1252   :  { %5744 = vpow2.f32 %v4921_v62 }
0x125d   :  { %v5743_v54 = vpop.eup %5742 }
0x125e   :  { %v3175_v48 = vadd.f32 1.0, %v5743_v54 }
0x125f   :  { %v5745_v60 = vpop.eup %5744 }
0x1260   :  { %5746 = vrcp.f32 %v3175_v48  ;;  %v3182_v53 = vadd.f32 1.0, %v5745_v60  ;;  %v7050_v60 = vld [vmem:[%s7347_s10 + $0x58] sm:$0xff]  ;;  %v7066_v48 = vld [vmem:[%s7347_s10 + $0x28] sm:$0xff] }
0x1262   :  { %5748 = vrcp.f32 %v3182_v53  ;;  %v3281_v53 = vld [vmem:[%s3280_s20] sm:$0x1] }
0x126d   :  { %v5747_v8 = vpop.eup %5746 }
0x126e   :  { %v3185_v25 = vmul.f32 %v5747_v8, %v3168_v19 }
0x126f   :  { %v5749_v41 = vpop.eup %5748 }
0x1270   :  { %v3186_v26 = vadd.f32 %v3185_v25, %v3027_v31  ;;  %v3188_v56 = vsub.f32 1.0, %v5749_v41  ;;  %v3190_v62 = vmul.f32 %v5749_v41, %v6740_v23  ;;  %v7059_v23 = vld [vmem:[%s7347_s10 + $0x40] sm:$0xff] }
0x1272   :  { %5750 = vtanh.f32 %v3186_v26 }
0x127f   :  { %v5751_v4 = vpop.eup %5750 }
0x1280   :  { %v3189_v45 = vmul.f32 %v5751_v4, %v3188_v56 }
0x1282   :  { %v7010_v34 = vadd.f32 %v3190_v62, %v3189_v45 }
0x1284   :  { %5513 = vmatmul.mubr.msk.f32.vlgmr.msra.gmra.mxu0 %vm158_vm1, %v7010_v34  ;;  %5524 = vmatmul.mubr.msk.f32.vlgmr.msra.gmra.mxu1 %vm158_vm1, %v7010_v34  ;;  %3192 = vst.msk [vmem:[#allocation11 + $0x3] sm:$0x1] %vm880_vm5, %v7010_v34 }
0x1285   :  { %5527 = vmatpush3.msra.mxu0 %v6751_v13  ;;  %5534 = vmatprep.mubr.msk.f32.mxu0 %vm6003_vm0, %v7411_v17 }
0x1286   :  { %5528 = vmatprep.subr.mxu0 %v7411_v17  ;;  %5538 = vmatpush3.msk.msra.mxu1 %vm323_vm3, %v6757_v1 }
0x1287   :  { %5529 = vmatpush3.msra.mxu0 %v6764_v9  ;;  %5539 = vmatprep.subr.mxu1 %v7411_v17 }
0x1288   :  { %5530 = vmatprep.subr.mxu0 %v7411_v17  ;;  %5540 = vmatpush3.msra.mxu1 %v6769_v33 }
0x1289   :  { %5531 = vmatpush3.msra.mxu0 %v6775_v30  ;;  %5541 = vmatprep.mubr.msk.f32.mxu1 %vm6003_vm0, %v7411_v17 }
0x128a   :  { %5532 = vmatprep.subr.mxu0 %v7411_v17  ;;  %5544 = vmatprep.subr.mxu1 %v7411_v17 }
0x128b   :  { %5533 = vmatpush3.msra.mxu0 %v6785_v35 }
0x128c   :  { %5535 = vmatmul.mubr.msk.f32.vlgmr.msra.gmra.mxu0 %vm158_vm1, %v3281_v53  ;;  %5555 = vmatprep.subr.mxu0 %v7411_v17 }
0x128d   :  { %5556 = vmatpush3.msra.mxu0 %v6793_v36  ;;  %5563 = vmatprep.mubr.msk.f32.mxu0 %vm6003_vm0, %v7411_v17 }
0x128e   :  { %5557 = vmatprep.subr.mxu0 %v7411_v17 }
0x128f   :  { %5558 = vmatpush3.msra.mxu0 %v6802_v37 }
0x1290   :  { %5559 = vmatprep.subr.mxu0 %v7411_v17 }
0x1291   :  { %5560 = vmatpush3.msra.mxu0 %v6809_v40 }
0x1292   :  { %5561 = vmatprep.subr.mxu0 %v7411_v17 }
0x1293   :  { %5562 = vmatpush3.msra.mxu0 %v6816_v43 }
0x1294   :  { %5564 = vmatmul.mubr.msk.f32.vlgmr.msra.gmra.mxu0 %vm158_vm1, %v3281_v53  ;;  %5566 = vmatprep.subr.mxu0 %v7411_v17 }
0x1295   :  { %5567 = vmatpush3.msra.mxu0 %v7050_v60  ;;  %5574 = vmatprep.mubr.msk.f32.mxu0 %vm6003_vm0, %v7411_v17 }
0x1296   :  { %5568 = vmatprep.subr.mxu0 %v7411_v17 }
0x1297   :  { %5569 = vmatpush3.msra.mxu0 %v7059_v23 }
0x1298   :  { %5570 = vmatprep.subr.mxu0 %v7411_v17 }
0x1299   :  { %5571 = vmatpush3.msra.mxu0 %v7066_v48 }
0x129a   :  { %5572 = vmatprep.subr.mxu0 %v7411_v17 }
0x129b   :  { %5573 = vmatpush3.msra.mxu0 %v7073_v51 }
0x129c   :  { %5577 = vmatprep.subr.mxu0 %v7411_v17 }
0x1344   :  { %v7077_v24 = vpop.f32.mrf.mxu0  ;;  %v3348_v46 = vpop.f32.mrf.mxu1 }
0x1346   :  { %v5514_v61 = vpop.f32.mrf.mxu0  ;;  %v5525_v54 = vpop.f32.mrf.mxu1 }
0x134c   :  { %v3421_v19 = vpop.f32.mrf.mxu0 }
0x134d   :  { %v3422_v8 = vadd.f32 %v3421_v19, %v3348_v46 }
0x134e   :  { %v5536_v31 = vpop.f32.mrf.mxu0 }
0x134f   :  { %v3425_v25 = vadd.f32 %v6836_v47, %v3422_v8 }
0x1351   :  { %v3426_v26 = vsel %vm306_vm2, %v3425_v25, -inf }
0x1352   :  { %3427 = vmax.xlane.f32.xlu0 %v3426_v26 }
0x1354   :  { %v3650_v46 = vpop.f32.mrf.mxu0 }
0x1356   :  { %v5565_v19 = vpop.f32.mrf.mxu0 }
0x13db   :  { %v3428_v41 = vpop.xlane.xlu0 %3427 }
0x13dc   :  { %v3429_v56 = vsub.f32 %v3425_v25, %v3428_v41 }
0x13de   :  { %v3430_v4 = vmul.f32 1.442695, %v3429_v56 }
0x13e0   :  { %5752 = vpow2.f32 %v3430_v4 }
0x13ed   :  { %v5753_v45 = vpop.eup %5752 }
0x13ee   :  { %v3432_v62 = vsel %vm306_vm2, %v5753_v45, 0.0 }
0x13ef   :  { %3433 = vadd.xlane.f32.xlu1 %v3432_v62  ;;  %v7142_v62 = vld [vmem:[%s7351_s14 + $0x10] sm:$0xff] }
0x13f0   :  { %7442 = vst [vmem:[#allocation28_spill] sm:$0xff] %v7142_v62 }
0x1478   :  { %v3434_v53 = vpop.xlane.xlu1 %3433 }
0x1479   :  { %5754 = vrcp.f32 %v3434_v53  ;;  %v7443_v53 = vld [vmem:[#allocation20_spill] sm:$0xff] }
0x1486   :  { %v5755_v61 = vpop.eup %5754 }
0x1487   :  { %v3436_v54 = vmul.f32 %v5755_v61, %v5753_v45  ;;  %v7133_v45 = vld [vmem:[%s7351_s14 + $0x18] sm:$0xff]  ;;  %v7445_v61 = vld [vmem:[#allocation21_spill] sm:$0xff] }
0x1488   :  { %7441 = vst [vmem:[#allocation27_spill] sm:$0xff] %v7133_v45 }
0x1489   :  { %3437 = vst.msk [vmem:[#allocation13 + $0x4] sm:$0x1] %vm306_vm2, %v3436_v54  ;;  %5542 = vmatmul.mubr.msk.f32.vlgmr.msra.gmra.mxu1 %vm319_vm4, %v3436_v54  ;;  %v7446_v54 = vld [vmem:[#allocation26_spill] sm:$0xff] }
0x148a   :  { %5545 = vmatpush3.msra.mxu1 %v6846_v21  ;;  %5552 = vmatprep.mubr.msk.f32.mxu1 %vm6003_vm0, %v7411_v17 }
0x148b   :  { %5546 = vmatprep.subr.mxu1 %v7411_v17 }
0x148c   :  { %5547 = vmatpush3.msra.mxu1 %v6855_v3 }
0x148d   :  { %5548 = vmatprep.subr.mxu1 %v7411_v17 }
0x148e   :  { %5549 = vmatpush3.msra.mxu1 %v6862_v20 }
0x148f   :  { %5550 = vmatprep.subr.mxu1 %v7411_v17 }
0x1490   :  { %5551 = vmatpush3.msra.mxu1 %v6869_v2 }
0x1491   :  { %3683 = vmatprep.subr.mxu1 %v6875_v6 }
0x1549   :  { %v3507_v8 = vpop.f32.mrf.mxu1 }
0x154a   :  { %5553 = vmatmul.mubr.msk.f32.vlgmr.msra.gmra.mxu1 %vm158_vm1, %v3507_v8 }
0x154b   :  { %v5543_v31 = vpop.f32.mrf.mxu1  ;;  %3684 = vmatpush1.msra.mxu1 %v6882_v27  ;;  %3723 = vmatprep.mubr.f32.mxu1 %v7411_v17 }
0x154c   :  { %3685 = vmatprep.subr.mxu1 %v6889_v28 }
0x154d   :  { %3686 = vmatpush1.msra.mxu1 %v6895_v29 }
0x154e   :  { %3687 = vmatprep.subr.mxu1 %v6901_v14 }
0x154f   :  { %3688 = vmatpush1.msra.mxu1 %v6907_v16 }
0x1550   :  { %3689 = vmatprep.subr.mxu1 %v6913_v32 }
0x1551   :  { %3690 = vmatpush1.msra.mxu1 %v6919_v5 }
0x1552   :  { %3824 = vmatprep.subr.mxu1 %v6922_v42 }
0x160a   :  { %v3580_v25 = vpop.f32.mrf.mxu1 }
0x160b   :  { %v3651_v26 = vadd.f32 %v3650_v46, %v3580_v25  ;;  %v7447_v46 = vld [vmem:[#allocation22_spill] sm:$0xff] }
0x160c   :  { %v5554_v41 = vpop.f32.mrf.mxu1 }
0x160d   :  { %v3654_v56 = vadd.f32 %v6928_v44, %v3651_v26 }
0x160f   :  { %v3655_v4 = vmax.f32 %v3654_v56, 0.0 }
0x1611   :  { %4930 = vmatmul.mubr.msk.f32.vlgmr.msra.gmra.mxu1 %vm158_vm1, %v3655_v4  ;;  %5575 = vmatmul.mubr.msk.f32.vlgmr.msra.gmra.mxu0 %vm158_vm1, %v3655_v4 }
0x1612   :  { %3825 = vmatpush1.msra.mxu1 %v6933_v63  ;;  %5578 = vmatpush3.msra.mxu0 %v6936_v10 }
0x1613   :  { %3826 = vmatprep.subr.mxu1 %v6939_v11  ;;  %5579 = vmatprep.subr.mxu0 %v7411_v17 }
0x1614   :  { %3827 = vmatpush1.msra.mxu1 %v6943_v50  ;;  %5580 = vmatpush3.msra.mxu0 %v6946_v12 }
0x1615   :  { %3828 = vmatprep.subr.mxu1 %v6949_v52  ;;  %5581 = vmatprep.subr.mxu0 %v7411_v17 }
0x1616   :  { %3829 = vmatpush1.msra.mxu1 %v6953_v15  ;;  %5582 = vmatpush3.msra.mxu0 %v6956_v22 }
0x1617   :  { %3830 = vmatprep.subr.mxu1 %v6959_v18  ;;  %5583 = vmatprep.subr.mxu0 %v7411_v17 }
0x1618   :  { %3831 = vmatpush1.msra.mxu1 %v6963_v58  ;;  %3864 = vmatprep.mubr.f32.mxu1 %v7411_v17 }
0x1619   :  { %5584 = vmatpush3.msra.mxu0 %v6967_v7  ;;  %5585 = vmatprep.mubr.msk.f32.mxu0 %vm6003_vm0, %v7411_v17 }
0x161a   :  { %4932 = vmatmul.mubr.msk.f32.vlgmr.msra.gmra.mxu1 %vm158_vm1, %v7010_v34  ;;  %5586 = vmatmul.mubr.msk.f32.vlgmr.msra.gmra.mxu0 %vm158_vm1, %v7010_v34 }
0x161b   :  { %5588 = vmatprep.subr.mxu1 %v7411_v17  ;;  %5599 = vmatprep.subr.mxu0 %v7411_v17 }
0x161c   :  { %5589 = vmatpush3.msra.mxu1 %v7133_v45  ;;  %5600 = vmatpush3.msra.mxu0 %v6697_v49  ;;  %v7151_v49 = vld [vmem:[%s7351_s14 + $0x8] sm:$0xff]  ;;  %s4937_s14 = sld [smem:[#allocation3 + $0x5]] }
0x161d   :  { %5590 = vmatprep.subr.mxu1 %v7411_v17  ;;  %5601 = vmatprep.subr.mxu0 %v7411_v17  ;;  %7444 = vst [vmem:[#allocation29_spill] sm:$0xff] %v7151_v49 }
0x161e   :  { %5591 = vmatpush3.msra.mxu1 %v7142_v62  ;;  %5602 = vmatpush3.msra.mxu0 %v7443_v53 }
0x161f   :  { %5592 = vmatprep.subr.mxu1 %v7411_v17  ;;  %5603 = vmatprep.subr.mxu0 %v7411_v17 }
0x1620   :  { %5593 = vmatpush3.msra.mxu1 %v7151_v49  ;;  %5604 = vmatpush3.msra.mxu0 %v7445_v61 }
0x1621   :  { %5594 = vmatprep.subr.mxu1 %v7411_v17  ;;  %5605 = vmatprep.subr.mxu0 %v7411_v17 }
0x1622   :  { %5595 = vmatpush3.msra.mxu1 %v7446_v54  ;;  %5596 = vmatprep.mubr.msk.f32.mxu1 %vm6003_vm0, %v7411_v17  ;;  %s4050_s28 = scalar_lea.vmem [#allocation4], %s4937_s14 }
0x1623   :  { %5606 = vmatpush3.msra.mxu0 %v7447_v46  ;;  %5607 = vmatprep.mubr.msk.f32.mxu0 %vm6003_vm0, %v7411_v17 }
0x1624   :  { %5610 = vmatprep.subr.mxu1 %v7411_v17  ;;  %5621 = vmatprep.subr.mxu0 %v7411_v17 }
0x16d1   :  { %v3796_v19 = vpop.f32.mrf.mxu0  ;;  %v3725_v31 = vpop.f32.mrf.mxu1 }
0x16d2   :  { %v3726_v56 = vadd.f32 %v3725_v31, %v7422_v38 }
0x16d3   :  { %v5576_v8 = vpop.f32.mrf.mxu0  ;;  %v3727_v25 = vpop.f32.mrf.mxu1 }
0x16d4   :  { %v3728_v62 = vadd.f32 %v3727_v25, %v6455_v39 }
0x16da   :  { %v3866_v26 = vpop.f32.mrf.mxu1  ;;  %v3937_v41 = vpop.f32.mrf.mxu0 }
0x16db   :  { %v3867_v4 = vadd.f32 %v3866_v26, %v7423_v59  ;;  %v3938_v31 = vadd.f32 %v3937_v41, %v6459_v55 }
0x16dc   :  { %v3868_v53 = vpop.f32.mrf.mxu1  ;;  %v5587_v61 = vpop.f32.mrf.mxu0 }
0x16dd   :  { %v3941_v46 = vadd.f32 %v3867_v4, %v3726_v56  ;;  %v3869_v49 = vadd.f32 %v3868_v53, %v6453_v0  ;;  %v3797_v61 = vadd.f32 %v3796_v19, %v6461_v57 }
0x16df   :  { %v4934_v54 = vmul.f32 -1.442695, %v3941_v46  ;;  %v3948_v45 = vadd.f32 %v3869_v49, %v3728_v62 }
0x16e1   :  { %5756 = vpow2.f32 %v4934_v54  ;;  %v4935_v7 = vmul.f32 -1.442695, %v3948_v45 }
0x16e3   :  { %5758 = vpow2.f32 %v4935_v7 }
0x16ee   :  { %v5757_v8 = vpop.eup %5756 }
0x16ef   :  { %v3945_v58 = vadd.f32 1.0, %v5757_v8 }
0x16f0   :  { %v5759_v18 = vpop.eup %5758 }
0x16f1   :  { %5760 = vrcp.f32 %v3945_v58  ;;  %v3952_v22 = vadd.f32 1.0, %v5759_v18 }
0x16f3   :  { %5762 = vrcp.f32 %v3952_v22  ;;  %v7448_v22 = vld [vmem:[#allocation32_spill] sm:$0xff] }
0x16fe   :  { %v5761_v26 = vpop.eup %5760 }
0x16ff   :  { %v3955_v56 = vmul.f32 %v5761_v26, %v3938_v31 }
0x1700   :  { %v5763_v53 = vpop.eup %5762 }
0x1701   :  { %v3956_v4 = vadd.f32 %v3955_v56, %v3797_v61  ;;  %v3958_v25 = vsub.f32 1.0, %v5763_v53  ;;  %v3960_v7 = vmul.f32 %v5763_v53, %v7010_v34  ;;  %v7449_v34 = vld [vmem:[#allocation30_spill] sm:$0xff] }
0x1703   :  { %5764 = vtanh.f32 %v3956_v4 }
0x1710   :  { %v5765_v62 = vpop.eup %5764 }
0x1711   :  { %v3959_v45 = vmul.f32 %v5765_v62, %v3958_v25 }
0x1713   :  { %v7172_v49 = vadd.f32 %v3960_v7, %v3959_v45  ;;  %v7450_v45 = vld [vmem:[#allocation19_spill] sm:$0xff] }
0x1715   :  { %5597 = vmatmul.mubr.msk.f32.vlgmr.msra.gmra.mxu1 %vm158_vm1, %v7172_v49  ;;  %5608 = vmatmul.mubr.msk.f32.vlgmr.msra.gmra.mxu0 %vm158_vm1, %v7172_v49  ;;  %3962 = vst.msk [vmem:[#allocation11 + $0x4] sm:$0x1] %vm880_vm5, %v7172_v49 }
0x1716   :  { %5611 = vmatpush3.msra.mxu1 %v6751_v13  ;;  %5618 = vmatprep.mubr.msk.f32.mxu1 %vm6003_vm0, %v7411_v17  ;;  %v4051_v13 = vld [vmem:[%s4050_s28] sm:$0x1] }
0x1717   :  { %5612 = vmatprep.subr.mxu1 %v7411_v17  ;;  %5622 = vmatpush3.msk.msra.mxu0 %vm323_vm3, %v6757_v1 }
0x1718   :  { %5613 = vmatpush3.msra.mxu1 %v6764_v9  ;;  %5623 = vmatprep.subr.mxu0 %v7411_v17 }
0x1719   :  { %5614 = vmatprep.subr.mxu1 %v7411_v17  ;;  %5624 = vmatpush3.msra.mxu0 %v6769_v33 }
0x171a   :  { %5615 = vmatpush3.msra.mxu1 %v6775_v30  ;;  %5625 = vmatprep.mubr.msk.f32.mxu0 %vm6003_vm0, %v7411_v17 }
0x171b   :  { %5616 = vmatprep.subr.mxu1 %v7411_v17  ;;  %5628 = vmatprep.subr.mxu0 %v7411_v17 }
0x171c   :  { %5617 = vmatpush3.msra.mxu1 %v6785_v35 }
0x171d   :  { %5619 = vmatmul.mubr.msk.f32.vlgmr.msra.gmra.mxu1 %vm158_vm1, %v4051_v13  ;;  %5639 = vmatprep.subr.mxu1 %v7411_v17 }
0x171e   :  { %5640 = vmatpush3.msra.mxu1 %v6793_v36  ;;  %5647 = vmatprep.mubr.msk.f32.mxu1 %vm6003_vm0, %v7411_v17 }
0x171f   :  { %5641 = vmatprep.subr.mxu1 %v7411_v17 }
0x1720   :  { %5642 = vmatpush3.msra.mxu1 %v6802_v37  ;;  %v7222_v37 = vld [vmem:[%s7352_s15] sm:$0x1]  ;;  %s6004_s15 = smov [#allocation11]  }
0x1721   :  { %5643 = vmatprep.subr.mxu1 %v7411_v17  ;;  %v952_v18 = vadd.f32 %v7448_v22, %v7222_v37  ;;  %v7236_v7 = vadd.f32 %v7450_v45, %v7222_v37  ;;  %s4835_s0 = sshll.u32 %s6004_s15, 4  ;;  %s4836_s0 = int_to_ptr.vmem [resolvable:$true] %s4835_s0 }
0x1722   :  { %5644 = vmatpush3.msra.mxu1 %v6809_v40  ;;  %s5924_s7 = scalar_lea.vmem %s4836_s0, 128  ;;  %p5929_p7 = scmp.lt.s32.totalorder %s4836_s0, %s4836_s0 }
0x1723   :  { %5645 = vmatprep.subr.mxu1 %v7411_v17  ;;  %p5925_p6 = scmp.ne.s32.totalorder %s4836_s0, %s5924_s7  ;;  %p5930_p8 = scmp.lt.s32.totalorder %s5924_s7, %s5924_s7 }
0x1724   :  { %5646 = vmatpush3.msra.mxu1 %v6816_v43 }
0x1725   :  { %5648 = vmatmul.mubr.msk.f32.vlgmr.msra.gmra.mxu1 %vm158_vm1, %v4051_v13  ;;  %5650 = vmatprep.subr.mxu1 %v7411_v17  ;;  %p5931_p9 = por %p5930_p8, %p5929_p7 }
0x1726   :  { %5651 = vmatpush3.msra.mxu1 %v7050_v60  ;;  %5658 = vmatprep.mubr.msk.f32.mxu1 %vm6003_vm0, %v7411_v17  ;;  %v2493_v60 = vadd.f32 %v7449_v34, %v7222_v37 }
0x1727   :  { %5652 = vmatprep.subr.mxu1 %v7411_v17  ;;  %p5932_p10 = pnand %p5931_p9, %p5925_p6 }
0x1728   :  { %5653 = vmatpush3.msra.mxu1 %v7059_v23  ;;  %v956_v23 = vsel %vm955_vm6, %v952_v18, -inf }
0x1729   :  { %5654 = vmatprep.subr.mxu1 %v7411_v17 }
0x172a   :  { %5655 = vmatpush3.msra.mxu1 %v7066_v48 }
0x172b   :  { %5656 = vmatprep.subr.mxu1 %v7411_v17 }
0x172c   :  { %5657 = vmatpush3.msra.mxu1 %v7073_v51  ;;  %v2496_v51 = vsel %vm955_vm6, %v2493_v60, -inf }
0x172d   :  { %5661 = vmatprep.subr.mxu1 %v7411_v17 }
0x17d5   :  { %v4032_v1 = vpop.f32.mrf.mxu1  ;;  %v4118_v9 = vpop.f32.mrf.mxu0 }
0x17d6   :  { %v4033_v48 = vadd.f32 %v4032_v1, %v7222_v37 }
0x17d7   :  { %v5598_v33 = vpop.f32.mrf.mxu1  ;;  %v5609_v30 = vpop.f32.mrf.mxu0 }
0x17d8   :  { %v1726_v33 = vsel %vm955_vm6, %v7236_v7, -inf }
0x17dd   :  { %v4191_v35 = vpop.f32.mrf.mxu1 }
0x17de   :  { %v4192_v36 = vadd.f32 %v4191_v35, %v4118_v9  ;;  %v7241_v9 = vadd.f32 %v7077_v24, %v7222_v37 }
0x17df   :  { %v5620_v40 = vpop.f32.mrf.mxu1 }
0x17e0   :  { %v4195_v43 = vadd.f32 %v6836_v47, %v4192_v36  ;;  %v4036_v47 = vsel %vm955_vm6, %v4033_v48, -inf  ;;  %v3266_v36 = vsel %vm955_vm6, %v7241_v9, -inf }
0x17e2   :  { %v4196_v58 = vsel %vm306_vm2, %v4195_v43, -inf }
0x17e3   :  { %4197 = vmax.xlane.f32.xlu0 %v4196_v58 }
0x17e7   :  { %957 = vmax.xlane.f32.xlu0 %v956_v23 }
0x17eb   :  { %2497 = vmax.xlane.f32.xlu0 %v2496_v51 }
0x17ef   :  { %4037 = vmax.xlane.f32.xlu0 %v4036_v47 }
0x186c   :  { %v4198_v54 = vpop.xlane.xlu0 %4197 }
0x186d   :  { %v4199_v19 = vsub.f32 %v4195_v43, %v4198_v54 }
0x186f   :  { %v4200_v41 = vmul.f32 1.442695, %v4199_v19 }
0x1870   :  { %v958_v46 = vpop.xlane.xlu0 %957 }
0x1871   :  { %5766 = vpow2.f32 %v4200_v41  ;;  %v959_v8 = vsub.f32 %v952_v18, %v958_v46 }
0x1873   :  { %v960_v31 = vmul.f32 1.442695, %v959_v8 }
0x1874   :  { %v2498_v26 = vpop.xlane.xlu0 %2497 }
0x1875   :  { %5768 = vpow2.f32 %v960_v31  ;;  %v2499_v61 = vsub.f32 %v2493_v60, %v2498_v26 }
0x1877   :  { %v2500_v56 = vmul.f32 1.442695, %v2499_v61 }
0x1878   :  { %v4038_v4 = vpop.xlane.xlu0 %4037 }
0x1879   :  { %5770 = vpow2.f32 %v2500_v56  ;;  %v4039_v53 = vsub.f32 %v4033_v48, %v4038_v4 }
0x187b   :  { %v4040_v25 = vmul.f32 1.442695, %v4039_v53 }
0x187d   :  { %5772 = vpow2.f32 %v4040_v25 }
0x187e   :  { %v5767_v62 = vpop.eup %5766 }
0x187f   :  { %v4202_v13 = vsel %vm306_vm2, %v5767_v62, 0.0 }
0x1880   :  { %4203 = vadd.xlane.f32.xlu1 %v4202_v13 }
0x1882   :  { %v5769_v1 = vpop.eup %5768 }
0x1883   :  { %v962_v30 = vsel %vm955_vm6, %v5769_v1, 0.0 }
0x1884   :  { %1727 = vmax.xlane.f32.xlu1 %v1726_v33  ;;  %963 = vadd.xlane.f32.xlu0 %v962_v30 }
0x1886   :  { %v5771_v35 = vpop.eup %5770 }
0x1887   :  { %v2502_v40 = vsel %vm955_vm6, %v5771_v35, 0.0 }
0x1888   :  { %3267 = vmax.xlane.f32.xlu1 %v3266_v36  ;;  %2503 = vadd.xlane.f32.xlu0 %v2502_v40 }
0x188a   :  { %v5773_v43 = vpop.eup %5772 }
0x188b   :  { %v4042_v22 = vsel %vm955_vm6, %v5773_v43, 0.0 }
0x188c   :  { %4043 = vadd.xlane.f32.xlu0 %v4042_v22 }
0x1909   :  { %v4204_v24 = vpop.xlane.xlu1 %4203 }
0x190a   :  { %5774 = vrcp.f32 %v4204_v24 }
0x190d   :  { %v964_v18 = vpop.xlane.xlu0 %963 }
0x190e   :  { %5776 = vlog2.f32 %v964_v18 }
0x1911   :  { %v2504_v58 = vpop.xlane.xlu0 %2503 }
0x1912   :  { %5778 = vlog2.f32 %v2504_v58 }
0x1915   :  { %v4044_v34 = vpop.xlane.xlu0 %4043 }
0x1916   :  { %5780 = vlog2.f32 %v4044_v34 }
0x1917   :  { %v5775_v60 = vpop.eup %5774 }
0x1918   :  { %v4206_v23 = vmul.f32 %v5775_v60, %v5767_v62 }
0x191a   :  { %4207 = vst.msk [vmem:[#allocation13 + $0x5] sm:$0x1] %vm306_vm2, %v4206_v23  ;;  %5626 = vmatmul.mubr.msk.f32.vlgmr.msra.gmra.mxu0 %vm319_vm4, %v4206_v23  ;;  %v1728_v23 = vpop.xlane.xlu1 %1727 }
0x191b   :  { %v5777_v48 = vpop.eup %5776  ;;  %5629 = vmatpush3.msra.mxu0 %v6846_v21  ;;  %5636 = vmatprep.mubr.msk.f32.mxu0 %vm6003_vm0, %v7411_v17 }
0x191c   :  { %v966_v51 = vmul.f32 0.6931472, %v5777_v48  ;;  %5630 = vmatprep.subr.mxu0 %v7411_v17 }
0x191d   :  { %5631 = vmatpush3.msra.mxu0 %v6855_v3 }
0x191e   :  { %v967_v47 = vsub.f32 %v959_v8, %v966_v51  ;;  %5632 = vmatprep.subr.mxu0 %v7411_v17  ;;  %v4420_v8 = vpop.f32.mrf.mxu1  ;;  %v3268_v48 = vpop.xlane.xlu1 %3267 }
0x191f   :  { %5633 = vmatpush3.msra.mxu0 %v6862_v20  ;;  %v5779_v54 = vpop.eup %5778  ;;  %v3269_v51 = vsub.f32 %v7241_v9, %v3268_v48 }
0x1920   :  { %968 = vst.msk [vmem:[#allocation10] sm:$0x1] %vm955_vm6, %v967_v47  ;;  %5634 = vmatprep.subr.mxu0 %v7411_v17  ;;  %v2506_v19 = vmul.f32 0.6931472, %v5779_v54  ;;  %v5649_v20 = vpop.f32.mrf.mxu1 }
0x1921   :  { %5635 = vmatpush3.msra.mxu0 %v6869_v2  ;;  %v3270_v47 = vmul.f32 1.442695, %v3269_v51 }
0x1922   :  { %4453 = vmatprep.subr.mxu0 %v6875_v6  ;;  %v2507_v21 = vsub.f32 %v2499_v61, %v2506_v19 }
0x1923   :  { %v5781_v41 = vpop.eup %5780 }
0x1924   :  { %2508 = vst.msk [vmem:[#allocation10 + $0x2] sm:$0x1] %vm955_vm6, %v2507_v21  ;;  %v4046_v3 = vmul.f32 0.6931472, %v5781_v41 }
0x1926   :  { %v4047_v46 = vsub.f32 %v4039_v53, %v4046_v3 }
0x1928   :  { %4048 = vst.msk [vmem:[#allocation10 + $0x4] sm:$0x1] %vm955_vm6, %v4047_v46 }
0x19da   :  { %v4277_v31 = vpop.f32.mrf.mxu0 }
0x19db   :  { %5637 = vmatmul.mubr.msk.f32.vlgmr.msra.gmra.mxu0 %vm158_vm1, %v4277_v31 }
0x19dc   :  { %v5627_v26 = vpop.f32.mrf.mxu0  ;;  %4454 = vmatpush1.msra.mxu0 %v6882_v27  ;;  %4493 = vmatprep.mubr.f32.mxu0 %v7411_v17 }
0x19dd   :  { %4455 = vmatprep.subr.mxu0 %v6889_v28  ;;  %v7451_v28 = vld [vmem:[#allocation31_spill] sm:$0xff] }
0x19de   :  { %4456 = vmatpush1.msra.mxu0 %v6895_v29  ;;  %v7452_v29 = vld [vmem:[#allocation23_spill] sm:$0xff] }
0x19df   :  { %4457 = vmatprep.subr.mxu0 %v6901_v14  ;;  %v7453_v14 = vld [vmem:[#allocation24_spill] sm:$0xff] }
0x19e0   :  { %4458 = vmatpush1.msra.mxu0 %v6907_v16  ;;  %v7454_v16 = vld [vmem:[#allocation25_spill] sm:$0xff] }
0x19e1   :  { %4459 = vmatprep.subr.mxu0 %v6913_v32  ;;  %v7455_v32 = vld [vmem:[#allocation27_spill] sm:$0xff] }
0x19e2   :  { %4460 = vmatpush1.msra.mxu0 %v6919_v5  ;;  %v7456_v5 = vld [vmem:[#allocation28_spill] sm:$0xff] }
0x19e3   :  { %4594 = vmatprep.subr.mxu0 %v6922_v42  ;;  %v7457_v42 = vld [vmem:[#allocation29_spill] sm:$0xff] }
0x1a9b   :  { %v4350_v2 = vpop.f32.mrf.mxu0 }
0x1a9c   :  { %v4421_v6 = vadd.f32 %v4420_v8, %v4350_v2 }
0x1a9d   :  { %v5638_v61 = vpop.f32.mrf.mxu0 }
0x1a9e   :  { %v4424_v27 = vadd.f32 %v6928_v44, %v4421_v6  ;;  %v7458_v44 = vld [vmem:[#allocation26_spill] sm:$0xff] }
0x1aa0   :  { %v4425_v56 = vmax.f32 %v4424_v27, 0.0 }
0x1aa2   :  { %4944 = vmatmul.mubr.msk.f32.vlgmr.msra.gmra.mxu0 %vm158_vm1, %v4425_v56  ;;  %5659 = vmatmul.mubr.msk.f32.vlgmr.msra.gmra.mxu1 %vm158_vm1, %v4425_v56 }
0x1aa3   :  { %4595 = vmatpush1.msra.mxu0 %v6933_v63  ;;  %5662 = vmatpush3.msra.mxu1 %v6936_v10 }
0x1aa4   :  { %4596 = vmatprep.subr.mxu0 %v6939_v11  ;;  %5663 = vmatprep.subr.mxu1 %v7411_v17 }
0x1aa5   :  { %4597 = vmatpush1.msra.mxu0 %v6943_v50  ;;  %5664 = vmatpush3.msra.mxu1 %v6946_v12 }
0x1aa6   :  { %4598 = vmatprep.subr.mxu0 %v6949_v52  ;;  %5665 = vmatprep.subr.mxu1 %v7411_v17 }
0x1aa7   :  { %4599 = vmatpush1.msra.mxu0 %v6953_v15  ;;  %5666 = vmatpush3.msra.mxu1 %v7451_v28 }
0x1aa8   :  { %4600 = vmatprep.subr.mxu0 %v7452_v29  ;;  %5667 = vmatprep.subr.mxu1 %v7411_v17 }
0x1aa9   :  { %4601 = vmatpush1.msra.mxu0 %v7453_v14  ;;  %4634 = vmatprep.mubr.f32.mxu0 %v7411_v17 }
0x1aaa   :  { %5668 = vmatpush3.msra.mxu1 %v7454_v16  ;;  %5669 = vmatprep.mubr.msk.f32.mxu1 %vm6003_vm0, %v7411_v17 }
0x1aab   :  { %4946 = vmatmul.mubr.msk.f32.vlgmr.msra.gmra.mxu0 %vm158_vm1, %v7172_v49  ;;  %5670 = vmatmul.mubr.msk.f32.vlgmr.msra.gmra.mxu1 %vm158_vm1, %v7172_v49 }
0x1aac   :  { %5672 = vmatprep.subr.mxu0 %v7411_v17  ;;  %5680 = vmatprep.mubr.msk.f32.mxu0 %vm6003_vm0, %v7411_v17 }
0x1aad   :  { %5673 = vmatpush3.msra.mxu0 %v7455_v32 }
0x1aae   :  { %5674 = vmatprep.subr.mxu0 %v7411_v17 }
0x1aaf   :  { %5675 = vmatpush3.msra.mxu0 %v7456_v5 }
0x1ab0   :  { %5676 = vmatprep.subr.mxu0 %v7411_v17 }
0x1ab1   :  { %5677 = vmatpush3.msra.mxu0 %v7457_v42 }
0x1ab2   :  { %5678 = vmatprep.subr.mxu0 %v7411_v17 }
0x1ab3   :  { %5679 = vmatpush3.msra.mxu0 %v7458_v44 }
0x1b62   :  { %v4566_v63 = vpop.f32.mrf.mxu1  ;;  %v4495_v11 = vpop.f32.mrf.mxu0 }
0x1b63   :  { %v4496_v15 = vadd.f32 %v4495_v11, %v7422_v38  ;;  %v4567_v43 = vadd.f32 %v4566_v63, %v6461_v57 }
0x1b64   :  { %v5660_v10 = vpop.f32.mrf.mxu1  ;;  %v4497_v50 = vpop.f32.mrf.mxu0 }
0x1b65   :  { %v4498_v17 = vadd.f32 %v4497_v50, %v6455_v39 }
0x1b6b   :  { %v4636_v12 = vpop.f32.mrf.mxu0  ;;  %v4707_v52 = vpop.f32.mrf.mxu1 }
0x1b6c   :  { %v4637_v4 = vadd.f32 %v4636_v12, %v7423_v59  ;;  %v4708_v38 = vadd.f32 %v4707_v52, %v6459_v55  ;;  %v1729_v55 = vsub.f32 %v7236_v7, %v1728_v23 }
0x1b6d   :  { %v4638_v53 = vpop.f32.mrf.mxu0  ;;  %v5671_v25 = vpop.f32.mrf.mxu1 }
0x1b6e   :  { %v4711_v62 = vadd.f32 %v4637_v4, %v4496_v15  ;;  %v4639_v13 = vadd.f32 %v4638_v53, %v6453_v0  ;;  %v1730_v57 = vmul.f32 1.442695, %v1729_v55 }
0x1b70   :  { %v4948_v45 = vmul.f32 -1.442695, %v4711_v62  ;;  %v4718_v1 = vadd.f32 %v4639_v13, %v4498_v17 }
0x1b72   :  { %5782 = vpow2.f32 %v4948_v45  ;;  %v4949_v33 = vmul.f32 -1.442695, %v4718_v1 }
0x1b74   :  { %5784 = vpow2.f32 %v4949_v33 }
0x1b7f   :  { %v5783_v30 = vpop.eup %5782 }
0x1b80   :  { %v4715_v35 = vadd.f32 1.0, %v5783_v30 }
0x1b81   :  { %v5785_v36 = vpop.eup %5784 }
0x1b82   :  { %5786 = vrcp.f32 %v4715_v35  ;;  %v4722_v40 = vadd.f32 1.0, %v5785_v36 }
0x1b84   :  { %5788 = vrcp.f32 %v4722_v40 }
0x1b8f   :  { %v5787_v59 = vpop.eup %5786 }
0x1b90   :  { %v4725_v22 = vmul.f32 %v5787_v59, %v4708_v38 }
0x1b91   :  { %v5789_v0 = vpop.eup %5788 }
0x1b92   :  { %v4726_v24 = vadd.f32 %v4725_v22, %v4567_v43  ;;  %v4728_v39 = vsub.f32 1.0, %v5789_v0  ;;  %v4730_v34 = vmul.f32 %v5789_v0, %v7172_v49 }
0x1b94   :  { %5790 = vtanh.f32 %v4726_v24 }
0x1b95   :  { %5792 = vpow2.f32 %v1730_v57 }
0x1b96   :  { %5794 = vpow2.f32 %v3270_v47 }
0x1ba1   :  { %v5791_v18 = vpop.eup %5790 }
0x1ba2   :  { %v4729_v58 = vmul.f32 %v5791_v18, %v4728_v39  ;;  %v5793_v41 = vpop.eup %5792 }
0x1ba3   :  { %v1732_v3 = vsel %vm955_vm6, %v5793_v41, 0.0  ;;  %v5795_v46 = vpop.eup %5794 }
0x1ba4   :  { %v4731_v60 = vadd.f32 %v4730_v34, %v4729_v58  ;;  %v3272_v7 = vsel %vm955_vm6, %v5795_v46, 0.0 }
0x1ba6   :  { %5681 = vmatmul.mubr.msk.f32.vlgmr.msra.gmra.mxu0 %vm158_vm1, %v4731_v60  ;;  %4732 = vst.msk [vmem:[#allocation11 + $0x5] sm:$0x1] %vm880_vm5, %v4731_v60 }
0x1c66   :  { %v4802_v54 = vpop.f32.mrf.mxu0 }
0x1c67   :  { %v4803_v19 = vadd.f32 %v4802_v54, %v7222_v37 }
0x1c68   :  { %v5682_v21 = vpop.f32.mrf.mxu0 }
0x1c69   :  { %v4806_v49 = vsel %vm955_vm6, %v4803_v19, -inf }
0x1c6a   :  { %4807 = vmax.xlane.f32.xlu1 %v4806_v49 }
0x1c6e   :  { %1733 = vadd.xlane.f32.xlu1 %v1732_v3 }
0x1c72   :  { %3273 = vadd.xlane.f32.xlu1 %v3272_v7 }
0x1cf3   :  { %v4808_v8 = vpop.xlane.xlu1 %4807 }
0x1cf4   :  { %v4809_v9 = vsub.f32 %v4803_v19, %v4808_v8 }
0x1cf6   :  { %v4810_v20 = vmul.f32 1.442695, %v4809_v9 }
0x1cf7   :  { %v1734_v31 = vpop.xlane.xlu1 %1733 }
0x1cf8   :  { %5796 = vpow2.f32 %v4810_v20 }
0x1cf9   :  { %5798 = vlog2.f32 %v1734_v31 }
0x1cfb   :  { %v3274_v26 = vpop.xlane.xlu1 %3273 }
0x1cfc   :  { %5800 = vlog2.f32 %v3274_v26 }
0x1d05   :  { %v5797_v37 = vpop.eup %5796 }
0x1d06   :  { %v5799_v2 = vpop.eup %5798  ;;  %v4812_v6 = vsel %vm955_vm6, %v5797_v37, 0.0 }
0x1d07   :  { %v1736_v61 = vmul.f32 0.6931472, %v5799_v2  ;;  %4813 = vadd.xlane.f32.xlu1 %v4812_v6 }
0x1d09   :  { %v5801_v27 = vpop.eup %5800  ;;  %v1737_v56 = vsub.f32 %v1729_v55, %v1736_v61 }
0x1d0a   :  { %v3276_v28 = vmul.f32 0.6931472, %v5801_v27 }
0x1d0b   :  { %1738 = vst.msk [vmem:[#allocation10 + $0x1] sm:$0x1] %vm955_vm6, %v1737_v56 }
0x1d0c   :  { %v3277_v29 = vsub.f32 %v3269_v51, %v3276_v28 }
0x1d0e   :  { %3278 = vst.msk [vmem:[#allocation10 + $0x3] sm:$0x1] %vm955_vm6, %v3277_v29 }
0x1d0f   :  { %5935 = shalt.err (!%p5932_p10)
}
0x1d10   :  { %4838 = dma.vmem_to_hbm [thread:$0]  %s4836_s0, 128, %s7354_s17, [#allocation12]  }
0x1d11   :  { %s6005_s19 = smov [#allocation13]  }
0x1d12   :  { %s4845_s9 = sshll.u32 %s6005_s19, 4  ;;  %s4846_s9 = int_to_ptr.vmem [resolvable:$true] %s4845_s9 }
0x1d13   :  { %s5944_s1 = scalar_lea.vmem %s4846_s9, 128  ;;  %p5949_p12 = scmp.lt.s32.totalorder %s4846_s9, %s4846_s9 }
0x1d14   :  { %p5945_p11 = scmp.ne.s32.totalorder %s4846_s9, %s5944_s1  ;;  %p5950_p13 = scmp.lt.s32.totalorder %s5944_s1, %s5944_s1 }
0x1d16   :  { %p5951_p0 = por %p5950_p13, %p5949_p12 }
0x1d18   :  { %p5952_p1 = pnand %p5951_p0, %p5945_p11 }
0x1d1a   :  { %5955 = shalt.err (!%p5952_p1)
}
0x1d1b   :  { %4848 = dma.vmem_to_hbm [thread:$0]  %s4846_s9, 128, %s7355_s18, [#allocation12]  }
0x1d1c   :  { %s6006_s22 = smov [#allocation10]  }
0x1d1d   :  { %s4825_s11 = sshll.u32 %s6006_s22, 4  ;;  %s4826_s11 = int_to_ptr.vmem [resolvable:$true] %s4825_s11 }
0x1d1e   :  { %s5964_s17 = scalar_lea.vmem %s4826_s11, 128  ;;  %p5969_p3 = scmp.lt.s32.totalorder %s4826_s11, %s4826_s11 }
0x1d1f   :  { %p5965_p2 = scmp.ne.s32.totalorder %s4826_s11, %s5964_s17  ;;  %p5970_p4 = scmp.lt.s32.totalorder %s5964_s17, %s5964_s17 }
0x1d21   :  { %p5971_p5 = por %p5970_p4, %p5969_p3 }
0x1d23   :  { %p5972_p6 = pnand %p5971_p5, %p5965_p2 }
0x1d90   :  { %v4814_v14 = vpop.xlane.xlu1 %4813 }
0x1d91   :  { %5802 = vlog2.f32 %v4814_v14 }
0x1d9e   :  { %v5803_v16 = vpop.eup %5802 }
0x1d9f   :  { %v4816_v32 = vmul.f32 0.6931472, %v5803_v16 }
0x1da1   :  { %v4817_v5 = vsub.f32 %v4809_v9, %v4816_v32 }
0x1da3   :  { %4818 = vst.msk [vmem:[#allocation10 + $0x5] sm:$0x1] %vm955_vm6, %v4817_v5 }
0x1da4   :  { %5975 = shalt.err (!%p5972_p6)
}
0x1da5   :  { %4828 = dma.vmem_to_hbm [thread:$0]  %s4826_s11, 128, %s7353_s16, [#allocation6]  }
0x1da6   :  { %5990 = dma.done.wait [#allocation6], 128  }
0x1da7   :  { %5991 = vsyncadd [#allocation6], 4294967168 }
0x1da8   :  { %5992 = dma.done.wait [#allocation12], 256  }
0x1da9   :  { %5993 = vsyncadd [#allocation12], 4294967040 }
0x1daa   :  { %4858 = vsyncpa [#allocation5], 1 }
0x1dab   :  { %4859 = vsyncpa [#allocation8], 1 }
0x1dac   :  { %4860 = vsyncpa [#allocation6], 1 }
0x1dad   :  { %4861 = vsyncpa [#allocation12], 1 }

</bundles_post_ra>
